<compile_context>
chip_gen: v6e
topology: v6e:2x2x1
jax: 0.10.0
libtpu: 0.0.40
codegen_flags: <defaults>
</compile_context>

<pallas_src>
import functools

import jax
import jax.numpy as jnp
from jax.experimental import pallas as pl
from jax.experimental.pallas import tpu as pltpu


def _round_up(a, b):
    return (a + b - 1) // b * b


@functools.lru_cache(maxsize=None)
def _vmem_limit_bytes():
    """Raise the scoped-VMEM limit (defaults: 16 MiB v5e / 32 MiB v6e,v7x) but
    leave headroom under physical capacity (128 MiB v5e/v6e, 64 MiB v7x)."""
    cap = 128 * 1024 * 1024
    try:
        cap = int(pltpu.get_tpu_info().vmem_capacity_bytes)
    except Exception:
        pass
    return int(min(100 * 1024 * 1024, cap * 3 // 4))


# ----------------------------------------------------------------------------
# In-kernel 3x3 'same' conv on padded-flat data
# ----------------------------------------------------------------------------
def _conv3x3_mxu(x, w, Wp, L):
    """3x3 'same' conv as 3 accumulating MXU contractions.

    x: (Cin_p, L) float (zero border / zero tail).
    w: (3*Cout_p, 3*Cin_p) bf16; row block kh -> (Cout_p, 3*Cin_p), column
       index = kw*Cin_p + cin.
    Returns (Cout_p, L) f32.  Output at flat position p (interior only; the
    caller masks the border) is sum_{kh,kw,cin} w * x[cin, p+(kh-1)*Wp+(kw-1)].
    Tap shifts use pltpu.roll (np.roll semantics); circular wrap only touches
    border/tail positions which are masked afterwards.
    """
    cout = w.shape[0] // 3
    xf = x.astype(jnp.float32)          # roll in f32; cast taps to bf16 for the MXU
    taps = []
    for kw in range(3):
        s = (1 - kw) % L                # out[p] = x[p + (kw-1)]  ->  roll by -(kw-1)
        t = xf if s == 0 else pltpu.roll(xf, shift=s, axis=1)
        taps.append(t.astype(jnp.bfloat16))
    slab = jnp.concatenate(taps, axis=0)                      # (3*Cin_p, L) bf16
    acc = None
    for kh in range(3):
        part = jnp.dot(w[kh * cout:(kh + 1) * cout, :], slab,
                       preferred_element_type=jnp.float32)    # (Cout_p, L) f32
        s = (-(kh - 1) * Wp) % L        # roll partial result by -(kh-1)*Wp
        if s:
            part = pltpu.roll(part, shift=s, axis=1)
        acc = part if acc is None else acc + part
    return acc


# ----------------------------------------------------------------------------
# Kernels
# ----------------------------------------------------------------------------
def _conv3x3_kernel(x_ref, mask_ref, w_ref, b_ref, o_ref, *, Wp, L):
    x = x_ref[0]
    y = _conv3x3_mxu(x, w_ref[...], Wp, L) + b_ref[...]
    o_ref[0] = (y * mask_ref[...]).astype(o_ref.dtype)        # keep zero border


def _trunk_kernel(x_ref, mask_ref, w1_ref, w2_ref, sp_ref, o_ref,
                  acc_ref, res_ref, *, Wp, L, inv_hw, num_rcab, Cr):
    """Whole RCAN trunk: grid axis 1 runs, per residual group, num_rcab RCAB
    layers then the RG tail conv (+RG skip); the very last layer is conv1 +
    the global skip.  Running activation `acc` and the per-RG residual `res`
    live in f32 VMEM scratch; only the final result hits HBM.

    Small-params block sp (C, 128) f32 layout:
      col 0: conv-A bias | col 1: RCAB conv2 bias | col 2: CA b2
      cols 3..3+Cr-1: CA w1 (stored [c, j] = torch_w1[j, c])
      cols 3+Cr..3+2Cr-1: CA w2 ([c, j] = torch_w2[c, j])
      cols 3+2Cr..3+3Cr-1: CA b1 (replicated over rows)
    """
    l = pl.program_id(1)
    last = pl.num_programs(1) - 1
    mask = mask_ref[...]                                       # (1, L) f32

    @pl.when(l == 0)
    def _():
        xf = x_ref[0].astype(jnp.float32)
        acc_ref[...] = xf                                      # running activation
        res_ref[...] = xf                                      # RG-level residual

    r = l % (num_rcab + 1)
    is_final = l == last
    is_tail = jnp.logical_and(r == num_rcab, jnp.logical_not(is_final))
    is_rcab = jnp.logical_and(r != num_rcab, jnp.logical_not(is_final))

    acc = acc_ref[...]                                         # (C, L) f32, zero border
    sp = sp_ref[0]                                             # (C, 128) f32
    # Conv A of this layer (RCAB conv1 / RG tail conv / final conv1) + bias.
    y1 = _conv3x3_mxu(acc, w1_ref[0], Wp, L) + sp[:, 0:1]

    @pl.when(is_rcab)
    def _():
        # ---- RCAB: SiLU -> conv2 -> channel attention -> residual add ----
        y = y1 * jax.nn.sigmoid(y1)                            # SiLU (f32)
        y = y * mask                                           # zero border for conv2
        y2 = _conv3x3_mxu(y, w2_ref[0], Wp, L) + sp[:, 1:2]
        # Channel attention on the VPU/XLU (no MXU): global average pool over
        # valid pixels, two tiny projections, sigmoid gate, channel rescale.
        pooled = jnp.sum(y2 * mask, axis=1, keepdims=True) * inv_hw          # (C,1)
        caw1 = sp[:, 3:3 + Cr]
        caw2 = sp[:, 3 + Cr:3 + 2 * Cr]
        cab1 = sp[0:1, 3 + 2 * Cr:3 + 3 * Cr]                                # (1,Cr)
        cab2 = sp[:, 2:3]                                                    # (C,1)
        h = jnp.sum(caw1 * pooled, axis=0, keepdims=True) + cab1             # (1,Cr)
        h = h * jax.nn.sigmoid(h)                              # SiLU
        s = jax.nn.sigmoid(jnp.sum(caw2 * h, axis=1, keepdims=True) + cab2)  # (C,1)
        acc_ref[...] = (acc + y2 * s) * mask                   # RCAB skip

    @pl.when(is_tail)
    def _():
        # ---- RG tail conv (no activation) + RG-level residual add ----
        new = (res_ref[...] + y1) * mask
        acc_ref[...] = new
        res_ref[...] = new                                     # residual for next RG

    @pl.when(is_final)
    def _():
        # ---- conv1 (no activation) + global skip (sf output == trunk input) ----
        o_ref[0] = ((x_ref[0].astype(jnp.float32) + y1) * mask).astype(o_ref.dtype)


# ----------------------------------------------------------------------------
# Pallas wrappers
# ----------------------------------------------------------------------------
def conv3x3_flat(x, w, b, mask, *, W, out_dtype):
    """Single fused 3x3 'same' conv on padded-flat activations."""
    N, cin_p, L = x.shape
    cout_p = w.shape[0] // 3
    assert w.shape[1] == 3 * cin_p, (w.shape, cin_p)
    kernel = functools.partial(_conv3x3_kernel, Wp=W + 2, L=L)
    return pl.pallas_call(
        kernel,
        out_shape=jax.ShapeDtypeStruct((N, cout_p, L), out_dtype),
        grid=(N,),
        in_specs=[
            pl.BlockSpec((1, cin_p, L), lambda n: (n, 0, 0)),
            pl.BlockSpec((1, L), lambda n: (0, 0)),
            pl.BlockSpec((3 * cout_p, 3 * cin_p), lambda n: (0, 0)),
            pl.BlockSpec((cout_p, 1), lambda n: (0, 0)),
        ],
        out_specs=pl.BlockSpec((1, cout_p, L), lambda n: (n, 0, 0)),
        compiler_params=pltpu.CompilerParams(
            dimension_semantics=("parallel",),
            vmem_limit_bytes=_vmem_limit_bytes()),
    )(x, mask, w, b)


def trunk_forward_flat(x, tp, mask, *, H, W, num_rcab, Cr):
    """Whole trunk (all RGs + conv1 + global skip) as one pallas_call."""
    N, C, L = x.shape
    T, wr, wc = tp["w1s"].shape
    SPW = tp["sps"].shape[-1]
    kernel = functools.partial(_trunk_kernel, Wp=W + 2, L=L,
                               inv_hw=1.0 / float(H * W),
                               num_rcab=num_rcab, Cr=Cr)
    return pl.pallas_call(
        kernel,
        out_shape=jax.ShapeDtypeStruct((N, C, L), jnp.bfloat16),
        grid=(N, T),
        in_specs=[
            pl.BlockSpec((1, C, L), lambda n, l: (n, 0, 0)),     # sf output (also global skip)
            pl.BlockSpec((1, L), lambda n, l: (0, 0)),           # interior mask
            pl.BlockSpec((1, wr, wc), lambda n, l: (l, 0, 0)),   # conv-A weights (bf16)
            pl.BlockSpec((1, wr, wc), lambda n, l: (l, 0, 0)),   # conv-B weights (bf16)
            pl.BlockSpec((1, C, SPW), lambda n, l: (l, 0, 0)),   # packed small params (f32)
        ],
        out_specs=pl.BlockSpec((1, C, L), lambda n, l: (n, 0, 0)),
        scratch_shapes=[pltpu.VMEM((C, L), jnp.float32),         # acc
                        pltpu.VMEM((C, L), jnp.float32)],        # RG residual
        compiler_params=pltpu.CompilerParams(
            dimension_semantics=("parallel", "arbitrary"),
            vmem_limit_bytes=_vmem_limit_bytes()),
    )(x, mask, tp["w1s"], tp["w2s"], tp["sps"])


# ----------------------------------------------------------------------------
# Plain-JAX glue: layout conversion, PixelShuffle, masks
# ----------------------------------------------------------------------------
def to_padded_flat(x, channels=None, dtype=jnp.bfloat16):
    """(N, C, H, W) -> (N, Cp, L) padded-flat with zero border / zero tail."""
    N, C, H, W = x.shape
    Cp = channels or C
    Hp, Wp = H + 2, W + 2
    L = _round_up(Hp * Wp, 128)
    xp = jnp.pad(x, ((0, 0), (0, Cp - C), (1, 1), (1, 1)))
    xf = xp.reshape(N, Cp, Hp * Wp)
    if L > Hp * Wp:
        xf = jnp.pad(xf, ((0, 0), (0, 0), (0, L - Hp * Wp)))
    return xf.astype(dtype)


def from_padded_flat(xf, H, W):
    """(N, C, L) padded-flat -> (N, C, H, W)."""
    N, C, _ = xf.shape
    Hp, Wp = H + 2, W + 2
    x = xf[:, :, :Hp * Wp].reshape(N, C, Hp, Wp)
    return x[:, :, 1:H + 1, 1:W + 1]


def _make_interior_mask(H, W):
    Hp, Wp = H + 2, W + 2
    L = _round_up(Hp * Wp, 128)
    m = jnp.zeros((Hp, Wp), jnp.float32).at[1:H + 1, 1:W + 1].set(1.0)
    m = m.reshape(1, Hp * Wp)
    if L > Hp * Wp:
        m = jnp.pad(m, ((0, 0), (0, L - Hp * Wp)))
    return m


def upshuffle_padded_flat(xf, H, W, scale):
    """PixelShuffle directly between padded-flat layouts with a single
    transpose: (N, C*s*s, L@HxW) -> (N, C, L2@(H*s)x(W*s))."""
    N, Css, _ = xf.shape
    s = scale
    C = Css // (s * s)
    Hp, Wp = H + 2, W + 2
    x = xf[:, :, :Hp * Wp].reshape(N, C, s, s, Hp, Wp)
    x = x[:, :, :, :, 1:H + 1, 1:W + 1]                    # (N, C, s, s, H, W)
    x = jnp.transpose(x, (0, 1, 4, 2, 5, 3))               # (N, C, H, s, W, s)
    x = x.reshape(N, C, H * s, W * s)
    Hs, Ws = H * s, W * s
    Hsp, Wsp = Hs + 2, Ws + 2
    L2 = _round_up(Hsp * Wsp, 128)
    x = jnp.pad(x, ((0, 0), (0, 0), (1, 1), (1, 1))).reshape(N, C, Hsp * Wsp)
    if L2 > Hsp * Wsp:
        x = jnp.pad(x, ((0, 0), (0, 0), (0, L2 - Hsp * Wsp)))
    return x


# ----------------------------------------------------------------------------
# Parameter initialization (deterministic, synthetic)
# ----------------------------------------------------------------------------
def _init_conv_w(key, cin, cout, k=3):
    fan_in = cin * k * k
    return jax.random.normal(key, (k, k, cin, cout), jnp.float32) / jnp.sqrt(float(fan_in))


def _pack_conv_w(w, cin_pad=None, cout_pad=None):
    """(3,3,Cin,Cout) HWIO -> (3*Cout_p, 3*Cin_p) bf16.  Row = kh*Cout_p+cout,
    col = kw*Cin_p+cin.  Channels padded to multiples of 16 so bf16 sublane
    slices stay packed-group aligned."""
    kh, kw, cin, cout = w.shape
    cin_p = cin_pad or _round_up(cin, 16)
    cout_p = cout_pad or _round_up(cout, 16)
    w = jnp.pad(w, ((0, 0), (0, 0), (0, cin_p - cin), (0, cout_p - cout)))
    w = jnp.transpose(w, (0, 3, 1, 2)).reshape(kh * cout_p, kw * cin_p)
    return w.astype(jnp.bfloat16)


def init_rcan_params(key, num_channels, filters, scale, num_rg, num_rcab, reduction):
    C = filters
    Cr = max(C // reduction, 1)
    assert C % 16 == 0, "filters must be a multiple of 16 for bf16 packing"
    SPW = 128
    assert 3 + 3 * Cr <= SPW
    cin_img = _round_up(num_channels, 16)

    n_keys = 4 + num_rg * (4 * num_rcab + 1) + 4
    keys = iter(jax.random.split(key, n_keys))

    def conv_w(cin, cout, cin_pad=None):
        return _pack_conv_w(_init_conv_w(next(keys), cin, cout), cin_pad=cin_pad)

    def small_block(b1, b2=None, caw1=None, caw2=None, cab1=None, cab2=None):
        sp = jnp.zeros((C, SPW), jnp.float32)
        sp = sp.at[:, 0].set(b1)
        if b2 is not None:
            sp = sp.at[:, 1].set(b2)
        if cab2 is not None:
            sp = sp.at[:, 2].set(cab2)
        if caw1 is not None:
            sp = sp.at[:, 3:3 + Cr].set(caw1)
        if caw2 is not None:
            sp = sp.at[:, 3 + Cr:3 + 2 * Cr].set(caw2)
        if cab1 is not None:
            sp = sp.at[:, 3 + 2 * Cr:3 + 3 * Cr].set(jnp.broadcast_to(cab1, (C, Cr)))
        return sp

    p = {}
    p["sf_w"] = _pack_conv_w(_init_conv_w(next(keys), num_channels, C), cin_pad=cin_img)
    p["sf_b"] = jnp.full((C, 1), 0.01, jnp.float32)

    bias = jnp.full((C,), 0.01, jnp.float32)
    zero_w = jnp.zeros((3 * C, 3 * C), jnp.bfloat16)
    w1s, w2s, sps = [], [], []
    for _ in range(num_rg):
        for _ in range(num_rcab):
            w1s.append(conv_w(C, C))
            w2s.append(conv_w(C, C))
            caw1 = jax.random.normal(next(keys), (C, Cr), jnp.float32) / jnp.sqrt(float(C))
            caw2 = jax.random.normal(next(keys), (C, Cr), jnp.float32) / jnp.sqrt(float(Cr))
            cab1 = jnp.full((1, Cr), 0.01, jnp.float32)
            sps.append(small_block(bias, bias, caw1, caw2, cab1, bias))
        # RG tail conv (stored as an extra "layer"; conv-B slot unused).
        w1s.append(conv_w(C, C))
        w2s.append(zero_w)
        sps.append(small_block(bias))
    # Final trunk layer: conv1 + global skip.
    w1s.append(conv_w(C, C))
    w2s.append(zero_w)
    sps.append(small_block(bias))
    p["trunk"] = {"w1s": jnp.stack(w1s), "w2s": jnp.stack(w2s), "sps": jnp.stack(sps)}

    p["up_w"] = conv_w(C, C * scale * scale)
    p["up_b"] = jnp.full((C * scale * scale, 1), 0.01, jnp.float32)
    cout2_p = _round_up(num_channels, 16)
    p["c2_w"] = conv_w(C, num_channels)                      # cout padded to cout2_p
    p["c2_b"] = jnp.zeros((cout2_p, 1), jnp.float32).at[:num_channels].set(0.01)
    return p


# ----------------------------------------------------------------------------
# Forward pass (matches rcan.forward, ndim=2, upscaling_layer=True)
# ----------------------------------------------------------------------------
def rcan_forward(x_nchw, params, *, scale, num_rcab, reduction):
    N, num_channels, H, W = x_nchw.shape
    C = params["sf_b"].shape[0]
    Cr = max(C // reduction, 1)
    cin_img = params["sf_w"].shape[1] // 3
    mask = _make_interior_mask(H, W)

    x = to_padded_flat(x_nchw, channels=cin_img, dtype=jnp.bfloat16)   # (N, Cin_p, L)
    x = conv3x3_flat(x, params["sf_w"], params["sf_b"], mask, W=W,
                     out_dtype=jnp.bfloat16)                           # shallow feature
    x = trunk_forward_flat(x, params["trunk"], mask, H=H, W=W,
                           num_rcab=num_rcab, Cr=Cr)                   # RGs + conv1 + skip
    x = conv3x3_flat(x, params["up_w"], params["up_b"], mask, W=W,
                     out_dtype=jnp.bfloat16)                           # upscale conv

    x = upshuffle_padded_flat(x, H, W, scale)                          # PixelShuffle (one transpose)
    H2, W2 = H * scale, W * scale
    mask2 = _make_interior_mask(H2, W2)
    y = conv3x3_flat(x, params["c2_w"], params["c2_b"], mask2, W=W2,
                     out_dtype=jnp.float32)                            # final conv
    return from_padded_flat(y, H2, W2)[:, :num_channels]               # drop padded channels


# ----------------------------------------------------------------------------
if __name__ == "__main__":
    # Small configuration consistent with the module's constructor.
    N, C_in, H, W = 2, 3, 16, 16
    filters, scale, num_rg, num_rcab, reduction = 16, 2, 2, 2, 4

    key = jax.random.PRNGKey(0)
    kx, kp = jax.random.split(key)
    x = jax.random.normal(kx, (N, C_in, H, W), jnp.float32)            # NCHW, like PyTorch
    params = init_rcan_params(kp, C_in, filters, scale, num_rg, num_rcab, reduction)

    fwd = jax.jit(functools.partial(rcan_forward, scale=scale,
                                    num_rcab=num_rcab, reduction=reduction))
    out = jax.block_until_ready(fwd(x, params))

    assert out.shape == (N, C_in, H * scale, W * scale), out.shape
    assert bool(jnp.all(jnp.isfinite(out)))
    print("KERNEL_OK")
</pallas_src>

<mosaic_0001>
module attributes {stable_mosaic.version = 11 : i64} {
  func.func @_conv3x3_kernel(%arg0: i32, %arg1: memref<1x16x384xbf16, #tpu.memory_space<vmem>>, %arg2: memref<1x384xf32, #tpu.memory_space<vmem>>, %arg3: memref<48x48xbf16, #tpu.memory_space<vmem>>, %arg4: memref<16x1xf32, #tpu.memory_space<vmem>>, %arg5: memref<1x16x384xbf16, #tpu.memory_space<vmem>>) attributes {dimension_semantics = [#tpu.dimension_semantics<parallel>], iteration_bounds = array<i64: 2>, scalar_prefetch = 0 : i64, scratch_operands = 0 : i64, tpu.core_type = #tpu.core_type<tc>, window_params = [{transform_indices = @transform_0, window_bounds = array<i64: 1, 16, 384>}, {pipeline_mode = #tpu.pipeline_mode<synchronous>, transform_indices = @transform_1, window_bounds = array<i64: 1, 384>}, {pipeline_mode = #tpu.pipeline_mode<synchronous>, transform_indices = @transform_2, window_bounds = array<i64: 48, 48>}, {pipeline_mode = #tpu.pipeline_mode<synchronous>, transform_indices = @transform_3, window_bounds = array<i64: 16, 1>}, {transform_indices = @transform_4, window_bounds = array<i64: 1, 16, 384>}]} {
    %c0 = arith.constant 0 : index
    %c0_0 = arith.constant 0 : index
    %c0_1 = arith.constant 0 : index
    %0 = vector.load %arg1[%c0, %c0_0, %c0_1] : memref<1x16x384xbf16, #tpu.memory_space<vmem>>, vector<1x16x384xbf16>
    %1 = vector.shape_cast %0 : vector<1x16x384xbf16> to vector<16x384xbf16>
    %c0_2 = arith.constant 0 : index
    %c0_3 = arith.constant 0 : index
    %2 = vector.load %arg3[%c0_2, %c0_3] : memref<48x48xbf16, #tpu.memory_space<vmem>>, vector<48x48xbf16>
    %3 = arith.extf %1 : vector<16x384xbf16> to vector<16x384xf32>
    %c1_i32 = arith.constant 1 : i32
    %4 = tpu.dynamic_rotate %3 by %c1_i32 dim 1 : vector<16x384xf32>, i32 -> vector<16x384xf32>
    %5 = arith.truncf %4 : vector<16x384xf32> to vector<16x384xbf16>
    %6 = arith.truncf %3 : vector<16x384xf32> to vector<16x384xbf16>
    %c383_i32 = arith.constant 383 : i32
    %7 = tpu.dynamic_rotate %3 by %c383_i32 dim 1 : vector<16x384xf32>, i32 -> vector<16x384xf32>
    %8 = arith.truncf %7 : vector<16x384xf32> to vector<16x384xbf16>
    %9 = tpu.concatenate %5, %6, %8 in 0 : vector<16x384xbf16>, vector<16x384xbf16>, vector<16x384xbf16> -> vector<48x384xbf16>
    %10 = vector.extract_strided_slice %2 {offsets = [0, 0], sizes = [16, 48], strides = [1, 1]} : vector<48x48xbf16> to vector<16x48xbf16>
    %cst = arith.constant dense<0.000000e+00> : vector<16x384xf32>
    %11 = tpu.matmul %10, %9, %cst {dimension_numbers = #tpu.dot_dimension_numbers<[1], [0], [0], [1], [0, 0, 1, 1], [], []>} : vector<16x48xbf16>, vector<48x384xbf16>, vector<16x384xf32> -> vector<16x384xf32>
    %c18_i32 = arith.constant 18 : i32
    %12 = tpu.dynamic_rotate %11 by %c18_i32 dim 1 : vector<16x384xf32>, i32 -> vector<16x384xf32>
    %13 = vector.extract_strided_slice %2 {offsets = [16, 0], sizes = [16, 48], strides = [1, 1]} : vector<48x48xbf16> to vector<16x48xbf16>
    %cst_4 = arith.constant dense<0.000000e+00> : vector<16x384xf32>
    %14 = tpu.matmul %13, %9, %cst_4 {dimension_numbers = #tpu.dot_dimension_numbers<[1], [0], [0], [1], [0, 0, 1, 1], [], []>} : vector<16x48xbf16>, vector<48x384xbf16>, vector<16x384xf32> -> vector<16x384xf32>
    %15 = arith.addf %12, %14 : vector<16x384xf32>
    %16 = vector.extract_strided_slice %2 {offsets = [32, 0], sizes = [16, 48], strides = [1, 1]} : vector<48x48xbf16> to vector<16x48xbf16>
    %cst_5 = arith.constant dense<0.000000e+00> : vector<16x384xf32>
    %17 = tpu.matmul %16, %9, %cst_5 {dimension_numbers = #tpu.dot_dimension_numbers<[1], [0], [0], [1], [0, 0, 1, 1], [], []>} : vector<16x48xbf16>, vector<48x384xbf16>, vector<16x384xf32> -> vector<16x384xf32>
    %c366_i32 = arith.constant 366 : i32
    %18 = tpu.dynamic_rotate %17 by %c366_i32 dim 1 : vector<16x384xf32>, i32 -> vector<16x384xf32>
    %19 = arith.addf %15, %18 : vector<16x384xf32>
    %c0_6 = arith.constant 0 : index
    %c0_7 = arith.constant 0 : index
    %20 = vector.load %arg4[%c0_6, %c0_7] : memref<16x1xf32, #tpu.memory_space<vmem>>, vector<16x1xf32>
    %21 = vector.broadcast %20 : vector<16x1xf32> to vector<16x384xf32>
    %22 = arith.addf %19, %21 : vector<16x384xf32>
    %c0_8 = arith.constant 0 : index
    %c0_9 = arith.constant 0 : index
    %23 = vector.load %arg2[%c0_8, %c0_9] : memref<1x384xf32, #tpu.memory_space<vmem>>, vector<1x384xf32>
    %24 = vector.broadcast %23 : vector<1x384xf32> to vector<16x384xf32>
    %25 = arith.mulf %22, %24 : vector<16x384xf32>
    %26 = arith.truncf %25 : vector<16x384xf32> to vector<16x384xbf16>
    %c0_10 = arith.constant 0 : index
    %c0_11 = arith.constant 0 : index
    %c0_12 = arith.constant 0 : index
    %27 = vector.load %arg5[%c0_10, %c0_11, %c0_12] : memref<1x16x384xbf16, #tpu.memory_space<vmem>>, vector<1x16x384xbf16>
    %28 = vector.shape_cast %27 : vector<1x16x384xbf16> to vector<16x384xbf16>
    %29 = vector.shape_cast %26 : vector<16x384xbf16> to vector<1x16x384xbf16>
    tpu.vector_store %arg5[%c0_10, %c0_11, %c0_12], %29 {strides = array<i32>} : memref<1x16x384xbf16, #tpu.memory_space<vmem>>, vector<1x16x384xbf16>,
    return
  }
  func.func @transform_0(%arg0: i32) -> (i32, i32, i32) {
    %c0_i32 = arith.constant 0 : i32
    %c0_i32_0 = arith.constant 0 : i32
    %c0_i32_1 = arith.constant 0 : i32
    return %arg0, %c0_i32, %c0_i32_0 : i32, i32, i32
  }
  func.func @transform_1(%arg0: i32) -> (i32, i32) {
    %c0_i32 = arith.constant 0 : i32
    %c0_i32_0 = arith.constant 0 : i32
    %c0_i32_1 = arith.constant 0 : i32
    return %c0_i32, %c0_i32_0 : i32, i32
  }
  func.func @transform_2(%arg0: i32) -> (i32, i32) {
    %c0_i32 = arith.constant 0 : i32
    %c0_i32_0 = arith.constant 0 : i32
    %c0_i32_1 = arith.constant 0 : i32
    return %c0_i32, %c0_i32_0 : i32, i32
  }
  func.func @transform_3(%arg0: i32) -> (i32, i32) {
    %c0_i32 = arith.constant 0 : i32
    %c0_i32_0 = arith.constant 0 : i32
    %c0_i32_1 = arith.constant 0 : i32
    return %c0_i32, %c0_i32_0 : i32, i32
  }
  func.func @transform_4(%arg0: i32) -> (i32, i32, i32) {
    %c0_i32 = arith.constant 0 : i32
    %c0_i32_0 = arith.constant 0 : i32
    %c0_i32_1 = arith.constant 0 : i32
    return %arg0, %c0_i32, %c0_i32_0 : i32, i32, i32
  }
}

module attributes {stable_mosaic.version = 11 : i64} {
  func.func @_trunk_kernel(%arg0: i32, %arg1: i32, %arg2: memref<1x16x384xbf16, #tpu.memory_space<vmem>>, %arg3: memref<1x384xf32, #tpu.memory_space<vmem>>, %arg4: memref<1x48x48xbf16, #tpu.memory_space<vmem>>, %arg5: memref<1x48x48xbf16, #tpu.memory_space<vmem>>, %arg6: memref<1x16x128xf32, #tpu.memory_space<vmem>>, %arg7: memref<1x16x384xbf16, #tpu.memory_space<vmem>>, %arg8: memref<16x384xf32, #tpu.memory_space<vmem>>, %arg9: memref<16x384xf32, #tpu.memory_space<vmem>>) attributes {dimension_semantics = [#tpu.dimension_semantics<parallel>, #tpu.dimension_semantics<arbitrary>], iteration_bounds = array<i64: 2, 7>, scalar_prefetch = 0 : i64, scratch_operands = 2 : i64, tpu.core_type = #tpu.core_type<tc>, window_params = [{transform_indices = @transform_0, window_bounds = array<i64: 1, 16, 384>}, {pipeline_mode = #tpu.pipeline_mode<synchronous>, transform_indices = @transform_1, window_bounds = array<i64: 1, 384>}, {transform_indices = @transform_2, window_bounds = array<i64: 1, 48, 48>}, {transform_indices = @transform_3, window_bounds = array<i64: 1, 48, 48>}, {transform_indices = @transform_4, window_bounds = array<i64: 1, 16, 128>}, {transform_indices = @transform_5, window_bounds = array<i64: 1, 16, 384>}]} {
    %c0 = arith.constant 0 : index
    %c0_0 = arith.constant 0 : index
    %0 = vector.load %arg3[%c0, %c0_0] : memref<1x384xf32, #tpu.memory_space<vmem>>, vector<1x384xf32>
    %c0_i32 = arith.constant 0 : i32
    %1 = arith.cmpi eq, %arg1, %c0_i32 : i32
    %2 = arith.extui %1 : i1 to i32
    %c0_i32_1 = arith.constant 0 : i32
    %3 = arith.cmpi ne, %2, %c0_i32_1 : i32
    scf.if %3 {
      %c0_22 = arith.constant 0 : index
      %c0_23 = arith.constant 0 : index
      %c0_24 = arith.constant 0 : index
      %51 = vector.load %arg2[%c0_22, %c0_23, %c0_24] : memref<1x16x384xbf16, #tpu.memory_space<vmem>>, vector<1x16x384xbf16>
      %52 = vector.shape_cast %51 : vector<1x16x384xbf16> to vector<16x384xbf16>
      %53 = arith.extf %52 : vector<16x384xbf16> to vector<16x384xf32>
      %c0_25 = arith.constant 0 : index
      %c0_26 = arith.constant 0 : index
      %54 = vector.load %arg8[%c0_25, %c0_26] : memref<16x384xf32, #tpu.memory_space<vmem>>, vector<16x384xf32>
      tpu.vector_store %arg8[%c0_25, %c0_26], %53 {strides = array<i32>} : memref<16x384xf32, #tpu.memory_space<vmem>>, vector<16x384xf32>,
      %c0_27 = arith.constant 0 : index
      %c0_28 = arith.constant 0 : index
      %55 = vector.load %arg9[%c0_27, %c0_28] : memref<16x384xf32, #tpu.memory_space<vmem>>, vector<16x384xf32>
      tpu.vector_store %arg9[%c0_27, %c0_28], %53 {strides = array<i32>} : memref<16x384xf32, #tpu.memory_space<vmem>>, vector<16x384xf32>,
    } else {
    }
    %c3_i32 = arith.constant 3 : i32
    %c0_i32_2 = arith.constant 0 : i32
    %4 = arith.cmpi eq, %c3_i32, %c0_i32_2 : i32
    %c1_i32 = arith.constant 1 : i32
    %5 = arith.select %4, %c1_i32, %c3_i32 : i32
    %6 = arith.remsi %arg1, %5 : i32
    %c0_i32_3 = arith.constant 0 : i32
    %7 = arith.cmpi ne, %6, %c0_i32_3 : i32
    %c0_i32_4 = arith.constant 0 : i32
    %8 = arith.cmpi slt, %6, %c0_i32_4 : i32
    %c0_i32_5 = arith.constant 0 : i32
    %9 = arith.cmpi slt, %5, %c0_i32_5 : i32
    %10 = arith.xori %8, %9 : i1
    %11 = arith.andi %10, %7 : i1
    %12 = arith.addi %6, %5 : i32
    %13 = arith.select %11, %12, %6 : i32
    %c6_i32 = arith.constant 6 : i32
    %14 = arith.cmpi eq, %arg1, %c6_i32 : i32
    %c2_i32 = arith.constant 2 : i32
    %15 = arith.cmpi eq, %13, %c2_i32 : i32
    %true = arith.constant true
    %16 = arith.xori %14, %true : i1
    %17 = arith.andi %15, %16 : i1
    %c2_i32_6 = arith.constant 2 : i32
    %18 = arith.cmpi ne, %13, %c2_i32_6 : i32
    %true_7 = arith.constant true
    %19 = arith.xori %14, %true_7 : i1
    %20 = arith.andi %18, %19 : i1
    %c0_8 = arith.constant 0 : index
    %c0_9 = arith.constant 0 : index
    %21 = vector.load %arg8[%c0_8, %c0_9] : memref<16x384xf32, #tpu.memory_space<vmem>>, vector<16x384xf32>
    %c0_10 = arith.constant 0 : index
    %c0_11 = arith.constant 0 : index
    %c0_12 = arith.constant 0 : index
    %22 = vector.load %arg6[%c0_10, %c0_11, %c0_12] : memref<1x16x128xf32, #tpu.memory_space<vmem>>, vector<1x16x128xf32>
    %23 = vector.shape_cast %22 : vector<1x16x128xf32> to vector<16x128xf32>
    %c0_13 = arith.constant 0 : index
    %c0_14 = arith.constant 0 : index
    %c0_15 = arith.constant 0 : index
    %24 = vector.load %arg4[%c0_13, %c0_14, %c0_15] : memref<1x48x48xbf16, #tpu.memory_space<vmem>>, vector<1x48x48xbf16>
    %25 = vector.shape_cast %24 : vector<1x48x48xbf16> to vector<48x48xbf16>
    %c1_i32_16 = arith.constant 1 : i32
    %26 = tpu.dynamic_rotate %21 by %c1_i32_16 dim 1 : vector<16x384xf32>, i32 -> vector<16x384xf32>
    %27 = arith.truncf %26 : vector<16x384xf32> to vector<16x384xbf16>
    %28 = arith.truncf %21 : vector<16x384xf32> to vector<16x384xbf16>
    %c383_i32 = arith.constant 383 : i32
    %29 = tpu.dynamic_rotate %21 by %c383_i32 dim 1 : vector<16x384xf32>, i32 -> vector<16x384xf32>
    %30 = arith.truncf %29 : vector<16x384xf32> to vector<16x384xbf16>
    %31 = tpu.concatenate %27, %28, %30 in 0 : vector<16x384xbf16>, vector<16x384xbf16>, vector<16x384xbf16> -> vector<48x384xbf16>
    %32 = vector.extract_strided_slice %25 {offsets = [0, 0], sizes = [16, 48], strides = [1, 1]} : vector<48x48xbf16> to vector<16x48xbf16>
    %cst = arith.constant dense<0.000000e+00> : vector<16x384xf32>
    %33 = tpu.matmul %32, %31, %cst {dimension_numbers = #tpu.dot_dimension_numbers<[1], [0], [0], [1], [0, 0, 1, 1], [], []>} : vector<16x48xbf16>, vector<48x384xbf16>, vector<16x384xf32> -> vector<16x384xf32>
    %c18_i32 = arith.constant 18 : i32
    %34 = tpu.dynamic_rotate %33 by %c18_i32 dim 1 : vector<16x384xf32>, i32 -> vector<16x384xf32>
    %35 = vector.extract_strided_slice %25 {offsets = [16, 0], sizes = [16, 48], strides = [1, 1]} : vector<48x48xbf16> to vector<16x48xbf16>
    %cst_17 = arith.constant dense<0.000000e+00> : vector<16x384xf32>
    %36 = tpu.matmul %35, %31, %cst_17 {dimension_numbers = #tpu.dot_dimension_numbers<[1], [0], [0], [1], [0, 0, 1, 1], [], []>} : vector<16x48xbf16>, vector<48x384xbf16>, vector<16x384xf32> -> vector<16x384xf32>
    %37 = arith.addf %34, %36 : vector<16x384xf32>
    %38 = vector.extract_strided_slice %25 {offsets = [32, 0], sizes = [16, 48], strides = [1, 1]} : vector<48x48xbf16> to vector<16x48xbf16>
    %cst_18 = arith.constant dense<0.000000e+00> : vector<16x384xf32>
    %39 = tpu.matmul %38, %31, %cst_18 {dimension_numbers = #tpu.dot_dimension_numbers<[1], [0], [0], [1], [0, 0, 1, 1], [], []>} : vector<16x48xbf16>, vector<48x384xbf16>, vector<16x384xf32> -> vector<16x384xf32>
    %c366_i32 = arith.constant 366 : i32
    %40 = tpu.dynamic_rotate %39 by %c366_i32 dim 1 : vector<16x384xf32>, i32 -> vector<16x384xf32>
    %41 = arith.addf %37, %40 : vector<16x384xf32>
    %42 = vector.extract_strided_slice %23 {offsets = [0, 0], sizes = [16, 1], strides = [1, 1]} : vector<16x128xf32> to vector<16x1xf32>
    %43 = vector.broadcast %42 : vector<16x1xf32> to vector<16x384xf32>
    %44 = arith.addf %41, %43 : vector<16x384xf32>
    %45 = arith.extui %20 : i1 to i32
    %c0_i32_19 = arith.constant 0 : i32
    %46 = arith.cmpi ne, %45, %c0_i32_19 : i32
    scf.if %46 {
      %51 = arith.negf %44 : vector<16x384xf32>
      %52 = math.exp %51 : vector<16x384xf32>
      %cst_22 = arith.constant 1.000000e+00 : f32
      %53 = vector.broadcast %cst_22 : f32 to vector<16x384xf32>
      %54 = arith.addf %53, %52 : vector<16x384xf32>
      %55 = arith.divf %53, %54 : vector<16x384xf32>
      %56 = arith.mulf %44, %55 : vector<16x384xf32>
      %57 = vector.broadcast %0 : vector<1x384xf32> to vector<16x384xf32>
      %58 = arith.mulf %56, %57 : vector<16x384xf32>
      %c0_23 = arith.constant 0 : index
      %c0_24 = arith.constant 0 : index
      %c0_25 = arith.constant 0 : index
      %59 = vector.load %arg5[%c0_23, %c0_24, %c0_25] : memref<1x48x48xbf16, #tpu.memory_space<vmem>>, vector<1x48x48xbf16>
      %60 = vector.shape_cast %59 : vector<1x48x48xbf16> to vector<48x48xbf16>
      %c1_i32_26 = arith.constant 1 : i32
      %61 = tpu.dynamic_rotate %58 by %c1_i32_26 dim 1 : vector<16x384xf32>, i32 -> vector<16x384xf32>
      %62 = arith.truncf %61 : vector<16x384xf32> to vector<16x384xbf16>
      %63 = arith.truncf %58 : vector<16x384xf32> to vector<16x384xbf16>
      %c383_i32_27 = arith.constant 383 : i32
      %64 = tpu.dynamic_rotate %58 by %c383_i32_27 dim 1 : vector<16x384xf32>, i32 -> vector<16x384xf32>
      %65 = arith.truncf %64 : vector<16x384xf32> to vector<16x384xbf16>
      %66 = tpu.concatenate %62, %63, %65 in 0 : vector<16x384xbf16>, vector<16x384xbf16>, vector<16x384xbf16> -> vector<48x384xbf16>
      %67 = vector.extract_strided_slice %60 {offsets = [0, 0], sizes = [16, 48], strides = [1, 1]} : vector<48x48xbf16> to vector<16x48xbf16>
      %cst_28 = arith.constant dense<0.000000e+00> : vector<16x384xf32>
      %68 = tpu.matmul %67, %66, %cst_28 {dimension_numbers = #tpu.dot_dimension_numbers<[1], [0], [0], [1], [0, 0, 1, 1], [], []>} : vector<16x48xbf16>, vector<48x384xbf16>, vector<16x384xf32> -> vector<16x384xf32>
      %c18_i32_29 = arith.constant 18 : i32
      %69 = tpu.dynamic_rotate %68 by %c18_i32_29 dim 1 : vector<16x384xf32>, i32 -> vector<16x384xf32>
      %70 = vector.extract_strided_slice %60 {offsets = [16, 0], sizes = [16, 48], strides = [1, 1]} : vector<48x48xbf16> to vector<16x48xbf16>
      %cst_30 = arith.constant dense<0.000000e+00> : vector<16x384xf32>
      %71 = tpu.matmul %70, %66, %cst_30 {dimension_numbers = #tpu.dot_dimension_numbers<[1], [0], [0], [1], [0, 0, 1, 1], [], []>} : vector<16x48xbf16>, vector<48x384xbf16>, vector<16x384xf32> -> vector<16x384xf32>
      %72 = arith.addf %69, %71 : vector<16x384xf32>
      %73 = vector.extract_strided_slice %60 {offsets = [32, 0], sizes = [16, 48], strides = [1, 1]} : vector<48x48xbf16> to vector<16x48xbf16>
      %cst_31 = arith.constant dense<0.000000e+00> : vector<16x384xf32>
      %74 = tpu.matmul %73, %66, %cst_31 {dimension_numbers = #tpu.dot_dimension_numbers<[1], [0], [0], [1], [0, 0, 1, 1], [], []>} : vector<16x48xbf16>, vector<48x384xbf16>, vector<16x384xf32> -> vector<16x384xf32>
      %c366_i32_32 = arith.constant 366 : i32
      %75 = tpu.dynamic_rotate %74 by %c366_i32_32 dim 1 : vector<16x384xf32>, i32 -> vector<16x384xf32>
      %76 = arith.addf %72, %75 : vector<16x384xf32>
      %77 = vector.extract_strided_slice %23 {offsets = [0, 1], sizes = [16, 1], strides = [1, 1]} : vector<16x128xf32> to vector<16x1xf32>
      %78 = vector.broadcast %77 : vector<16x1xf32> to vector<16x384xf32>
      %79 = arith.addf %76, %78 : vector<16x384xf32>
      %80 = vector.broadcast %0 : vector<1x384xf32> to vector<16x384xf32>
      %81 = arith.mulf %79, %80 : vector<16x384xf32>
      %cst_33 = arith.constant dense<0.000000e+00> : vector<16xf32>
      %82 = vector.multi_reduction <add>, %81, %cst_33 [1] : vector<16x384xf32> to vector<16xf32>
      %83 = vector.shape_cast %82 : vector<16xf32> to vector<16x1xf32>
      %cst_34 = arith.constant 3.906250e-03 : f32
      %84 = vector.broadcast %cst_34 : f32 to vector<16x1xf32>
      %85 = arith.mulf %83, %84 : vector<16x1xf32>
      %86 = vector.extract_strided_slice %23 {offsets = [0, 3], sizes = [16, 4], strides = [1, 1]} : vector<16x128xf32> to vector<16x4xf32>
      %87 = vector.extract_strided_slice %23 {offsets = [0, 7], sizes = [16, 4], strides = [1, 1]} : vector<16x128xf32> to vector<16x4xf32>
      %88 = vector.extract_strided_slice %23 {offsets = [0, 11], sizes = [1, 4], strides = [1, 1]} : vector<16x128xf32> to vector<1x4xf32>
      %89 = vector.extract_strided_slice %23 {offsets = [0, 2], sizes = [16, 1], strides = [1, 1]} : vector<16x128xf32> to vector<16x1xf32>
      %90 = vector.broadcast %85 : vector<16x1xf32> to vector<16x4xf32>
      %91 = arith.mulf %86, %90 : vector<16x4xf32>
      %cst_35 = arith.constant dense<0.000000e+00> : vector<4xf32>
      %92 = vector.multi_reduction <add>, %91, %cst_35 [0] : vector<16x4xf32> to vector<4xf32>
      %93 = vector.shape_cast %92 : vector<4xf32> to vector<1x4xf32>
      %94 = arith.addf %93, %88 : vector<1x4xf32>
      %95 = arith.negf %94 : vector<1x4xf32>
      %96 = math.exp %95 : vector<1x4xf32>
      %cst_36 = arith.constant 1.000000e+00 : f32
      %97 = vector.broadcast %cst_36 : f32 to vector<1x4xf32>
      %98 = arith.addf %97, %96 : vector<1x4xf32>
      %99 = arith.divf %97, %98 : vector<1x4xf32>
      %100 = arith.mulf %94, %99 : vector<1x4xf32>
      %101 = vector.broadcast %100 : vector<1x4xf32> to vector<16x4xf32>
      %102 = arith.mulf %87, %101 : vector<16x4xf32>
      %cst_37 = arith.constant dense<0.000000e+00> : vector<16xf32>
      %103 = vector.multi_reduction <add>, %102, %cst_37 [1] : vector<16x4xf32> to vector<16xf32>
      %104 = vector.shape_cast %103 : vector<16xf32> to vector<16x1xf32>
      %105 = arith.addf %104, %89 : vector<16x1xf32>
      %106 = arith.negf %105 : vector<16x1xf32>
      %107 = math.exp %106 : vector<16x1xf32>
      %cst_38 = arith.constant 1.000000e+00 : f32
      %108 = vector.broadcast %cst_38 : f32 to vector<16x1xf32>
      %109 = arith.addf %108, %107 : vector<16x1xf32>
      %110 = arith.divf %108, %109 : vector<16x1xf32>
      %111 = vector.broadcast %110 : vector<16x1xf32> to vector<16x384xf32>
      %112 = arith.mulf %79, %111 : vector<16x384xf32>
      %113 = arith.addf %21, %112 : vector<16x384xf32>
      %114 = vector.broadcast %0 : vector<1x384xf32> to vector<16x384xf32>
      %115 = arith.mulf %113, %114 : vector<16x384xf32>
      %c0_39 = arith.constant 0 : index
      %c0_40 = arith.constant 0 : index
      %116 = vector.load %arg8[%c0_39, %c0_40] : memref<16x384xf32, #tpu.memory_space<vmem>>, vector<16x384xf32>
      tpu.vector_store %arg8[%c0_39, %c0_40], %115 {strides = array<i32>} : memref<16x384xf32, #tpu.memory_space<vmem>>, vector<16x384xf32>,
    } else {
    }
    %47 = arith.extui %17 : i1 to i32
    %c0_i32_20 = arith.constant 0 : i32
    %48 = arith.cmpi ne, %47, %c0_i32_20 : i32
    scf.if %48 {
      %c0_22 = arith.constant 0 : index
      %c0_23 = arith.constant 0 : index
      %51 = vector.load %arg9[%c0_22, %c0_23] : memref<16x384xf32, #tpu.memory_space<vmem>>, vector<16x384xf32>
      %52 = arith.addf %51, %44 : vector<16x384xf32>
      %53 = vector.broadcast %0 : vector<1x384xf32> to vector<16x384xf32>
      %54 = arith.mulf %52, %53 : vector<16x384xf32>
      %c0_24 = arith.constant 0 : index
      %c0_25 = arith.constant 0 : index
      %55 = vector.load %arg8[%c0_24, %c0_25] : memref<16x384xf32, #tpu.memory_space<vmem>>, vector<16x384xf32>
      tpu.vector_store %arg8[%c0_24, %c0_25], %54 {strides = array<i32>} : memref<16x384xf32, #tpu.memory_space<vmem>>, vector<16x384xf32>,
      %c0_26 = arith.constant 0 : index
      %c0_27 = arith.constant 0 : index
      %56 = vector.load %arg9[%c0_26, %c0_27] : memref<16x384xf32, #tpu.memory_space<vmem>>, vector<16x384xf32>
      tpu.vector_store %arg9[%c0_26, %c0_27], %54 {strides = array<i32>} : memref<16x384xf32, #tpu.memory_space<vmem>>, vector<16x384xf32>,
    } else {
    }
    %49 = arith.extui %14 : i1 to i32
    %c0_i32_21 = arith.constant 0 : i32
    %50 = arith.cmpi ne, %49, %c0_i32_21 : i32
    scf.if %50 {
      %c0_22 = arith.constant 0 : index
      %c0_23 = arith.constant 0 : index
      %c0_24 = arith.constant 0 : index
      %51 = vector.load %arg2[%c0_22, %c0_23, %c0_24] : memref<1x16x384xbf16, #tpu.memory_space<vmem>>, vector<1x16x384xbf16>
      %52 = vector.shape_cast %51 : vector<1x16x384xbf16> to vector<16x384xbf16>
      %53 = arith.extf %52 : vector<16x384xbf16> to vector<16x384xf32>
      %54 = arith.addf %53, %44 : vector<16x384xf32>
      %55 = vector.broadcast %0 : vector<1x384xf32> to vector<16x384xf32>
      %56 = arith.mulf %54, %55 : vector<16x384xf32>
      %57 = arith.truncf %56 : vector<16x384xf32> to vector<16x384xbf16>
      %c0_25 = arith.constant 0 : index
      %c0_26 = arith.constant 0 : index
      %c0_27 = arith.constant 0 : index
      %58 = vector.load %arg7[%c0_25, %c0_26, %c0_27] : memref<1x16x384xbf16, #tpu.memory_space<vmem>>, vector<1x16x384xbf16>
      %59 = vector.shape_cast %58 : vector<1x16x384xbf16> to vector<16x384xbf16>
      %60 = vector.shape_cast %57 : vector<16x384xbf16> to vector<1x16x384xbf16>
      tpu.vector_store %arg7[%c0_25, %c0_26, %c0_27], %60 {strides = array<i32>} : memref<1x16x384xbf16, #tpu.memory_space<vmem>>, vector<1x16x384xbf16>,
    } else {
    }
    return
  }
  func.func @transform_0(%arg0: i32, %arg1: i32) -> (i32, i32, i32) {
    %c0_i32 = arith.constant 0 : i32
    %c0_i32_0 = arith.constant 0 : i32
    %c0_i32_1 = arith.constant 0 : i32
    return %arg0, %c0_i32, %c0_i32_0 : i32, i32, i32
  }
  func.func @transform_1(%arg0: i32, %arg1: i32) -> (i32, i32) {
    %c0_i32 = arith.constant 0 : i32
    %c0_i32_0 = arith.constant 0 : i32
    %c0_i32_1 = arith.constant 0 : i32
    return %c0_i32, %c0_i32_0 : i32, i32
  }
  func.func @transform_2(%arg0: i32, %arg1: i32) -> (i32, i32, i32) {
    %c0_i32 = arith.constant 0 : i32
    %c0_i32_0 = arith.constant 0 : i32
    %c0_i32_1 = arith.constant 0 : i32
    return %arg1, %c0_i32, %c0_i32_0 : i32, i32, i32
  }
  func.func @transform_3(%arg0: i32, %arg1: i32) -> (i32, i32, i32) {
    %c0_i32 = arith.constant 0 : i32
    %c0_i32_0 = arith.constant 0 : i32
    %c0_i32_1 = arith.constant 0 : i32
    return %arg1, %c0_i32, %c0_i32_0 : i32, i32, i32
  }
  func.func @transform_4(%arg0: i32, %arg1: i32) -> (i32, i32, i32) {
    %c0_i32 = arith.constant 0 : i32
    %c0_i32_0 = arith.constant 0 : i32
    %c0_i32_1 = arith.constant 0 : i32
    return %arg1, %c0_i32, %c0_i32_0 : i32, i32, i32
  }
  func.func @transform_5(%arg0: i32, %arg1: i32) -> (i32, i32, i32) {
    %c0_i32 = arith.constant 0 : i32
    %c0_i32_0 = arith.constant 0 : i32
    %c0_i32_1 = arith.constant 0 : i32
    return %arg0, %c0_i32, %c0_i32_0 : i32, i32, i32
  }
}

module attributes {stable_mosaic.version = 11 : i64} {
  func.func @_conv3x3_kernel(%arg0: i32, %arg1: memref<1x16x384xbf16, #tpu.memory_space<vmem>>, %arg2: memref<1x384xf32, #tpu.memory_space<vmem>>, %arg3: memref<192x48xbf16, #tpu.memory_space<vmem>>, %arg4: memref<64x1xf32, #tpu.memory_space<vmem>>, %arg5: memref<1x64x384xbf16, #tpu.memory_space<vmem>>) attributes {dimension_semantics = [#tpu.dimension_semantics<parallel>], iteration_bounds = array<i64: 2>, scalar_prefetch = 0 : i64, scratch_operands = 0 : i64, tpu.core_type = #tpu.core_type<tc>, window_params = [{transform_indices = @transform_0, window_bounds = array<i64: 1, 16, 384>}, {pipeline_mode = #tpu.pipeline_mode<synchronous>, transform_indices = @transform_1, window_bounds = array<i64: 1, 384>}, {pipeline_mode = #tpu.pipeline_mode<synchronous>, transform_indices = @transform_2, window_bounds = array<i64: 192, 48>}, {pipeline_mode = #tpu.pipeline_mode<synchronous>, transform_indices = @transform_3, window_bounds = array<i64: 64, 1>}, {transform_indices = @transform_4, window_bounds = array<i64: 1, 64, 384>}]} {
    %c0 = arith.constant 0 : index
    %c0_0 = arith.constant 0 : index
    %c0_1 = arith.constant 0 : index
    %0 = vector.load %arg1[%c0, %c0_0, %c0_1] : memref<1x16x384xbf16, #tpu.memory_space<vmem>>, vector<1x16x384xbf16>
    %1 = vector.shape_cast %0 : vector<1x16x384xbf16> to vector<16x384xbf16>
    %c0_2 = arith.constant 0 : index
    %c0_3 = arith.constant 0 : index
    %2 = vector.load %arg3[%c0_2, %c0_3] : memref<192x48xbf16, #tpu.memory_space<vmem>>, vector<192x48xbf16>
    %3 = arith.extf %1 : vector<16x384xbf16> to vector<16x384xf32>
    %c1_i32 = arith.constant 1 : i32
    %4 = tpu.dynamic_rotate %3 by %c1_i32 dim 1 : vector<16x384xf32>, i32 -> vector<16x384xf32>
    %5 = arith.truncf %4 : vector<16x384xf32> to vector<16x384xbf16>
    %6 = arith.truncf %3 : vector<16x384xf32> to vector<16x384xbf16>
    %c383_i32 = arith.constant 383 : i32
    %7 = tpu.dynamic_rotate %3 by %c383_i32 dim 1 : vector<16x384xf32>, i32 -> vector<16x384xf32>
    %8 = arith.truncf %7 : vector<16x384xf32> to vector<16x384xbf16>
    %9 = tpu.concatenate %5, %6, %8 in 0 : vector<16x384xbf16>, vector<16x384xbf16>, vector<16x384xbf16> -> vector<48x384xbf16>
    %10 = vector.extract_strided_slice %2 {offsets = [0, 0], sizes = [64, 48], strides = [1, 1]} : vector<192x48xbf16> to vector<64x48xbf16>
    %cst = arith.constant dense<0.000000e+00> : vector<64x384xf32>
    %11 = tpu.matmul %10, %9, %cst {dimension_numbers = #tpu.dot_dimension_numbers<[1], [0], [0], [1], [0, 0, 1, 1], [], []>} : vector<64x48xbf16>, vector<48x384xbf16>, vector<64x384xf32> -> vector<64x384xf32>
    %c18_i32 = arith.constant 18 : i32
    %12 = tpu.dynamic_rotate %11 by %c18_i32 dim 1 : vector<64x384xf32>, i32 -> vector<64x384xf32>
    %13 = vector.extract_strided_slice %2 {offsets = [64, 0], sizes = [64, 48], strides = [1, 1]} : vector<192x48xbf16> to vector<64x48xbf16>
    %cst_4 = arith.constant dense<0.000000e+00> : vector<64x384xf32>
    %14 = tpu.matmul %13, %9, %cst_4 {dimension_numbers = #tpu.dot_dimension_numbers<[1], [0], [0], [1], [0, 0, 1, 1], [], []>} : vector<64x48xbf16>, vector<48x384xbf16>, vector<64x384xf32> -> vector<64x384xf32>
    %15 = arith.addf %12, %14 : vector<64x384xf32>
    %16 = vector.extract_strided_slice %2 {offsets = [128, 0], sizes = [64, 48], strides = [1, 1]} : vector<192x48xbf16> to vector<64x48xbf16>
    %cst_5 = arith.constant dense<0.000000e+00> : vector<64x384xf32>
    %17 = tpu.matmul %16, %9, %cst_5 {dimension_numbers = #tpu.dot_dimension_numbers<[1], [0], [0], [1], [0, 0, 1, 1], [], []>} : vector<64x48xbf16>, vector<48x384xbf16>, vector<64x384xf32> -> vector<64x384xf32>
    %c366_i32 = arith.constant 366 : i32
    %18 = tpu.dynamic_rotate %17 by %c366_i32 dim 1 : vector<64x384xf32>, i32 -> vector<64x384xf32>
    %19 = arith.addf %15, %18 : vector<64x384xf32>
    %c0_6 = arith.constant 0 : index
    %c0_7 = arith.constant 0 : index
    %20 = vector.load %arg4[%c0_6, %c0_7] : memref<64x1xf32, #tpu.memory_space<vmem>>, vector<64x1xf32>
    %21 = vector.broadcast %20 : vector<64x1xf32> to vector<64x384xf32>
    %22 = arith.addf %19, %21 : vector<64x384xf32>
    %c0_8 = arith.constant 0 : index
    %c0_9 = arith.constant 0 : index
    %23 = vector.load %arg2[%c0_8, %c0_9] : memref<1x384xf32, #tpu.memory_space<vmem>>, vector<1x384xf32>
    %24 = vector.broadcast %23 : vector<1x384xf32> to vector<64x384xf32>
    %25 = arith.mulf %22, %24 : vector<64x384xf32>
    %26 = arith.truncf %25 : vector<64x384xf32> to vector<64x384xbf16>
    %c0_10 = arith.constant 0 : index
    %c0_11 = arith.constant 0 : index
    %c0_12 = arith.constant 0 : index
    %27 = vector.load %arg5[%c0_10, %c0_11, %c0_12] : memref<1x64x384xbf16, #tpu.memory_space<vmem>>, vector<1x64x384xbf16>
    %28 = vector.shape_cast %27 : vector<1x64x384xbf16> to vector<64x384xbf16>
    %29 = vector.shape_cast %26 : vector<64x384xbf16> to vector<1x64x384xbf16>
    tpu.vector_store %arg5[%c0_10, %c0_11, %c0_12], %29 {strides = array<i32>} : memref<1x64x384xbf16, #tpu.memory_space<vmem>>, vector<1x64x384xbf16>,
    return
  }
  func.func @transform_0(%arg0: i32) -> (i32, i32, i32) {
    %c0_i32 = arith.constant 0 : i32
    %c0_i32_0 = arith.constant 0 : i32
    %c0_i32_1 = arith.constant 0 : i32
    return %arg0, %c0_i32, %c0_i32_0 : i32, i32, i32
  }
  func.func @transform_1(%arg0: i32) -> (i32, i32) {
    %c0_i32 = arith.constant 0 : i32
    %c0_i32_0 = arith.constant 0 : i32
    %c0_i32_1 = arith.constant 0 : i32
    return %c0_i32, %c0_i32_0 : i32, i32
  }
  func.func @transform_2(%arg0: i32) -> (i32, i32) {
    %c0_i32 = arith.constant 0 : i32
    %c0_i32_0 = arith.constant 0 : i32
    %c0_i32_1 = arith.constant 0 : i32
    return %c0_i32, %c0_i32_0 : i32, i32
  }
  func.func @transform_3(%arg0: i32) -> (i32, i32) {
    %c0_i32 = arith.constant 0 : i32
    %c0_i32_0 = arith.constant 0 : i32
    %c0_i32_1 = arith.constant 0 : i32
    return %c0_i32, %c0_i32_0 : i32, i32
  }
  func.func @transform_4(%arg0: i32) -> (i32, i32, i32) {
    %c0_i32 = arith.constant 0 : i32
    %c0_i32_0 = arith.constant 0 : i32
    %c0_i32_1 = arith.constant 0 : i32
    return %arg0, %c0_i32, %c0_i32_0 : i32, i32, i32
  }
}

module attributes {stable_mosaic.version = 11 : i64} {
  func.func @_conv3x3_kernel(%arg0: i32, %arg1: memref<1x16x1280xbf16, #tpu.memory_space<vmem>>, %arg2: memref<1x1280xf32, #tpu.memory_space<vmem>>, %arg3: memref<48x48xbf16, #tpu.memory_space<vmem>>, %arg4: memref<16x1xf32, #tpu.memory_space<vmem>>, %arg5: memref<1x16x1280xf32, #tpu.memory_space<vmem>>) attributes {dimension_semantics = [#tpu.dimension_semantics<parallel>], iteration_bounds = array<i64: 2>, scalar_prefetch = 0 : i64, scratch_operands = 0 : i64, tpu.core_type = #tpu.core_type<tc>, window_params = [{transform_indices = @transform_0, window_bounds = array<i64: 1, 16, 1280>}, {pipeline_mode = #tpu.pipeline_mode<synchronous>, transform_indices = @transform_1, window_bounds = array<i64: 1, 1280>}, {pipeline_mode = #tpu.pipeline_mode<synchronous>, transform_indices = @transform_2, window_bounds = array<i64: 48, 48>}, {pipeline_mode = #tpu.pipeline_mode<synchronous>, transform_indices = @transform_3, window_bounds = array<i64: 16, 1>}, {transform_indices = @transform_4, window_bounds = array<i64: 1, 16, 1280>}]} {
    %c0 = arith.constant 0 : index
    %c0_0 = arith.constant 0 : index
    %c0_1 = arith.constant 0 : index
    %0 = vector.load %arg1[%c0, %c0_0, %c0_1] : memref<1x16x1280xbf16, #tpu.memory_space<vmem>>, vector<1x16x1280xbf16>
    %1 = vector.shape_cast %0 : vector<1x16x1280xbf16> to vector<16x1280xbf16>
    %c0_2 = arith.constant 0 : index
    %c0_3 = arith.constant 0 : index
    %2 = vector.load %arg3[%c0_2, %c0_3] : memref<48x48xbf16, #tpu.memory_space<vmem>>, vector<48x48xbf16>
    %3 = arith.extf %1 : vector<16x1280xbf16> to vector<16x1280xf32>
    %c1_i32 = arith.constant 1 : i32
    %4 = tpu.dynamic_rotate %3 by %c1_i32 dim 1 : vector<16x1280xf32>, i32 -> vector<16x1280xf32>
    %5 = arith.truncf %4 : vector<16x1280xf32> to vector<16x1280xbf16>
    %6 = arith.truncf %3 : vector<16x1280xf32> to vector<16x1280xbf16>
    %c1279_i32 = arith.constant 1279 : i32
    %7 = tpu.dynamic_rotate %3 by %c1279_i32 dim 1 : vector<16x1280xf32>, i32 -> vector<16x1280xf32>
    %8 = arith.truncf %7 : vector<16x1280xf32> to vector<16x1280xbf16>
    %9 = tpu.concatenate %5, %6, %8 in 0 : vector<16x1280xbf16>, vector<16x1280xbf16>, vector<16x1280xbf16> -> vector<48x1280xbf16>
    %10 = vector.extract_strided_slice %2 {offsets = [0, 0], sizes = [16, 48], strides = [1, 1]} : vector<48x48xbf16> to vector<16x48xbf16>
    %cst = arith.constant dense<0.000000e+00> : vector<16x1280xf32>
    %11 = tpu.matmul %10, %9, %cst {dimension_numbers = #tpu.dot_dimension_numbers<[1], [0], [0], [1], [0, 0, 1, 1], [], []>} : vector<16x48xbf16>, vector<48x1280xbf16>, vector<16x1280xf32> -> vector<16x1280xf32>
    %c34_i32 = arith.constant 34 : i32
    %12 = tpu.dynamic_rotate %11 by %c34_i32 dim 1 : vector<16x1280xf32>, i32 -> vector<16x1280xf32>
    %13 = vector.extract_strided_slice %2 {offsets = [16, 0], sizes = [16, 48], strides = [1, 1]} : vector<48x48xbf16> to vector<16x48xbf16>
    %cst_4 = arith.constant dense<0.000000e+00> : vector<16x1280xf32>
    %14 = tpu.matmul %13, %9, %cst_4 {dimension_numbers = #tpu.dot_dimension_numbers<[1], [0], [0], [1], [0, 0, 1, 1], [], []>} : vector<16x48xbf16>, vector<48x1280xbf16>, vector<16x1280xf32> -> vector<16x1280xf32>
    %15 = arith.addf %12, %14 : vector<16x1280xf32>
    %16 = vector.extract_strided_slice %2 {offsets = [32, 0], sizes = [16, 48], strides = [1, 1]} : vector<48x48xbf16> to vector<16x48xbf16>
    %cst_5 = arith.constant dense<0.000000e+00> : vector<16x1280xf32>
    %17 = tpu.matmul %16, %9, %cst_5 {dimension_numbers = #tpu.dot_dimension_numbers<[1], [0], [0], [1], [0, 0, 1, 1], [], []>} : vector<16x48xbf16>, vector<48x1280xbf16>, vector<16x1280xf32> -> vector<16x1280xf32>
    %c1246_i32 = arith.constant 1246 : i32
    %18 = tpu.dynamic_rotate %17 by %c1246_i32 dim 1 : vector<16x1280xf32>, i32 -> vector<16x1280xf32>
    %19 = arith.addf %15, %18 : vector<16x1280xf32>
    %c0_6 = arith.constant 0 : index
    %c0_7 = arith.constant 0 : index
    %20 = vector.load %arg4[%c0_6, %c0_7] : memref<16x1xf32, #tpu.memory_space<vmem>>, vector<16x1xf32>
    %21 = vector.broadcast %20 : vector<16x1xf32> to vector<16x1280xf32>
    %22 = arith.addf %19, %21 : vector<16x1280xf32>
    %c0_8 = arith.constant 0 : index
    %c0_9 = arith.constant 0 : index
    %23 = vector.load %arg2[%c0_8, %c0_9] : memref<1x1280xf32, #tpu.memory_space<vmem>>, vector<1x1280xf32>
    %24 = vector.broadcast %23 : vector<1x1280xf32> to vector<16x1280xf32>
    %25 = arith.mulf %22, %24 : vector<16x1280xf32>
    %c0_10 = arith.constant 0 : index
    %c0_11 = arith.constant 0 : index
    %c0_12 = arith.constant 0 : index
    %26 = vector.load %arg5[%c0_10, %c0_11, %c0_12] : memref<1x16x1280xf32, #tpu.memory_space<vmem>>, vector<1x16x1280xf32>
    %27 = vector.shape_cast %26 : vector<1x16x1280xf32> to vector<16x1280xf32>
    %28 = vector.shape_cast %25 : vector<16x1280xf32> to vector<1x16x1280xf32>
    tpu.vector_store %arg5[%c0_10, %c0_11, %c0_12], %28 {strides = array<i32>} : memref<1x16x1280xf32, #tpu.memory_space<vmem>>, vector<1x16x1280xf32>,
    return
  }
  func.func @transform_0(%arg0: i32) -> (i32, i32, i32) {
    %c0_i32 = arith.constant 0 : i32
    %c0_i32_0 = arith.constant 0 : i32
    %c0_i32_1 = arith.constant 0 : i32
    return %arg0, %c0_i32, %c0_i32_0 : i32, i32, i32
  }
  func.func @transform_1(%arg0: i32) -> (i32, i32) {
    %c0_i32 = arith.constant 0 : i32
    %c0_i32_0 = arith.constant 0 : i32
    %c0_i32_1 = arith.constant 0 : i32
    return %c0_i32, %c0_i32_0 : i32, i32
  }
  func.func @transform_2(%arg0: i32) -> (i32, i32) {
    %c0_i32 = arith.constant 0 : i32
    %c0_i32_0 = arith.constant 0 : i32
    %c0_i32_1 = arith.constant 0 : i32
    return %c0_i32, %c0_i32_0 : i32, i32
  }
  func.func @transform_3(%arg0: i32) -> (i32, i32) {
    %c0_i32 = arith.constant 0 : i32
    %c0_i32_0 = arith.constant 0 : i32
    %c0_i32_1 = arith.constant 0 : i32
    return %c0_i32, %c0_i32_0 : i32, i32
  }
  func.func @transform_4(%arg0: i32) -> (i32, i32, i32) {
    %c0_i32 = arith.constant 0 : i32
    %c0_i32_0 = arith.constant 0 : i32
    %c0_i32_1 = arith.constant 0 : i32
    return %arg0, %c0_i32, %c0_i32_0 : i32, i32, i32
  }
}

</mosaic_0001>

<bundles_post_ra>
// kernel: rcan_forward.4
= control target key start
LH: loop header
LB: loop body
LE: loop exit
PB: predicated region body
PF: predicated region fallthrough
CT: control target
= control target key end

     0   :  { %s889_s15 = smov 0   ;;  %s1019_s0 = inlined_call_operand.vmem [shape: bf16[2,16,384], index: 0, kind: input, shape index: {}]   ;;  %s1020_s1 = inlined_call_operand.vmem [shape: f32[1,384], index: 1, kind: input, shape index: {}]   ;;  %s1021_s2 = inlined_call_operand.vmem [shape: bf16[48,48], index: 2, kind: input, shape index: {}]   ;;  %s1022_s3 = inlined_call_operand.vmem [shape: f32[16,1], index: 3, kind: input, shape index: {}]   ;;  %s1023_s4 = inlined_call_operand.vmem [shape: bf16[2,16,384], index: 4, kind: output, shape index: {}]  }
   0x1 LB: > { %s724_s16 = sadd.s32 4294967295, %s855_s15   ;;  %p728_p0 = scmp.ge.s32.totalorder %s855_s15, 1  ;;  %s855_s15 = sphi %s889_s15, %s14_s15  }
   0x2   : > { %p162_p1 = scmp.lt.s32.totalorder %s855_s15, 3 }
   0x4   : > { %p163_p2 = pnand %p728_p0, %p162_p1 }
   0x5   : > { %p188_p3 = scmp.lt.s32.totalorder (!%p163_p2), %s724_s16, 1  ;;  %s858_s21 = smov (!%p163_p2), 127  }
   0x6   : > { %166 = sbr.rel (%p163_p2) target bundleno = 510 (0x1fe), region = 36  ;;  %s859_s22 = smov (!%p163_p2), 1  }
   0x7   : > { %s862_s7 = smov (!%p163_p2), 18   ;;  %s863_s8 = smov (!%p163_p2), 110  }
   0xb   : > { %s1025_s16 = smov (!%p188_p3, %s724_s16), 1  ;;  %v857_v0 = vmov 0.0   ;;  %vm860_vm0 = vmmov 0   ;;  %v861_v17 = vmov 0   ;;  %v604_v18 = vld [vmem:[%s1022_s3] sm:$0xff]  ;;  %v605_v19 = vld [vmem:[%s1022_s3 + $0x8] sm:$0xff]  ;;  %v227_v20 = vlaneseq }
   0xc   : > { %s795_s17 = smul.u32 24, %s1025_s16  ;;  %765 = vmatprep.subr.bf16.mxu1 %v857_v0  ;;  %771 = vmatprep.mubr.msk.bf16.mxu1 %vm860_vm0, %v857_v0  ;;  %v846_v58 = vld [vmem:[%s1021_s2] sm:$0xff]   ;;  %vm282_vm3 = vcmask 392192   ;;  %v847_v59 = vld [vmem:[%s1021_s2 + $0x8] sm:$0xff]   ;;  %v848_v60 = vld [vmem:[%s1021_s2 + $0x10] sm:$0xff]  }
   0xd   : > { %318 = vmatprep.mubr.bf16.mxu0 %v861_v17  ;;  %841 = vset.pattern.permute.xlu0 %v861_v17  ;;  %v924_v21 = vand.u32 127, %v227_v20 }
   0xe   : > { %s192_s20 = scalar_lea.vmem %s1019_s0, %s795_s17  ;;  %842 = vset.pattern.permute.xlu1 %v861_v17  ;;  %s197_s13 = scalar_lea.vmem %s1023_s4, %s795_s17 }
   0xf   : > { %v199_v1 = vld [vmem:[%s192_s20] sm:$0xff]  ;;  %v201_v2 = vld [vmem:[%s192_s20 + $0xc] sm:$0xff]  ;;  %v200_v3 = vld [vmem:[%s192_s20 + $0x8] sm:$0xf]  ;;  %vm251_vm1 = vcmp.lt.s32.totalorder %v924_v21, 127  ;;  %vm229_vm2 = vcmp.lt.s32.totalorder %v924_v21, 1 }
  0x10   : > { %v210_v4 = vunpack.c.h.bf16 %v199_v1  ;;  %v213_v5 = vunpack.c.h.bf16 %v201_v2  ;;  %v209_v6 = vunpack.c.l.bf16 %v199_v1  ;;  %v212_v7 = vunpack.c.l.bf16 %v201_v2  ;;  %v202_v8 = vld [vmem:[%s192_s20 + $0x14] sm:$0xf] }
  0x11   : > { %v211_v9 = vunpack.c.l.bf16 %v200_v3  ;;  %v214_v10 = vunpack.c.l.bf16 %v202_v8  ;;  %v906_v11 = vcombine.high %v199_v1, %v201_v2  ;;  %v908_v14 = vcombine.low %v200_v3, %v202_v8 }
  0x12   : > { %v811_v12 = vpack.i.bf16 %v213_v5, %v210_v4  ;;  %v821_v13 = vpack.i.bf16 %v212_v7, %v209_v6  ;;  %v910_v15 = vcombine.low %v199_v1, %v201_v2  ;;  %vm382_vm4 = vcmp.lt.s32.totalorder %v924_v21, 18 }
  0x13   : > { %v816_v16 = vpack.i.bf16 %v214_v10, %v211_v9  ;;  %vm591_vm5 = vcmp.lt.s32.totalorder %v924_v21, 110 }
  0x14   : > { %812 = vrot.lane.b32.xlu0 %v811_v12, %s858_s21  ;;  %822 = vrot.lane.b32.xlu1 %v821_v13, %s858_s21 }
  0x18   : > { %817 = vrot.lane.b32.xlu0 %v816_v16, %s858_s21  ;;  %827 = vrot.lane.b32.xlu1 %v821_v13, %s859_s22 }
  0x1c   : > { %832 = vrot.lane.b32.xlu0 %v811_v12, %s859_s22  ;;  %837 = vrot.lane.b32.xlu1 %v816_v16, %s859_s22 }
  0x20   : > { %608 = vperm.xlu0 %841, %v604_v18   ;;  %613 = vperm.xlu1 %842, %v605_v19  }
  0x86   : > { %v813_v22 = vpop.permute.xlu0 %812  ;;  %v823_v23 = vpop.permute.xlu1 %822 }
  0x87   : > { %v815_v24 = vunpack.i.h.bf16 %v813_v22  ;;  %v814_v25 = vunpack.i.l.bf16 %v813_v22  ;;  %v825_v26 = vunpack.i.h.bf16 %v823_v23  ;;  %v824_v27 = vunpack.i.l.bf16 %v823_v23 }
  0x89   : > { %v254_v34 = vsel %vm251_vm1, %v824_v27, %v814_v25  ;;  %v255_v35 = vsel %vm251_vm1, %v825_v26, %v815_v24 }
  0x8a   : > { %v818_v28 = vpop.permute.xlu0 %817  ;;  %v828_v29 = vpop.permute.xlu1 %827  ;;  %v258_v47 = vpack.c.bf16 %v255_v35, %v254_v34 }
  0x8b   : > { %v820_v30 = vunpack.i.h.bf16 %v818_v28  ;;  %v819_v31 = vunpack.i.l.bf16 %v818_v28  ;;  %v830_v32 = vunpack.i.h.bf16 %v828_v29  ;;  %v829_v33 = vunpack.i.l.bf16 %v828_v29 }
  0x8d   : > { %v252_v36 = vsel %vm251_vm1, %v814_v25, %v819_v31  ;;  %v253_v37 = vsel %vm251_vm1, %v815_v24, %v820_v30  ;;  %v256_v38 = vsel %vm251_vm1, %v819_v31, %v824_v27  ;;  %v257_v39 = vsel %vm251_vm1, %v820_v30, %v825_v26 }
  0x8e   : > { %v833_v40 = vpop.permute.xlu0 %832  ;;  %v838_v41 = vpop.permute.xlu1 %837  ;;  %v259_v42 = vpack.c.bf16 %v253_v37, %v252_v36  ;;  %v260_v43 = vpack.c.bf16 %v257_v39, %v256_v38  ;;  %v625_v30 = vshrl.u32 %v227_v20, 7  ;;  %v622_v38 = vld [vmem:[%s1020_s1] sm:$0x7] }
  0x8f   : > { %v835_v44 = vunpack.i.h.bf16 %v833_v40  ;;  %v834_v45 = vunpack.i.l.bf16 %v833_v40  ;;  %v839_v46 = vunpack.i.l.bf16 %v838_v41  ;;  %v840_v48 = vunpack.i.h.bf16 %v838_v41 }
  0x90   : > { %296 = vmatprep.subr.bf16.mxu0 %v259_v42  ;;  %766 = vmatpush3.bf16.msra.mxu1 %v260_v43  ;;  %v626_v34 = vsub.s32 0, %v625_v30  ;;  %v630_v35 = vsub.s32 1, %v625_v30  ;;  %v634_v36 = vsub.s32 2, %v625_v30 }
  0x91   : > { %297 = vmatpush1.bf16.msra.mxu0 %v258_v47  ;;  %767 = vmatprep.subr.bf16.mxu1 %v857_v0  ;;  %v232_v49 = vsel %vm229_vm2, %v829_v33, %v834_v45  ;;  %v233_v50 = vsel %vm229_vm2, %v830_v32, %v835_v44  ;;  %v230_v51 = vsel %vm229_vm2, %v834_v45, %v839_v46 }
  0x92   : > { %298 = vmatprep.subr.bf16.mxu0 %v906_v11  ;;  %v237_v52 = vpack.c.bf16 %v233_v50, %v232_v49  ;;  %v231_v53 = vsel %vm229_vm2, %v835_v44, %v840_v48  ;;  %v234_v55 = vsel %vm229_vm2, %v839_v46, %v829_v33  ;;  %v235_v56 = vsel %vm229_vm2, %v840_v48, %v830_v32 }
  0x93   : > { %v238_v54 = vpack.c.bf16 %v231_v53, %v230_v51  ;;  %v236_v57 = vpack.c.bf16 %v235_v56, %v234_v55  ;;  %v627_v45 = vrot.slane %v622_v38, %v626_v34  ;;  %v631_v46 = vrot.slane %v622_v38, %v630_v35 }
  0x94   : > { %768 = vmatpush3.bf16.msra.mxu1 %v908_v14 }
  0x95   : > { %299 = vmatpush1.bf16.msra.mxu0 %v910_v15  ;;  %769 = vmatprep.subr.bf16.mxu1 %v857_v0 }
  0x96   : > { %300 = vmatprep.subr.bf16.mxu0 %v237_v52 }
  0x98   : > { %770 = vmatpush3.bf16.msra.mxu1 %v238_v54 }
  0x99   : > { %301 = vmatpush1.bf16.msra.mxu0 %v236_v57  ;;  %775 = vmatprep.subr.bf16.mxu1 %v857_v0 }
  0x9a   : > { %407 = vmatprep.subr.bf16.mxu0 %v259_v42 }
  0x9b   : > { %772 = vmatmul.mubr.msk.bf16.vlgmr.msra.gmra.mxu1 %vm282_vm3, %v846_v58  ;;  %v614_v23 = vpop.permute.xlu1 %613  ;;  %v609_v24 = vpop.permute.xlu0 %608 }
  0x9c   : > { %735 = vmatmul.mubr.msk.bf16.vlgmr.msra.gmra.mxu0 %vm282_vm3, %v846_v58  ;;  %776 = vmatpush3.bf16.msra.mxu1 %v260_v43 }
  0x9d   : > { %408 = vmatpush1.bf16.msra.mxu0 %v258_v47  ;;  %777 = vmatprep.subr.bf16.mxu1 %v857_v0 }
  0x9e   : > { %409 = vmatprep.subr.bf16.mxu0 %v906_v11  ;;  %429 = vmatprep.mubr.bf16.mxu0 %v861_v17 }
  0x9f   : > { %781 = vmatprep.mubr.msk.bf16.mxu1 %vm860_vm0, %v857_v0 }
  0xa0   : > { %778 = vmatpush3.bf16.msra.mxu1 %v908_v14 }
  0xa1   : > { %410 = vmatpush1.bf16.msra.mxu0 %v910_v15  ;;  %779 = vmatprep.subr.bf16.mxu1 %v857_v0 }
  0xa2   : > { %411 = vmatprep.subr.bf16.mxu0 %v237_v52 }
  0xa4   : > { %780 = vmatpush3.bf16.msra.mxu1 %v238_v54 }
  0xa5   : > { %412 = vmatpush1.bf16.msra.mxu0 %v236_v57  ;;  %785 = vmatprep.subr.bf16.mxu1 %v857_v0 }
  0xa6   : > { %505 = vmatprep.subr.bf16.mxu0 %v259_v42 }
  0xa7   : > { %782 = vmatmul.mubr.msk.bf16.vlgmr.msra.gmra.mxu1 %vm282_vm3, %v847_v59 }
  0xa8   : > { %738 = vmatmul.mubr.msk.bf16.vlgmr.msra.gmra.mxu0 %vm282_vm3, %v847_v59  ;;  %786 = vmatpush3.bf16.msra.mxu1 %v260_v43 }
  0xa9   : > { %506 = vmatpush1.bf16.msra.mxu0 %v258_v47  ;;  %787 = vmatprep.subr.bf16.mxu1 %v857_v0  ;;  %v635_v47 = vrot.slane %v622_v38, %v634_v36 }
  0xaa   : > { %507 = vmatprep.subr.bf16.mxu0 %v906_v11  ;;  %527 = vmatprep.mubr.bf16.mxu0 %v861_v17 }
  0xab   : > { %791 = vmatprep.mubr.msk.bf16.mxu1 %vm860_vm0, %v857_v0 }
  0xac   : > { %788 = vmatpush3.bf16.msra.mxu1 %v908_v14 }
  0xad   : > { %508 = vmatpush1.bf16.msra.mxu0 %v910_v15  ;;  %789 = vmatprep.subr.bf16.mxu1 %v857_v0 }
  0xae   : > { %509 = vmatprep.subr.bf16.mxu0 %v237_v52 }
  0xb0   : > { %790 = vmatpush3.bf16.msra.mxu1 %v238_v54 }
  0xb1   : > { %510 = vmatpush1.bf16.msra.mxu0 %v236_v57 }
  0xb3   : > { %792 = vmatmul.mubr.msk.bf16.vlgmr.msra.gmra.mxu1 %vm282_vm3, %v848_v60 }
  0xb4   : > { %741 = vmatmul.mubr.msk.bf16.vlgmr.msra.gmra.mxu0 %vm282_vm3, %v848_v60 }
 0x15b   : > { %v363_v61 = vpop.f32.mrf.mxu1 }
 0x15c   : > { %378 = vrot.lane.b32.xlu0 %v363_v61, %s862_s7  ;;  %v320_v62 = vpop.f32.mrf.mxu0 }
 0x15d   : > { %v773_v63 = vpop.f32.mrf.mxu1 }
 0x15e   : > { %v322_v1 = vpop.f32.mrf.mxu0 }
 0x15f   : > { %v366_v2 = vpop.f32.mrf.mxu1 }
 0x160   : > { %380 = vrot.lane.b32.xlu1 %v366_v2, %s862_s7  ;;  %370 = vrot.lane.b32.xlu0 %v320_v62, %s862_s7  ;;  %v324_v3 = vpop.f32.mrf.mxu0 }
 0x161   : > { %v774_v0 = vpop.f32.mrf.mxu1 }
 0x162   : > { %v326_v4 = vpop.f32.mrf.mxu0 }
 0x164   : > { %374 = vrot.lane.b32.xlu0 %v322_v1, %s862_s7  ;;  %372 = vrot.lane.b32.xlu1 %v324_v3, %s862_s7 }
 0x167   : > { %v474_v5 = vpop.f32.mrf.mxu1 }
 0x168   : > { %376 = vrot.lane.b32.xlu1 %v326_v4, %s862_s7  ;;  %v431_v6 = vpop.f32.mrf.mxu0 }
 0x169   : > { %v783_v7 = vpop.f32.mrf.mxu1 }
 0x16a   : > { %v433_v8 = vpop.f32.mrf.mxu0 }
 0x16b   : > { %v978_v9 = vpop.f32.mrf.mxu1 }
 0x16c   : > { %v435_v11 = vpop.f32.mrf.mxu0 }
 0x16d   : > { %v784_v10 = vpop.f32.mrf.mxu1 }
 0x16e   : > { %v437_v12 = vpop.f32.mrf.mxu0 }
 0x173   : > { %v572_v13 = vpop.f32.mrf.mxu1 }
 0x174   : > { %v529_v14 = vpop.f32.mrf.mxu0 }
 0x175   : > { %579 = vrot.lane.b32.xlu1 %v529_v14, %s863_s8  ;;  %v793_v15 = vpop.f32.mrf.mxu1 }
 0x176   : > { %v531_v16 = vpop.f32.mrf.mxu0 }
 0x177   : > { %v575_v17 = vpop.f32.mrf.mxu1 }
 0x178   : > { %v533_v18 = vpop.f32.mrf.mxu0 }
 0x179   : > { %583 = vrot.lane.b32.xlu1 %v531_v16, %s863_s8  ;;  %581 = vrot.lane.b32.xlu0 %v533_v18, %s863_s8  ;;  %v794_v19 = vpop.f32.mrf.mxu1 }
 0x17a   : > { %v535_v22 = vpop.f32.mrf.mxu0 }
 0x17d   : > { %587 = vrot.lane.b32.xlu1 %v572_v13, %s863_s8  ;;  %585 = vrot.lane.b32.xlu0 %v535_v22, %s863_s8 }
 0x181   : > { %589 = vrot.lane.b32.xlu0 %v575_v17, %s863_s8 }
 0x1ce   : > { %v379_v26 = vpop.permute.xlu0 %378 }
 0x1d2   : > { %v381_v25 = vpop.permute.xlu1 %380  ;;  %v371_v28 = vpop.permute.xlu0 %370 }
 0x1d3   : > { %v387_v33 = vsel %vm382_vm4, %v379_v26, %v371_v28 }
 0x1d4   : > { %v481_v37 = vadd.f32 %v431_v6, %v387_v33 }
 0x1d6   : > { %v373_v27 = vpop.permute.xlu1 %372  ;;  %v375_v31 = vpop.permute.xlu0 %374 }
 0x1d7   : > { %v383_v20 = vsel %vm382_vm4, %v375_v31, %v379_v26  ;;  %v385_v41 = vsel %vm382_vm4, %v371_v28, %v375_v31  ;;  %v388_v42 = vsel %vm382_vm4, %v381_v25, %v373_v27 }
 0x1d8   : > { %v482_v48 = vadd.f32 %v433_v8, %v385_v41  ;;  %v483_v49 = vadd.f32 %v474_v5, %v383_v20  ;;  %v484_v50 = vadd.f32 %v435_v11, %v388_v42 }
 0x1da   : > { %v377_v29 = vpop.permute.xlu1 %376 }
 0x1db   : > { %v386_v51 = vsel %vm382_vm4, %v373_v27, %v377_v29  ;;  %v384_v58 = vsel %vm382_vm4, %v377_v29, %v381_v25 }
 0x1dc   : > { %v485_v62 = vadd.f32 %v437_v12, %v386_v51  ;;  %v486_v0 = vadd.f32 %v978_v9, %v384_v58 }
 0x1e7   : > { %v580_v32 = vpop.permute.xlu1 %579 }
 0x1eb   : > { %v584_v39 = vpop.permute.xlu1 %583  ;;  %v582_v40 = vpop.permute.xlu0 %581 }
 0x1ec   : > { %v594_v43 = vsel %vm591_vm5, %v580_v32, %v584_v39 }
 0x1ed   : > { %v598_v44 = vadd.f32 %v594_v43, %v481_v37 }
 0x1ef   : > { %v588_v52 = vpop.permute.xlu1 %587  ;;  %v586_v53 = vpop.permute.xlu0 %585  ;;  %v616_v54 = vadd.f32 %v609_v24, %v598_v44 }
 0x1f0   : > { %v592_v55 = vsel %vm591_vm5, %v584_v39, %v588_v52  ;;  %v596_v56 = vsel %vm591_vm5, %v588_v52, %v580_v32  ;;  %v595_v57 = vsel %vm591_vm5, %v582_v40, %v586_v53 }
 0x1f1   : > { %v599_v59 = vadd.f32 %v592_v55, %v482_v48  ;;  %v600_v60 = vadd.f32 %v596_v56, %v483_v49  ;;  %v601_v61 = vadd.f32 %v595_v57, %v484_v50  ;;  %v639_v3 = vmul.f32 %v627_v45, %v616_v54 }
 0x1f3   : > { %v617_v63 = vadd.f32 %v609_v24, %v599_v59  ;;  %v618_v1 = vadd.f32 %v609_v24, %v600_v60  ;;  %v590_v2 = vpop.permute.xlu0 %589  ;;  %v619_v8 = vadd.f32 %v614_v23, %v601_v61 }
 0x1f4   : > { %v593_v4 = vsel %vm591_vm5, %v586_v53, %v590_v2  ;;  %v597_v5 = vsel %vm591_vm5, %v590_v2, %v582_v40 }
 0x1f5   : > { %v640_v6 = vmul.f32 %v631_v46, %v617_v63  ;;  %v641_v7 = vmul.f32 %v635_v47, %v618_v1  ;;  %v602_v10 = vadd.f32 %v593_v4, %v485_v62  ;;  %v603_v11 = vadd.f32 %v597_v5, %v486_v0 }
 0x1f6   : > { %v642_v15 = vmul.f32 %v627_v45, %v619_v8 }
 0x1f7   : > { %v749_v12 = vpack.c.bf16 %v640_v6, %v639_v3  ;;  %v750_v13 = vpack.c.bf16 %v641_v7, %v641_v7  ;;  %v620_v9 = vadd.f32 %v614_v23, %v602_v10  ;;  %v621_v14 = vadd.f32 %v614_v23, %v603_v11 }
 0x1f9   : > { %665 = vst [vmem:[%s197_s13] sm:$0xff] %v749_v12  ;;  %666 = vst [vmem:[%s197_s13 + $0x8] sm:$0xf] %v750_v13  ;;  %v643_v16 = vmul.f32 %v631_v46, %v620_v9  ;;  %v644_v21 = vmul.f32 %v635_v47, %v621_v14 }
 0x1fb   : > { %v751_v17 = vpack.c.bf16 %v643_v16, %v642_v15  ;;  %v752_v18 = vpack.c.bf16 %v644_v21, %v644_v21 }
 0x1fd   : > { %667 = vst [vmem:[%s197_s13 + $0xc] sm:$0xff] %v751_v17  ;;  %668 = vst [vmem:[%s197_s13 + $0x14] sm:$0xf] %v752_v18 }
 0x1fe PF: > { %s14_s15 = sadd.s32 1, %s855_s15  }
 0x1ff   : > { %p11_p4 = scmp.ge.s32.totalorder %s14_s15, 4  }
 0x201   :  { %13 = sbr.rel (!%p11_p4) target bundleno = 1 (0x1), region = 66 }

// kernel: rcan_forward.6
= control target key start
LH: loop header
LB: loop body
LE: loop exit
PB: predicated region body
PF: predicated region fallthrough
CT: control target
= control target key end

     0   :  { %s1507_s15 = smov 0   ;;  %s2062_s0 = inlined_call_operand.vmem [shape: bf16[2,16,384], index: 0, kind: input, shape index: {}]   ;;  %s2063_s1 = inlined_call_operand.vmem [shape: f32[1,384], index: 1, kind: input, shape index: {}]   ;;  %s2064_s2 = inlined_call_operand.vmem [shape: bf16[192,48], index: 2, kind: input, shape index: {}]   ;;  %s2065_s3 = inlined_call_operand.vmem [shape: f32[64,1], index: 3, kind: input, shape index: {}]   ;;  %s2066_s4 = inlined_call_operand.vmem [shape: bf16[2,64,384], index: 4, kind: output, shape index: {}]  }
   0x1 LB: > { %s1264_s16 = sadd.s32 4294967295, %s1475_s15   ;;  %p1268_p0 = scmp.ge.s32.totalorder %s1475_s15, 1  ;;  %s1475_s15 = sphi %s1507_s15, %s14_s15  }
   0x2   : > { %p162_p1 = scmp.lt.s32.totalorder %s1475_s15, 3 }
   0x4   : > { %p163_p2 = pnand %p1268_p0, %p162_p1 }
   0x6   : > { %166 = sbr.rel (%p163_p2) target bundleno = 572 (0x23c), region = 36 }
   0xb   : > { %p188_p3 = scmp.lt.s32.totalorder %s1264_s16, 1  ;;  %s1477_s21 = smov 127   ;;  %v1530_v16 = vld [vmem:[%s2064_s2] sm:$0xff]   ;;  %vm315_vm0 = vcmask 392192   ;;  %v1479_v17 = vmov 0   ;;  %v1001_v19 = vld [vmem:[%s2065_s3 + $0x8] sm:$0xff]  ;;  %v245_v26 = vlaneseq }
   0xc   : > { %s1478_s22 = smov 1   ;;  %360 = vmatprep.mubr.bf16.mxu0 %v1479_v17  ;;  %1453 = vset.pattern.permute.xlu1 %v1479_v17  ;;  %v1000_v18 = vld [vmem:[%s2065_s3] sm:$0xff]  ;;  %v1003_v20 = vld [vmem:[%s2065_s3 + $0x18] sm:$0xff]  ;;  %v1002_v21 = vld [vmem:[%s2065_s3 + $0x10] sm:$0xff]  ;;  %s1480_s13 = smov 18  }
   0xd   : > { %s2104_s16 = smov (!%p188_p3, %s1264_s16), 1  ;;  %1371 = vmatprep.mubr.msk.bf16.mxu1 %vm315_vm0, %v1530_v16  ;;  %1452 = vset.pattern.permute.xlu0 %v1479_v17  ;;  %v1005_v22 = vld [vmem:[%s2065_s3 + $0x28] sm:$0xff]  ;;  %v1004_v23 = vld [vmem:[%s2065_s3 + $0x20] sm:$0xff]  ;;  %v1007_v24 = vld [vmem:[%s2065_s3 + $0x38] sm:$0xff]  ;;  %v1562_v27 = vand.u32 127, %v245_v26  ;;  %s1481_s14 = smov 110  }
   0xe   : > { %s1407_s17 = smul.u32 24, %s2104_s16  ;;  %v1006_v25 = vld [vmem:[%s2065_s3 + $0x30] sm:$0xff] }
   0xf   : > { %vm269_vm1 = vcmp.lt.s32.totalorder %v1562_v27, 127  ;;  %vm247_vm2 = vcmp.lt.s32.totalorder %v1562_v27, 1  ;;  %vm514_vm3 = vcmp.lt.s32.totalorder %v1562_v27, 18  ;;  %vm951_vm4 = vcmp.lt.s32.totalorder %v1562_v27, 110  ;;  %s1408_s19 = smul.u32 96, %s2104_s16 }
  0x10   : > { %s192_s20 = scalar_lea.vmem %s2062_s0, %s1407_s17 }
  0x11   : > { %v199_v0 = vld [vmem:[%s192_s20] sm:$0xff]  ;;  %v201_v1 = vld [vmem:[%s192_s20 + $0xc] sm:$0xff]  ;;  %v200_v2 = vld [vmem:[%s192_s20 + $0x8] sm:$0xf] }
  0x12   : > { %v228_v3 = vunpack.c.h.bf16 %v199_v0  ;;  %v231_v4 = vunpack.c.h.bf16 %v201_v1  ;;  %v227_v5 = vunpack.c.l.bf16 %v199_v0  ;;  %v230_v6 = vunpack.c.l.bf16 %v201_v1  ;;  %v202_v7 = vld [vmem:[%s192_s20 + $0x14] sm:$0xf] }
  0x13   : > { %v229_v8 = vunpack.c.l.bf16 %v200_v2  ;;  %v232_v9 = vunpack.c.l.bf16 %v202_v7  ;;  %v1521_v10 = vcombine.low %v200_v2, %v202_v7  ;;  %v1523_v13 = vcombine.high %v199_v0, %v201_v1  ;;  %v1460_v2 = vld [vmem:[%s2064_s2 + $0x18] sm:$0xff]   ;;  %v1465_v7 = vld [vmem:[%s2064_s2 + $0x40] sm:$0xff]  }
  0x14   : > { %v1422_v11 = vpack.i.bf16 %v231_v4, %v228_v3  ;;  %v1432_v12 = vpack.i.bf16 %v230_v6, %v227_v5  ;;  %v1525_v14 = vcombine.low %v199_v0, %v201_v1  ;;  %v1458_v0 = vld [vmem:[%s2064_s2 + $0x8] sm:$0xff]   ;;  %v1459_v1 = vld [vmem:[%s2064_s2 + $0x10] sm:$0xff]   ;;  %v1461_v3 = vld [vmem:[%s2064_s2 + $0x20] sm:$0xff]  }
  0x15   : > { %v1427_v15 = vpack.i.bf16 %v232_v9, %v229_v8  ;;  %v1462_v4 = vld [vmem:[%s2064_s2 + $0x28] sm:$0xff]   ;;  %v1463_v5 = vld [vmem:[%s2064_s2 + $0x30] sm:$0xff]   ;;  %v1464_v6 = vld [vmem:[%s2064_s2 + $0x38] sm:$0xff]  }
  0x16   : > { %1423 = vrot.lane.b32.xlu0 %v1422_v11, %s1477_s21  ;;  %1433 = vrot.lane.b32.xlu1 %v1432_v12, %s1477_s21  ;;  %v1466_v8 = vld [vmem:[%s2064_s2 + $0x48] sm:$0xff]   ;;  %v1467_v9 = vld [vmem:[%s2064_s2 + $0x50] sm:$0xff]  }
  0x1a   : > { %1428 = vrot.lane.b32.xlu0 %v1427_v15, %s1477_s21  ;;  %1438 = vrot.lane.b32.xlu1 %v1432_v12, %s1478_s22  ;;  %s1909_s21 = scalar_lea.vmem %s2066_s4, %s1408_s19 }
  0x1e   : > { %1443 = vrot.lane.b32.xlu0 %v1422_v11, %s1478_s22  ;;  %1448 = vrot.lane.b32.xlu1 %v1427_v15, %s1478_s22 }
  0x22   : > { %1010 = vperm.xlu0 %1452, %v1000_v18   ;;  %1015 = vperm.xlu1 %1453, %v1001_v19  }
  0x26   : > { %1025 = vperm.xlu0 %1452, %v1003_v20   ;;  %1020 = vperm.xlu1 %1453, %v1002_v21  }
  0x2a   : > { %1035 = vperm.xlu0 %1452, %v1005_v22   ;;  %1030 = vperm.xlu1 %1453, %v1004_v23  }
  0x2e   : > { %1045 = vperm.xlu0 %1452, %v1007_v24   ;;  %1040 = vperm.xlu1 %1453, %v1006_v25  }
  0x88   : > { %v1424_v28 = vpop.permute.xlu0 %1423  ;;  %v1434_v29 = vpop.permute.xlu1 %1433 }
  0x89   : > { %v1426_v30 = vunpack.i.h.bf16 %v1424_v28  ;;  %v1425_v31 = vunpack.i.l.bf16 %v1424_v28  ;;  %v1436_v32 = vunpack.i.h.bf16 %v1434_v29  ;;  %v1435_v33 = vunpack.i.l.bf16 %v1434_v29 }
  0x8b   : > { %v272_v38 = vsel %vm269_vm1, %v1435_v33, %v1425_v31  ;;  %v273_v39 = vsel %vm269_vm1, %v1436_v32, %v1426_v30 }
  0x8c   : > { %v1429_v34 = vpop.permute.xlu0 %1428  ;;  %v1439_v35 = vpop.permute.xlu1 %1438  ;;  %v1566_v50 = vpack.c.bf16 %v273_v39, %v272_v38 }
  0x8d   : > { %v1431_v36 = vunpack.i.h.bf16 %v1429_v34  ;;  %v1430_v37 = vunpack.i.l.bf16 %v1429_v34  ;;  %v1440_v40 = vunpack.i.l.bf16 %v1439_v35  ;;  %v1441_v46 = vunpack.i.h.bf16 %v1439_v35 }
  0x8f   : > { %v274_v41 = vsel %vm269_vm1, %v1430_v37, %v1435_v33  ;;  %v275_v42 = vsel %vm269_vm1, %v1431_v36, %v1436_v32  ;;  %v270_v43 = vsel %vm269_vm1, %v1425_v31, %v1430_v37  ;;  %v271_v44 = vsel %vm269_vm1, %v1426_v30, %v1431_v36 }
  0x90   : > { %v278_v45 = vpack.c.bf16 %v275_v42, %v274_v41  ;;  %v1444_v47 = vpop.permute.xlu0 %1443  ;;  %v1449_v48 = vpop.permute.xlu1 %1448  ;;  %v277_v49 = vpack.c.bf16 %v271_v44, %v270_v43 }
  0x91   : > { %v1446_v51 = vunpack.i.h.bf16 %v1444_v47  ;;  %v1445_v52 = vunpack.i.l.bf16 %v1444_v47  ;;  %v1451_v53 = vunpack.i.h.bf16 %v1449_v48  ;;  %v1450_v54 = vunpack.i.l.bf16 %v1449_v48 }
  0x92   : > { %338 = vmatprep.subr.bf16.mxu0 %v277_v49  ;;  %1365 = vmatprep.subr.bf16.mxu1 %v278_v45 }
  0x93   : > { %v249_v55 = vsel %vm247_vm2, %v1446_v51, %v1451_v53  ;;  %v248_v56 = vsel %vm247_vm2, %v1445_v52, %v1450_v54  ;;  %339 = vmatpush1.bf16.msra.mxu0 %v1566_v50  ;;  %1366 = vmatpush3.bf16.msra.mxu1 %v278_v45  ;;  %v250_v57 = vsel %vm247_vm2, %v1440_v40, %v1445_v52 }
  0x94   : > { %v256_v58 = vpack.c.bf16 %v249_v55, %v248_v56  ;;  %340 = vmatprep.subr.bf16.mxu0 %v1523_v13  ;;  %1367 = vmatprep.subr.bf16.mxu1 %v1521_v10  ;;  %v251_v59 = vsel %vm247_vm2, %v1441_v46, %v1446_v51  ;;  %v252_v61 = vsel %vm247_vm2, %v1450_v54, %v1440_v40 }
  0x95   : > { %v255_v60 = vpack.c.bf16 %v251_v59, %v250_v57  ;;  %v253_v62 = vsel %vm247_vm2, %v1451_v53, %v1441_v46 }
  0x96   : > { %v254_v63 = vpack.c.bf16 %v253_v62, %v252_v61 }
  0x97   : > { %341 = vmatpush1.bf16.msra.mxu0 %v1525_v14  ;;  %1368 = vmatpush3.bf16.msra.mxu1 %v1521_v10 }
  0x98   : > { %342 = vmatprep.subr.bf16.mxu0 %v255_v60  ;;  %1369 = vmatprep.subr.bf16.mxu1 %v256_v58 }
  0x9b   : > { %343 = vmatpush1.bf16.msra.mxu0 %v254_v63  ;;  %1370 = vmatpush3.bf16.msra.mxu1 %v256_v58 }
  0x9c   : > { %581 = vmatprep.subr.bf16.mxu1 %v277_v49  ;;  %1379 = vmatprep.subr.bf16.mxu0 %v278_v45 }
  0x9e   : > { %1278 = vmatmul.mubr.msk.bf16.vlgmr.msra.gmra.mxu0 %vm315_vm0, %v1530_v16  ;;  %1372 = vmatmul.mubr.msk.bf16.vlgmr.msra.gmra.mxu1 %vm315_vm0, %v1458_v0 }
  0x9f   : > { %582 = vmatpush1.bf16.msra.mxu1 %v1566_v50  ;;  %1380 = vmatpush3.bf16.msra.mxu0 %v278_v45 }
  0xa0   : > { %583 = vmatprep.subr.bf16.mxu1 %v1523_v13  ;;  %1381 = vmatprep.subr.bf16.mxu0 %v1521_v10 }
  0xa1   : > { %370 = vmatprep.mubr.bf16.mxu0 %v1479_v17  ;;  %1375 = vmatprep.mubr.msk.bf16.mxu1 %vm315_vm0, %v1459_v1 }
  0xa3   : > { %584 = vmatpush1.bf16.msra.mxu1 %v1525_v14  ;;  %1382 = vmatpush3.bf16.msra.mxu0 %v1521_v10 }
  0xa4   : > { %585 = vmatprep.subr.bf16.mxu1 %v255_v60  ;;  %1383 = vmatprep.subr.bf16.mxu0 %v256_v58 }
  0xa6   : > { %1279 = vmatmul.mubr.msk.bf16.gmra.mxu0 %vm315_vm0, %v1458_v0  ;;  %1376 = vmatmul.mubr.msk.bf16.gmra.mxu1 %vm315_vm0, %v1460_v2 }
  0xa7   : > { %586 = vmatpush1.bf16.msra.mxu1 %v254_v63  ;;  %1384 = vmatpush3.bf16.msra.mxu0 %v256_v58 }
  0xa8   : > { %775 = vmatprep.subr.bf16.mxu0 %v277_v49  ;;  %1393 = vmatprep.subr.bf16.mxu1 %v278_v45 }
  0xa9   : > { %380 = vmatprep.mubr.bf16.mxu0 %v1479_v17  ;;  %603 = vmatprep.mubr.bf16.mxu1 %v1479_v17 }
  0xae   : > { %1280 = vmatmul.mubr.msk.bf16.gmra.mxu0 %vm315_vm0, %v1459_v1  ;;  %1290 = vmatmul.mubr.msk.bf16.vlgmr.msra.gmra.mxu1 %vm315_vm0, %v1461_v3 }
  0xaf   : > { %1394 = vmatpush3.bf16.msra.mxu1 %v278_v45  ;;  %390 = vmatprep.mubr.bf16.mxu0 %v1479_v17 }
  0xb0   : > { %1395 = vmatprep.subr.bf16.mxu1 %v1521_v10  ;;  %613 = vmatprep.mubr.bf16.mxu1 %v1479_v17 }
  0xb3   : > { %1396 = vmatpush3.bf16.msra.mxu1 %v1521_v10  ;;  %v1468_v10 = vld [vmem:[%s2064_s2 + $0x58] sm:$0xff]  }
  0xb4   : > { %1397 = vmatprep.subr.bf16.mxu1 %v256_v58 }
  0xb6   : > { %1281 = vmatmul.mubr.msk.bf16.gmra.mxu0 %vm315_vm0, %v1460_v2  ;;  %1291 = vmatmul.mubr.msk.bf16.gmra.mxu1 %vm315_vm0, %v1462_v4 }
  0xb7   : > { %1398 = vmatpush3.bf16.msra.mxu1 %v256_v58  ;;  %623 = vmatprep.mubr.bf16.mxu1 %v1479_v17 }
  0xb8   : > { %1385 = vmatprep.mubr.msk.bf16.mxu0 %vm315_vm0, %v1461_v3 }
  0xbe   : > { %1292 = vmatmul.mubr.msk.bf16.gmra.mxu1 %vm315_vm0, %v1463_v5  ;;  %1386 = vmatmul.mubr.msk.bf16.vlgmr.msra.gmra.mxu0 %vm315_vm0, %v1462_v4 }
  0xbf   : > { %776 = vmatpush1.bf16.msra.mxu0 %v1566_v50  ;;  %633 = vmatprep.mubr.bf16.mxu1 %v1479_v17 }
  0xc0   : > { %777 = vmatprep.subr.bf16.mxu0 %v1523_v13  ;;  %1389 = vmatprep.mubr.msk.bf16.mxu0 %vm315_vm0, %v1463_v5 }
  0xc3   : > { %778 = vmatpush1.bf16.msra.mxu0 %v1525_v14 }
  0xc4   : > { %779 = vmatprep.subr.bf16.mxu0 %v255_v60 }
  0xc6   : > { %1293 = vmatmul.mubr.msk.bf16.gmra.mxu1 %vm315_vm0, %v1464_v6  ;;  %1390 = vmatmul.mubr.msk.bf16.gmra.mxu0 %vm315_vm0, %v1464_v6 }
  0xc7   : > { %780 = vmatpush1.bf16.msra.mxu0 %v254_v63  ;;  %797 = vmatprep.mubr.bf16.mxu0 %v1479_v17 }
  0xc8   : > { %1399 = vmatprep.mubr.msk.bf16.mxu1 %vm315_vm0, %v1465_v7 }
  0xce   : > { %1302 = vmatmul.mubr.msk.bf16.vlgmr.msra.gmra.mxu0 %vm315_vm0, %v1465_v7  ;;  %1400 = vmatmul.mubr.msk.bf16.vlgmr.msra.gmra.mxu1 %vm315_vm0, %v1466_v8 }
  0xcf   : > { %807 = vmatprep.mubr.bf16.mxu0 %v1479_v17  ;;  %1403 = vmatprep.mubr.msk.bf16.mxu1 %vm315_vm0, %v1467_v9 }
  0xd6   : > { %1303 = vmatmul.mubr.msk.bf16.gmra.mxu0 %vm315_vm0, %v1466_v8  ;;  %1404 = vmatmul.mubr.msk.bf16.gmra.mxu1 %vm315_vm0, %v1468_v10 }
  0xd7   : > { %817 = vmatprep.mubr.bf16.mxu0 %v1479_v17 }
  0xde   : > { %1304 = vmatmul.mubr.msk.bf16.gmra.mxu0 %vm315_vm0, %v1467_v9 }
  0xdf   : > { %827 = vmatprep.mubr.bf16.mxu0 %v1479_v17 }
  0xe6   : > { %1305 = vmatmul.mubr.msk.bf16.gmra.mxu0 %vm315_vm0, %v1468_v10 }
 0x15e   : > { %v362_v11 = vpop.f32.mrf.mxu0  ;;  %v1373_v12 = vpop.f32.mrf.mxu1 }
 0x15f   : > { %466 = vrot.lane.b32.xlu0 %v362_v11, %s1480_s13 }
 0x160   : > { %v364_v13 = vpop.f32.mrf.mxu0  ;;  %v435_v14 = vpop.f32.mrf.mxu1 }
 0x162   : > { %v366_v15 = vpop.f32.mrf.mxu0  ;;  %v1374_v16 = vpop.f32.mrf.mxu1 }
 0x163   : > { %502 = vrot.lane.b32.xlu0 %v1373_v12, %s1480_s13  ;;  %468 = vrot.lane.b32.xlu1 %v366_v15, %s1480_s13 }
 0x164   : > { %v368_v18 = vpop.f32.mrf.mxu0  ;;  %v438_v19 = vpop.f32.mrf.mxu1 }
 0x166   : > { %v372_v20 = vpop.f32.mrf.mxu0  ;;  %v1377_v21 = vpop.f32.mrf.mxu1 }
 0x167   : > { %482 = vrot.lane.b32.xlu0 %v364_v13, %s1480_s13  ;;  %504 = vrot.lane.b32.xlu1 %v1374_v16, %s1480_s13 }
 0x168   : > { %v374_v17 = vpop.f32.mrf.mxu0  ;;  %v451_v22 = vpop.f32.mrf.mxu1 }
 0x16a   : > { %v376_v23 = vpop.f32.mrf.mxu0  ;;  %v1378_v24 = vpop.f32.mrf.mxu1 }
 0x16b   : > { %498 = vrot.lane.b32.xlu0 %v435_v14, %s1480_s13  ;;  %484 = vrot.lane.b32.xlu1 %v368_v18, %s1480_s13 }
 0x16c   : > { %v378_v25 = vpop.f32.mrf.mxu0  ;;  %v454_v28 = vpop.f32.mrf.mxu1 }
 0x16e   : > { %v382_v29 = vpop.f32.mrf.mxu0  ;;  %v1670_v30 = vpop.f32.mrf.mxu1 }
 0x16f   : > { %500 = vrot.lane.b32.xlu1 %v438_v19, %s1480_s13  ;;  %470 = vrot.lane.b32.xlu0 %v372_v20, %s1480_s13 }
 0x170   : > { %v384_v31 = vpop.f32.mrf.mxu0  ;;  %v1674_v32 = vpop.f32.mrf.mxu1 }
 0x172   : > { %v386_v33 = vpop.f32.mrf.mxu0  ;;  %v1676_v34 = vpop.f32.mrf.mxu1 }
 0x173   : > { %510 = vrot.lane.b32.xlu0 %v1377_v21, %s1480_s13  ;;  %472 = vrot.lane.b32.xlu1 %v376_v23, %s1480_s13 }
 0x174   : > { %v388_v35 = vpop.f32.mrf.mxu0  ;;  %v1680_v36 = vpop.f32.mrf.mxu1 }
 0x176   : > { %v392_v37 = vpop.f32.mrf.mxu0  ;;  %v1682_v38 = vpop.f32.mrf.mxu1 }
 0x177   : > { %486 = vrot.lane.b32.xlu0 %v374_v17, %s1480_s13  ;;  %512 = vrot.lane.b32.xlu1 %v1378_v24, %s1480_s13  ;;  %v1756_v17 = vpop.permute.xlu0 %1010 }
 0x178   : > { %v394_v39 = vpop.f32.mrf.mxu0  ;;  %v1686_v40 = vpop.f32.mrf.mxu1 }
 0x17a   : > { %v396_v41 = vpop.f32.mrf.mxu0  ;;  %v1688_v42 = vpop.f32.mrf.mxu1 }
 0x17b   : > { %506 = vrot.lane.b32.xlu0 %v451_v22, %s1480_s13  ;;  %488 = vrot.lane.b32.xlu1 %v378_v25, %s1480_s13  ;;  %v1760_v22 = vpop.permute.xlu1 %1015  ;;  %v1763_v23 = vpop.permute.xlu0 %1025 }
 0x17c   : > { %v398_v43 = vpop.f32.mrf.mxu0  ;;  %v1692_v44 = vpop.f32.mrf.mxu1 }
 0x17e   : > { %v1694_v45 = vpop.f32.mrf.mxu1  ;;  %v1696_v46 = vpop.f32.mrf.mxu0 }
 0x17f   : > { %508 = vrot.lane.b32.xlu1 %v454_v28, %s1480_s13  ;;  %474 = vrot.lane.b32.xlu0 %v382_v29, %s1480_s13  ;;  %v1765_v24 = vpop.permute.xlu1 %1020  ;;  %v1767_v25 = vpop.permute.xlu0 %1035 }
 0x180   : > { %v1700_v47 = vpop.f32.mrf.mxu1  ;;  %v1702_v48 = vpop.f32.mrf.mxu0 }
 0x182   : > { %v1704_v49 = vpop.f32.mrf.mxu1  ;;  %v1706_v50 = vpop.f32.mrf.mxu0 }
 0x183   : > { %490 = vrot.lane.b32.xlu0 %v384_v31, %s1480_s13  ;;  %476 = vrot.lane.b32.xlu1 %v386_v33, %s1480_s13  ;;  %v1769_v28 = vpop.permute.xlu1 %1030  ;;  %v1771_v29 = vpop.permute.xlu0 %1045 }
 0x184   : > { %v1710_v51 = vpop.f32.mrf.mxu1  ;;  %v1712_v52 = vpop.f32.mrf.mxu0  ;;  %2079 = vst [vmem:[#allocation8_spill] sm:$0xff] %v1771_v29 }
 0x186   : > { %v1714_v53 = vpop.f32.mrf.mxu1  ;;  %v1716_v54 = vpop.f32.mrf.mxu0 }
 0x187   : > { %2073 = vst [vmem:[#allocation2_spill] sm:$0xff] %v1714_v53  ;;  %2074 = vst [vmem:[#allocation3_spill] sm:$0xff] %v1716_v54  ;;  %492 = vrot.lane.b32.xlu1 %v388_v35, %s1480_s13  ;;  %478 = vrot.lane.b32.xlu0 %v392_v37, %s1480_s13  ;;  %v1773_v31 = vpop.permute.xlu1 %1040  ;;  %v1075_v54 = vshrl.u32 %v245_v26, 7 }
 0x188   : > { %v1720_v55 = vpop.f32.mrf.mxu1  ;;  %v1722_v56 = vpop.f32.mrf.mxu0  ;;  %2080 = vst [vmem:[#allocation9_spill] sm:$0xff] %v1773_v31 }
 0x189   : > { %2075 = vst [vmem:[#allocation4_spill] sm:$0xff] %v1720_v55  ;;  %v1084_v29 = vsub.s32 2, %v1075_v54 }
 0x18a   : > { %v1724_v57 = vpop.f32.mrf.mxu1  ;;  %v1726_v58 = vpop.f32.mrf.mxu0 }
 0x18b   : > { %2076 = vst [vmem:[#allocation5_spill] sm:$0xff] %v1724_v57  ;;  %2077 = vst [vmem:[#allocation6_spill] sm:$0xff] %v1726_v58  ;;  %494 = vrot.lane.b32.xlu0 %v394_v39, %s1480_s13  ;;  %480 = vrot.lane.b32.xlu1 %v396_v41, %s1480_s13 }
 0x18c   : > { %v1730_v59 = vpop.f32.mrf.mxu1  ;;  %v1732_v60 = vpop.f32.mrf.mxu0 }
 0x18d   : > { %2078 = vst [vmem:[#allocation7_spill] sm:$0xff] %v1730_v59 }
 0x18e   : > { %v799_v61 = vpop.f32.mrf.mxu0  ;;  %v1401_v62 = vpop.f32.mrf.mxu1 }
 0x18f   : > { %496 = vrot.lane.b32.xlu1 %v398_v43, %s1480_s13  ;;  %903 = vrot.lane.b32.xlu0 %v799_v61, %s1481_s14 }
 0x190   : > { %v801_v63 = vpop.f32.mrf.mxu0  ;;  %v872_v0 = vpop.f32.mrf.mxu1 }
 0x192   : > { %v803_v1 = vpop.f32.mrf.mxu0  ;;  %v1402_v2 = vpop.f32.mrf.mxu1 }
 0x193   : > { %939 = vrot.lane.b32.xlu1 %v1401_v62, %s1481_s14  ;;  %941 = vrot.lane.b32.xlu0 %v1402_v2, %s1481_s14 }
 0x194   : > { %v805_v3 = vpop.f32.mrf.mxu0  ;;  %v875_v5 = vpop.f32.mrf.mxu1 }
 0x196   : > { %v809_v4 = vpop.f32.mrf.mxu0  ;;  %v1405_v8 = vpop.f32.mrf.mxu1 }
 0x197   : > { %919 = vrot.lane.b32.xlu1 %v801_v63, %s1481_s14  ;;  %921 = vrot.lane.b32.xlu0 %v805_v3, %s1481_s14 }
 0x198   : > { %v811_v6 = vpop.f32.mrf.mxu0  ;;  %v888_v10 = vpop.f32.mrf.mxu1 }
 0x19a   : > { %v813_v7 = vpop.f32.mrf.mxu0  ;;  %v1406_v13 = vpop.f32.mrf.mxu1 }
 0x19b   : > { %935 = vrot.lane.b32.xlu1 %v872_v0, %s1481_s14  ;;  %937 = vrot.lane.b32.xlu0 %v875_v5, %s1481_s14 }
 0x19c   : > { %v815_v9 = vpop.f32.mrf.mxu0  ;;  %v891_v15 = vpop.f32.mrf.mxu1 }
 0x19e   : > { %v819_v11 = vpop.f32.mrf.mxu0 }
 0x19f   : > { %905 = vrot.lane.b32.xlu1 %v803_v1, %s1481_s14  ;;  %907 = vrot.lane.b32.xlu0 %v809_v4, %s1481_s14 }
 0x1a0   : > { %v821_v12 = vpop.f32.mrf.mxu0 }
 0x1a2   : > { %v823_v14 = vpop.f32.mrf.mxu0 }
 0x1a3   : > { %923 = vrot.lane.b32.xlu1 %v811_v6, %s1481_s14  ;;  %925 = vrot.lane.b32.xlu0 %v815_v9, %s1481_s14 }
 0x1a4   : > { %v825_v16 = vpop.f32.mrf.mxu0 }
 0x1a6   : > { %v829_v18 = vpop.f32.mrf.mxu0 }
 0x1a7   : > { %943 = vrot.lane.b32.xlu1 %v888_v10, %s1481_s14  ;;  %945 = vrot.lane.b32.xlu0 %v891_v15, %s1481_s14 }
 0x1a8   : > { %v831_v19 = vpop.f32.mrf.mxu0 }
 0x1aa   : > { %v833_v20 = vpop.f32.mrf.mxu0 }
 0x1ab   : > { %909 = vrot.lane.b32.xlu1 %v813_v7, %s1481_s14  ;;  %911 = vrot.lane.b32.xlu0 %v819_v11, %s1481_s14 }
 0x1ac   : > { %v835_v21 = vpop.f32.mrf.mxu0 }
 0x1af   : > { %927 = vrot.lane.b32.xlu1 %v821_v12, %s1481_s14  ;;  %929 = vrot.lane.b32.xlu0 %v825_v16, %s1481_s14 }
 0x1b3   : > { %913 = vrot.lane.b32.xlu1 %v823_v14, %s1481_s14  ;;  %917 = vrot.lane.b32.xlu0 %v833_v20, %s1481_s14 }
 0x1b7   : > { %915 = vrot.lane.b32.xlu1 %v829_v18, %s1481_s14  ;;  %933 = vrot.lane.b32.xlu0 %v835_v21, %s1481_s14 }
 0x1bb   : > { %931 = vrot.lane.b32.xlu1 %v831_v19, %s1481_s14  ;;  %949 = vrot.lane.b32.xlu0 %v1406_v13, %s1481_s14 }
 0x1bf   : > { %947 = vrot.lane.b32.xlu1 %v1405_v8, %s1481_s14 }
 0x1d1   : > { %v467_v33 = vpop.permute.xlu0 %466 }
 0x1d5   : > { %v1775_v35 = vpop.permute.xlu0 %502  ;;  %v469_v37 = vpop.permute.xlu1 %468 }
 0x1d9   : > { %v483_v39 = vpop.permute.xlu0 %482  ;;  %v505_v41 = vpop.permute.xlu1 %504 }
 0x1dd   : > { %v499_v43 = vpop.permute.xlu0 %498  ;;  %v485_v61 = vpop.permute.xlu1 %484 }
 0x1de   : > { %v515_v26 = vsel %vm514_vm3, %v483_v39, %v499_v43  ;;  %v524_v53 = vsel %vm514_vm3, %v469_v37, %v485_v61 }
 0x1e1   : > { %v501_v62 = vpop.permute.xlu1 %500  ;;  %v1777_v63 = vpop.permute.xlu0 %470 }
 0x1e5   : > { %v511_v0 = vpop.permute.xlu0 %510  ;;  %v1780_v1 = vpop.permute.xlu1 %472 }
 0x1e6   : > { %v1785_v2 = vsel %vm514_vm3, %v505_v41, %v1780_v1 }
 0x1e9   : > { %v487_v3 = vpop.permute.xlu0 %486  ;;  %v513_v4 = vpop.permute.xlu1 %512 }
 0x1ed   : > { %v1787_v5 = vpop.permute.xlu0 %506  ;;  %v1789_v6 = vpop.permute.xlu1 %488 }
 0x1ee   : > { %v1794_v7 = vsel %vm514_vm3, %v1789_v6, %v505_v41 }
 0x1f1   : > { %v1796_v8 = vpop.permute.xlu1 %508  ;;  %v1798_v9 = vpop.permute.xlu0 %474 }
 0x1f5   : > { %v1800_v10 = vpop.permute.xlu0 %490  ;;  %v1802_v11 = vpop.permute.xlu1 %476 }
 0x1f9   : > { %v1804_v12 = vpop.permute.xlu1 %492  ;;  %v1806_v13 = vpop.permute.xlu0 %478 }
 0x1fa   : > { %2081 = vst [vmem:[#allocation10_spill] sm:$0xff] %v1806_v13  ;;  %v1811_v14 = vsel %vm514_vm3, %v511_v0, %v1806_v13  ;;  %v1072_v13 = vld [vmem:[%s2063_s1] sm:$0x7] }
 0x1fb   : > { %2082 = vst [vmem:[#allocation11_spill] sm:$0xff] %v1811_v14  ;;  %v1858_v57 = vrot.slane %v1072_v13, %v1084_v29  ;;  %v517_v29 = vsel %vm514_vm3, %v487_v3, %v1775_v35 }
 0x1fd   : > { %v1813_v15 = vpop.permute.xlu0 %494  ;;  %v1815_v16 = vpop.permute.xlu1 %480 }
 0x1fe   : > { %2083 = vst [vmem:[#allocation12_spill] sm:$0xff] %v1813_v15  ;;  %2084 = vst [vmem:[#allocation13_spill] sm:$0xff] %v1815_v16  ;;  %v1820_v18 = vsel %vm514_vm3, %v1813_v15, %v511_v0  ;;  %v1825_v19 = vsel %vm514_vm3, %v513_v4, %v1815_v16  ;;  %v531_v0 = vsel %vm514_vm3, %v499_v43, %v467_v33  ;;  %v1080_v15 = vsub.s32 1, %v1075_v54 }
 0x1ff   : > { %2085 = vst [vmem:[#allocation14_spill] sm:$0xff] %v1820_v18  ;;  %v1076_v18 = vsub.s32 0, %v1075_v54  ;;  %v709_v58 = vadd.f32 %v1670_v30, %v531_v0  ;;  %v711_v30 = vadd.f32 %v1702_v48, %v515_v26  ;;  %v516_v43 = vsel %vm514_vm3, %v485_v61, %v501_v62 }
 0x200   : > { %v1856_v54 = vrot.slane %v1072_v13, %v1080_v15  ;;  %v532_v0 = vsel %vm514_vm3, %v501_v62, %v469_v37  ;;  %v714_v15 = vadd.f32 %v1712_v52, %v516_v43  ;;  %v526_v52 = vsel %vm514_vm3, %v1780_v1, %v1789_v6 }
 0x201   : > { %v1827_v20 = vpop.permute.xlu1 %496  ;;  %v904_v21 = vpop.permute.xlu0 %903  ;;  %v1854_v16 = vrot.slane %v1072_v13, %v1076_v18  ;;  %v712_v13 = vadd.f32 %v1676_v34, %v532_v0 }
 0x202   : > { %2086 = vst [vmem:[#allocation15_spill] sm:$0xff] %v1827_v20  ;;  %v1832_v41 = vsel %vm514_vm3, %v1827_v20, %v513_v4  ;;  %v523_v4 = vsel %vm514_vm3, %v467_v33, %v483_v39  ;;  %v713_v39 = vadd.f32 %v1680_v36, %v524_v53 }
 0x203   : > { %2087 = vst [vmem:[#allocation16_spill] sm:$0xff] %v1832_v41  ;;  %v710_v33 = vadd.f32 %v1674_v32, %v523_v4 }
 0x205   : > { %v1835_v31 = vpop.permute.xlu1 %939  ;;  %v1837_v55 = vpop.permute.xlu0 %941 }
 0x209   : > { %v920_v41 = vpop.permute.xlu1 %919  ;;  %v922_v59 = vpop.permute.xlu0 %921 }
 0x20a   : > { %v960_v14 = vsel %vm951_vm4, %v904_v21, %v920_v41 }
 0x20b   : > { %v976_v20 = vadd.f32 %v960_v14, %v709_v58 }
 0x20d   : > { %v1048_v18 = vadd.f32 %v1756_v17, %v976_v20  ;;  %v936_v58 = vpop.permute.xlu1 %935  ;;  %v938_v14 = vpop.permute.xlu0 %937  ;;  %v533_v20 = vsel %vm514_vm3, %v1775_v35, %v1777_v63 }
 0x20e   : > { %v952_v32 = vsel %vm951_vm4, %v920_v41, %v936_v58  ;;  %v968_v36 = vsel %vm951_vm4, %v936_v58, %v904_v21  ;;  %v953_v48 = vsel %vm951_vm4, %v922_v59, %v938_v14  ;;  %v525_v21 = vsel %vm514_vm3, %v1777_v63, %v487_v3 }
 0x20f   : > { %v1089_v53 = vmul.f32 %v1854_v16, %v1048_v18  ;;  %v977_v37 = vadd.f32 %v952_v32, %v710_v33  ;;  %v978_v61 = vadd.f32 %v968_v36, %v711_v30  ;;  %v980_v62 = vadd.f32 %v953_v48, %v713_v39 }
 0x210   : > { %v717_v41 = vadd.f32 %v1696_v46, %v517_v29  ;;  %v716_v1 = vadd.f32 %v1686_v40, %v525_v21  ;;  %v719_v18 = vadd.f32 %v1692_v44, %v526_v52 }
 0x211   : > { %v1049_v4 = vadd.f32 %v1756_v17, %v977_v37  ;;  %v1050_v26 = vadd.f32 %v1756_v17, %v978_v61  ;;  %v1052_v33 = vadd.f32 %v1760_v22, %v980_v62  ;;  %v906_v34 = vpop.permute.xlu1 %905  ;;  %v908_v30 = vpop.permute.xlu0 %907 }
 0x212   : > { %v961_v35 = vsel %vm951_vm4, %v906_v34, %v922_v59  ;;  %v969_v63 = vsel %vm951_vm4, %v938_v14, %v906_v34  ;;  %v970_v46 = vsel %vm951_vm4, %v1835_v31, %v908_v30  ;;  %v715_v59 = vadd.f32 %v1682_v38, %v533_v20 }
 0x213   : > { %v1090_v17 = vmul.f32 %v1856_v54, %v1049_v4  ;;  %v1091_v3 = vmul.f32 %v1858_v57, %v1050_v26  ;;  %v1093_v39 = vmul.f32 %v1856_v54, %v1052_v33  ;;  %v979_v43 = vadd.f32 %v961_v35, %v712_v13 }
 0x214   : > { %v981_v6 = vadd.f32 %v969_v63, %v714_v15  ;;  %v984_v0 = vadd.f32 %v970_v46, %v717_v41  ;;  %v519_v26 = vsel %vm514_vm3, %v1800_v10, %v1787_v5  ;;  %v720_v63 = vadd.f32 %v1706_v50, %v1794_v7 }
 0x215   : > { %v1328_v58 = vpack.c.bf16 %v1090_v17, %v1089_v53  ;;  %v1329_v14 = vpack.c.bf16 %v1091_v3, %v1091_v3  ;;  %v1051_v29 = vadd.f32 %v1760_v22, %v979_v43  ;;  %v924_v32 = vpop.permute.xlu1 %923  ;;  %v926_v36 = vpop.permute.xlu0 %925  ;;  %v535_v17 = vsel %vm514_vm3, %v1787_v5, %v1798_v9 }
 0x216   : > { %v1053_v48 = vadd.f32 %v1760_v22, %v981_v6  ;;  %v1056_v37 = vadd.f32 %v1765_v24, %v984_v0  ;;  %v954_v38 = vsel %vm951_vm4, %v924_v32, %v1835_v31  ;;  %v962_v40 = vsel %vm951_vm4, %v908_v30, %v924_v32 }
 0x217   : > { %1193 = vst [vmem:[%s1909_s21] sm:$0xff] %v1328_v58  ;;  %1194 = vst [vmem:[%s1909_s21 + $0x8] sm:$0xf] %v1329_v14  ;;  %v1092_v44 = vmul.f32 %v1854_v16, %v1051_v29  ;;  %v982_v53 = vadd.f32 %v962_v40, %v715_v59  ;;  %v983_v61 = vadd.f32 %v954_v38, %v716_v1 }
 0x218   : > { %v955_v22 = vsel %vm951_vm4, %v926_v36, %v1837_v55  ;;  %v1094_v62 = vmul.f32 %v1858_v57, %v1053_v48  ;;  %v1097_v13 = vmul.f32 %v1858_v57, %v1056_v37  ;;  %v527_v3 = vsel %vm514_vm3, %v1798_v9, %v1800_v10 }
 0x219   : > { %v986_v31 = vadd.f32 %v955_v22, %v719_v18  ;;  %v1330_v15 = vpack.c.bf16 %v1093_v39, %v1092_v44  ;;  %v1054_v20 = vadd.f32 %v1765_v24, %v982_v53  ;;  %v1055_v21 = vadd.f32 %v1765_v24, %v983_v61  ;;  %v944_v41 = vpop.permute.xlu1 %943  ;;  %v946_v4 = vpop.permute.xlu0 %945 }
 0x21a   : > { %v1331_v33 = vpack.c.bf16 %v1094_v62, %v1094_v62  ;;  %v1333_v34 = vpack.c.bf16 %v1097_v13, %v1097_v13  ;;  %v718_v24 = vadd.f32 %v1688_v42, %v1785_v2  ;;  %v723_v39 = vadd.f32 %v1722_v56, %v519_v26 }
 0x21b   : > { %v1058_v30 = vadd.f32 %v1763_v23, %v986_v31  ;;  %1195 = vst [vmem:[%s1909_s21 + $0xc] sm:$0xff] %v1330_v15  ;;  %v1095_v52 = vmul.f32 %v1854_v16, %v1054_v20  ;;  %v1096_v35 = vmul.f32 %v1856_v54, %v1055_v21  ;;  %v528_v9 = vsel %vm514_vm3, %v1802_v11, %v1804_v12 }
 0x21c   : > { %1196 = vst [vmem:[%s1909_s21 + $0x14] sm:$0xf] %v1331_v33  ;;  %1198 = vst [vmem:[%s1909_s21 + $0x20] sm:$0xf] %v1333_v34  ;;  %v721_v1 = vadd.f32 %v1694_v45, %v535_v17  ;;  %v722_v6 = vadd.f32 %v1700_v47, %v527_v3  ;;  %v520_v0 = vsel %vm514_vm3, %v1804_v12, %v1796_v8  ;;  %v2088_v33 = vld [vmem:[#allocation5_spill] sm:$0xff] }
 0x21d   : > { %v1099_v46 = vmul.f32 %v1856_v54, %v1058_v30  ;;  %v1332_v42 = vpack.c.bf16 %v1096_v35, %v1095_v52  ;;  %v910_v2 = vpop.permute.xlu1 %909  ;;  %v912_v43 = vpop.permute.xlu0 %911  ;;  %v725_v47 = vadd.f32 %v1710_v51, %v528_v9  ;;  %v726_v37 = vadd.f32 %v1732_v60, %v520_v0  ;;  %v2089_v30 = vld [vmem:[#allocation15_spill] sm:$0xff]  ;;  %v2090_v52 = vld [vmem:[#allocation13_spill] sm:$0xff]  ;;  %v2095_v9 = vld [vmem:[#allocation6_spill] sm:$0xff] }
 0x21e   : > { %v963_v50 = vsel %vm951_vm4, %v910_v2, %v926_v36  ;;  %v971_v7 = vsel %vm951_vm4, %v1837_v55, %v910_v2  ;;  %v972_v5 = vsel %vm951_vm4, %v944_v41, %v912_v43  ;;  %v536_v55 = vsel %vm514_vm3, %v1796_v8, %v1802_v11  ;;  %v2091_v2 = vld [vmem:[#allocation11_spill] sm:$0xff] }
 0x21f   : > { %1197 = vst [vmem:[%s1909_s21 + $0x18] sm:$0xff] %v1332_v42  ;;  %v985_v56 = vadd.f32 %v963_v50, %v718_v24  ;;  %v987_v10 = vadd.f32 %v971_v7, %v720_v63  ;;  %v990_v59 = vadd.f32 %v972_v5, %v723_v39  ;;  %v724_v51 = vadd.f32 %v1704_v49, %v536_v55  ;;  %v2093_v7 = vld [vmem:[#allocation7_spill] sm:$0xff] }
 0x220   : > { %v730_v34 = vadd.f32 %v2088_v33, %v1825_v19 }
 0x221   : > { %v1057_v18 = vadd.f32 %v1763_v23, %v985_v56  ;;  %v1059_v58 = vadd.f32 %v1763_v23, %v987_v10  ;;  %v1062_v14 = vadd.f32 %v1769_v28, %v990_v59  ;;  %v928_v29 = vpop.permute.xlu1 %927  ;;  %v930_v45 = vpop.permute.xlu0 %929 }
 0x222   : > { %v956_v32 = vsel %vm951_vm4, %v928_v29, %v944_v41  ;;  %v964_v11 = vsel %vm951_vm4, %v912_v43, %v928_v29  ;;  %v957_v36 = vsel %vm951_vm4, %v930_v45, %v946_v4  ;;  %v2092_v43 = vld [vmem:[#allocation2_spill] sm:$0xff] }
 0x223   : > { %v1098_v8 = vmul.f32 %v1854_v16, %v1057_v18  ;;  %v1100_v12 = vmul.f32 %v1858_v57, %v1059_v58  ;;  %v1103_v23 = vmul.f32 %v1858_v57, %v1062_v14  ;;  %v988_v48 = vadd.f32 %v964_v11, %v721_v1  ;;  %v2096_v1 = vld [vmem:[#allocation8_spill] sm:$0xff]  ;;  %v2098_v58 = vld [vmem:[#allocation10_spill] sm:$0xff] }
 0x224   : > { %v989_v38 = vadd.f32 %v956_v32, %v722_v6  ;;  %v992_v40 = vadd.f32 %v957_v36, %v725_v47  ;;  %v727_v50 = vadd.f32 %v2092_v43, %v2091_v2  ;;  %v2097_v18 = vld [vmem:[#allocation12_spill] sm:$0xff] }
 0x225   : > { %v1334_v44 = vpack.c.bf16 %v1099_v46, %v1098_v8  ;;  %v1335_v53 = vpack.c.bf16 %v1100_v12, %v1100_v12  ;;  %v1337_v61 = vpack.c.bf16 %v1103_v23, %v1103_v23  ;;  %v1060_v22 = vadd.f32 %v1769_v28, %v988_v48  ;;  %v914_v62 = vpop.permute.xlu1 %913  ;;  %v918_v13 = vpop.permute.xlu0 %917  ;;  %v2099_v12 = vld [vmem:[#allocation4_spill] sm:$0xff]  ;;  %v2100_v48 = vld [vmem:[#allocation9_spill] sm:$0xff] }
 0x226   : > { %v1061_v31 = vadd.f32 %v1769_v28, %v989_v38  ;;  %v1064_v15 = vadd.f32 %v1767_v25, %v992_v40  ;;  %v965_v20 = vsel %vm951_vm4, %v914_v62, %v930_v45  ;;  %v973_v49 = vsel %vm951_vm4, %v946_v4, %v914_v62 }
 0x227   : > { %1199 = vst [vmem:[%s1909_s21 + $0x24] sm:$0xff] %v1334_v44  ;;  %1200 = vst [vmem:[%s1909_s21 + $0x2c] sm:$0xf] %v1335_v53  ;;  %v1101_v60 = vmul.f32 %v1854_v16, %v1060_v22  ;;  %v991_v21 = vadd.f32 %v965_v20, %v724_v51  ;;  %v993_v41 = vadd.f32 %v973_v49, %v726_v37  ;;  %v2101_v44 = vld [vmem:[#allocation14_spill] sm:$0xff]  ;;  %v2102_v53 = vld [vmem:[#allocation3_spill] sm:$0xff] }
 0x228   : > { %1202 = vst [vmem:[%s1909_s21 + $0x38] sm:$0xf] %v1337_v61  ;;  %v1102_v26 = vmul.f32 %v1856_v54, %v1061_v31  ;;  %v1105_v28 = vmul.f32 %v1856_v54, %v1064_v15  ;;  %v530_v4 = vsel %vm514_vm3, %v2090_v52, %v2089_v30  ;;  %v529_v14 = vsel %vm514_vm3, %v2098_v58, %v2097_v18 }
 0x229   : > { %v1063_v35 = vadd.f32 %v1767_v25, %v991_v21  ;;  %v1065_v24 = vadd.f32 %v1767_v25, %v993_v41  ;;  %v916_v63 = vpop.permute.xlu1 %915  ;;  %v934_v46 = vpop.permute.xlu0 %933  ;;  %v731_v5 = vadd.f32 %v2093_v7, %v530_v4  ;;  %v2094_v25 = vld [vmem:[#allocation16_spill] sm:$0xff]  ;;  %v728_v23 = vadd.f32 %v2099_v12, %v529_v14 }
 0x22a   : > { %v1336_v17 = vpack.c.bf16 %v1102_v26, %v1101_v60  ;;  %v967_v3 = vsel %vm951_vm4, %v918_v13, %v934_v46  ;;  %v732_v56 = vadd.f32 %v2095_v9, %v2094_v25  ;;  %v729_v61 = vadd.f32 %v2102_v53, %v2101_v44 }
 0x22b   : > { %v1104_v39 = vmul.f32 %v1854_v16, %v1063_v35  ;;  %v1106_v19 = vmul.f32 %v1858_v57, %v1065_v24  ;;  %v997_v42 = vadd.f32 %v967_v3, %v730_v34 }
 0x22c   : > { %1201 = vst [vmem:[%s1909_s21 + $0x30] sm:$0xff] %v1336_v17 }
 0x22d   : > { %v1338_v10 = vpack.c.bf16 %v1105_v28, %v1104_v39  ;;  %v1339_v59 = vpack.c.bf16 %v1106_v19, %v1106_v19  ;;  %v1069_v6 = vadd.f32 %v2096_v1, %v997_v42  ;;  %v932_v55 = vpop.permute.xlu1 %931  ;;  %v950_v0 = vpop.permute.xlu0 %949 }
 0x22e   : > { %v966_v29 = vsel %vm951_vm4, %v916_v63, %v932_v55  ;;  %v959_v45 = vsel %vm951_vm4, %v934_v46, %v950_v0  ;;  %v975_v47 = vsel %vm951_vm4, %v950_v0, %v918_v13 }
 0x22f   : > { %1203 = vst [vmem:[%s1909_s21 + $0x3c] sm:$0xff] %v1338_v10  ;;  %1204 = vst [vmem:[%s1909_s21 + $0x44] sm:$0xf] %v1339_v59  ;;  %v1110_v32 = vmul.f32 %v1854_v16, %v1069_v6  ;;  %v994_v11 = vadd.f32 %v966_v29, %v727_v50  ;;  %v998_v36 = vadd.f32 %v959_v45, %v731_v5 }
 0x230   : > { %v999_v8 = vadd.f32 %v975_v47, %v732_v56 }
 0x231   : > { %v1066_v51 = vadd.f32 %v2100_v48, %v994_v11  ;;  %v1070_v37 = vadd.f32 %v2096_v1, %v998_v36  ;;  %v948_v40 = vpop.permute.xlu1 %947 }
 0x232   : > { %v1071_v38 = vadd.f32 %v2096_v1, %v999_v8  ;;  %v958_v22 = vsel %vm951_vm4, %v932_v55, %v948_v40  ;;  %v974_v62 = vsel %vm951_vm4, %v948_v40, %v916_v63 }
 0x233   : > { %v1107_v13 = vmul.f32 %v1854_v16, %v1066_v51  ;;  %v1111_v31 = vmul.f32 %v1856_v54, %v1070_v37  ;;  %v995_v20 = vadd.f32 %v958_v22, %v728_v23  ;;  %v996_v49 = vadd.f32 %v974_v62, %v729_v61 }
 0x234   : > { %v1112_v15 = vmul.f32 %v1858_v57, %v1071_v38 }
 0x235   : > { %v1342_v60 = vpack.c.bf16 %v1111_v31, %v1110_v32  ;;  %v1067_v41 = vadd.f32 %v2100_v48, %v995_v20  ;;  %v1068_v26 = vadd.f32 %v2100_v48, %v996_v49 }
 0x236   : > { %v1343_v21 = vpack.c.bf16 %v1112_v15, %v1112_v15 }
 0x237   : > { %1207 = vst [vmem:[%s1909_s21 + $0x54] sm:$0xff] %v1342_v60  ;;  %v1108_v27 = vmul.f32 %v1856_v54, %v1067_v41  ;;  %v1109_v28 = vmul.f32 %v1858_v57, %v1068_v26 }
 0x238   : > { %1208 = vst [vmem:[%s1909_s21 + $0x5c] sm:$0xf] %v1343_v21 }
 0x239   : > { %v1340_v16 = vpack.c.bf16 %v1108_v27, %v1107_v13  ;;  %v1341_v33 = vpack.c.bf16 %v1109_v28, %v1109_v28 }
 0x23b   : > { %1205 = vst [vmem:[%s1909_s21 + $0x48] sm:$0xff] %v1340_v16  ;;  %1206 = vst [vmem:[%s1909_s21 + $0x50] sm:$0xf] %v1341_v33 }
 0x23c PF: > { %s14_s15 = sadd.s32 1, %s1475_s15  }
 0x23d   : > { %p11_p4 = scmp.ge.s32.totalorder %s14_s15, 4  }
 0x23f   :  { %13 = sbr.rel (!%p11_p4) target bundleno = 1 (0x1), region = 66 }

// kernel: rcan_forward.5
= control target key start
LH: loop header
LB: loop body
LE: loop exit
PB: predicated region body
PF: predicated region fallthrough
CT: control target
= control target key end

     0   :  { %s1933_s18 = smov 0   ;;  %s1935_s19 = smov 0   ;;  %s2386_s0 = inlined_call_operand.vmem [shape: bf16[2,16,384], index: 0, kind: input, shape index: {}]   ;;  %s2387_s1 = inlined_call_operand.vmem [shape: f32[1,384], index: 1, kind: input, shape index: {}]   ;;  %s2388_s2 = inlined_call_operand.vmem [shape: bf16[7,48,48], index: 2, kind: input, shape index: {}]   ;;  %s2389_s3 = inlined_call_operand.vmem [shape: bf16[7,48,48], index: 3, kind: input, shape index: {}]   ;;  %s2390_s4 = inlined_call_operand.vmem [shape: f32[7,16,128], index: 4, kind: input, shape index: {}]   ;;  %s2391_s5 = inlined_call_operand.vmem [shape: bf16[2,16,384], index: 5, kind: output, shape index: {}]  }
   0x1   :  { %s1937_s20 = smov 0   ;;  %s1939_s21 = smov 0  }
   0x2   :  { %s1941_s22 = smov 0  }
   0x3 LB: > { %s24_s23 = sadd.s32 1, %s1874_s20  ;;  %s27_s24 = sadd.s32 1, %s1878_s21  ;;  %s1882_s22 = sphi %s1941_s22, %s15_s22   ;;  %s1878_s21 = sphi %s1939_s21, %s2397_s21   ;;  %s1874_s20 = sphi %s1937_s20, %s2396_s20   ;;  %s1870_s19 = sphi %s1935_s19, %s2395_s19   ;;  %s1866_s18 = sphi %s1933_s18, %s2394_s18  }
   0x4   : > { %p25_p0 = scmp.ge.s32.totalorder %s24_s23, 7  ;;  %p1538_p1 = scmp.ge.s32.totalorder %s1882_s22, 1 }
   0x5   : > { %p229_p2 = scmp.lt.s32.totalorder %s1882_s22, 15 }
   0x6   : > { %s2399_s23 = smov (%p25_p0, %s24_s23), 0  ;;  %s2401_s24 = smov (!%p25_p0, %s27_s24), %s1878_s21 }
   0x7   : > { %p230_p3 = pnand %p1538_p1, %p229_p2  ;;  %p29_p4 = scmp.ge.s32.totalorder %s2401_s24, 2 }
   0x8   : > { %p272_p5 = scmp.lt.s32.totalorder (!%p230_p3), %s1870_s19, 1  ;;  %p277_p6 = scmp.lt.s32.totalorder (!%p230_p3), %s1866_s18, 6 }
   0x9   : > { %s2403_s24 = smov (%p29_p4, %s2401_s24), 0  ;;  %233 = sbr.rel (%p230_p3) target bundleno = 1827 (0x723), region = 40 }
   0xa   : > { %p1545_p7 = scmp.ne.s32.totalorder (!%p230_p3), %s1866_s18, 0 }
   0xe   : > { %v1969_v0 = vld [vmem:[%s2387_s1] sm:$0x7]  ;;  %s2405_s19 = smov (!%p272_p5, %s1870_s19), 1 }
   0xf   : > { %s278_s27 = scalar_select %p277_p6, %s1866_s18, 6 }
  0x10   : > { %s1672_s28 = smul.u32 24, %s2405_s19 }
  0x11   : > { %s1673_s29 = smul.u32 24, %s278_s27  ;;  %s1583_s30 = sshll.u32 %s278_s27, 4 }
  0x12   : > { %s1975_s8 = scalar_lea.vmem %s2386_s0, %s1672_s28  ;;  %s1980_s11 = scalar_lea.vmem %s2390_s4, %s1583_s30 }
  0x13   : > { %s1985_s14 = scalar_lea.vmem %s2388_s2, %s1673_s29  ;;  %s1990_s17 = scalar_lea.vmem %s2389_s3, %s1673_s29 }
  0x14   : > { %s1995_s26 = scalar_lea.vmem %s2391_s5, %s1672_s28  ;;  %302 = sbr.rel (%p1545_p7) target bundleno = 34 (0x22), region = 44 }
  0x19   : > { %v303_v1 = vld [vmem:[%s1975_s8] sm:$0xff]  ;;  %v304_v2 = vld [vmem:[%s1975_s8 + $0x8] ss:$12 sps:$4 sm:$0xff]   ;;  %v305_v3 = vld [vmem:[%s1975_s8 + $0xc] sm:$0xff] }
  0x1a   : > { %v307_v4 = vunpack.c.l.bf16 %v303_v1  ;;  %v308_v5 = vunpack.c.h.bf16 %v303_v1  ;;  %v309_v6 = vunpack.c.l.bf16 %v304_v2  ;;  %v310_v7 = vunpack.c.l.bf16 %v305_v3 }
  0x1b   : > { %v311_v8 = vunpack.c.h.bf16 %v305_v3  ;;  %v312_v9 = vunpack.c.h.bf16 %v304_v2 }
  0x1c   : > { %313 = vst [vmem:[#allocation2 + $0x28] sm:$0xff] %v307_v4  ;;  %319 = vst [vmem:[#allocation3] sm:$0xff] %v307_v4 }
  0x1d   : > { %314 = vst [vmem:[#allocation2 + $0x10] sm:$0xff] %v308_v5  ;;  %320 = vst [vmem:[#allocation3 + $0x8] sm:$0xff] %v308_v5 }
  0x1e   : > { %315 = vst [vmem:[#allocation2 + $0x8] sm:$0xff] %v309_v6  ;;  %321 = vst [vmem:[#allocation3 + $0x20] sm:$0xff] %v309_v6 }
  0x1f   : > { %316 = vst [vmem:[#allocation2] sm:$0xff] %v310_v7  ;;  %322 = vst [vmem:[#allocation3 + $0x18] sm:$0xff] %v310_v7 }
  0x20   : > { %317 = vst [vmem:[#allocation2 + $0x18] sm:$0xff] %v311_v8  ;;  %323 = vst [vmem:[#allocation3 + $0x28] sm:$0xff] %v311_v8 }
  0x21   : > { %318 = vst [vmem:[#allocation2 + $0x20] sm:$0xff] %v312_v9  ;;  %324 = vst [vmem:[#allocation3 + $0x10] sm:$0xff] %v312_v9 }
  0x22 PF: > { %v1884_v17 = vmov 0.0   ;;  %s326_s27 = ssub.s32 0, %s1866_s18  ;;  %s1885_s29 = smov 127   ;;  %vm1887_vm0 = vmmov 0   ;;  %v1888_v23 = vmov 0   ;;  %v2054_v24 = vld [vmem:[%s1980_s11] sm:$0xff]  ;;  %v372_v26 = vlaneseq }
  0x23   : > { %v2005_v12 = vld [vmem:[#allocation2 + $0x28] sm:$0xff]  ;;  %1612 = vmatprep.subr.bf16.mxu1 %v1884_v17  ;;  %s1546_s28 = smin.u32 %s1866_s18, %s326_s27  ;;  %s1886_s30 = smov 1   ;;  %1618 = vmatprep.mubr.msk.bf16.mxu1 %vm1887_vm0, %v1884_v17  ;;  %v1766_v1 = vld [vmem:[%s1985_s14] sm:$0xff]   ;;  %vm414_vm3 = vcmask 392192   ;;  %v1768_v3 = vld [vmem:[%s1985_s14 + $0x10] sm:$0xff]  }
  0x24   : > { %v2001_v10 = vld [vmem:[#allocation2 + $0x10] sm:$0xff]  ;;  %1769 = sdivrem.u32 %s1546_s28, 3  ;;  %p325_p8 = scmp.lt.s32.totalorder %s1866_s18, 0  ;;  %450 = vmatprep.mubr.bf16.mxu0 %v1888_v23  ;;  %1764 = vset.pattern.permute.xlu0 %v1888_v23  ;;  %v2057_v25 = vld [vmem:[%s1980_s11 + $0x8] sm:$0xff]  ;;  %v2062_v27 = vand.u32 127, %v372_v26 }
  0x25   : > { %v2011_v15 = vld [vmem:[#allocation2 + $0x8] sm:$0xff]  ;;  %1765 = vset.pattern.permute.xlu1 %v1888_v23  ;;  %p340_p10 = scmp.ne.s32.totalorder %s1866_s18, 6  ;;  %s1889_s11 = smov 18  }
  0x26   : > { %v2009_v14 = vld [vmem:[#allocation2] sm:$0xff]  ;;  %vm399_vm1 = vcmp.lt.s32.totalorder %v2062_v27, 127  ;;  %vm374_vm2 = vcmp.lt.s32.totalorder %v2062_v27, 1  ;;  %v1767_v2 = vld [vmem:[%s1985_s14 + $0x8] sm:$0xff]   ;;  %s1890_s13 = smov 110   ;;  %vm514_vm4 = vcmp.lt.s32.totalorder %v2062_v27, 18 }
  0x27   : > { %v2003_v11 = vld [vmem:[#allocation2 + $0x18] sm:$0xff]  ;;  %v1744_v19 = vpack.i.bf16 %v2009_v14, %v2005_v12  ;;  %v2032_v22 = vpack.c.bf16 %v2009_v14, %v2005_v12  ;;  %vm723_vm5 = vcmp.lt.s32.totalorder %v2062_v27, 110 }
  0x28   : > { %v1734_v13 = vpack.i.bf16 %v2003_v11, %v2001_v10  ;;  %v2013_v16 = vld [vmem:[#allocation2 + $0x20] sm:$0xff]  ;;  %v2019_v18 = vpack.c.bf16 %v2003_v11, %v2001_v10 }
  0x29   : > { %v1739_v20 = vpack.i.bf16 %v2013_v16, %v2011_v15  ;;  %v2028_v21 = vpack.c.bf16 %v2013_v16, %v2011_v15  ;;  %1745 = vrot.lane.b32.xlu1 %v1744_v19, %s1885_s29 }
  0x2a   : > { %1735 = vrot.lane.b32.xlu0 %v1734_v13, %s1885_s29 }
  0x2d   : > { %1750 = vrot.lane.b32.xlu1 %v1744_v19, %s1886_s30  ;;  %s1770_s6 = spop.drf %1769 }
  0x2e   : > { %1740 = vrot.lane.b32.xlu0 %v1739_v20, %s1885_s29  ;;  %s330_s7 = ssub.s32 0, %s1770_s6 }
  0x2f   : > { %s2407_s7 = smov (!%p325_p8, %s330_s7), %s1770_s6 }
  0x30   : > { %p1548_p9 = scmp.lt.s32.totalorder %s2407_s7, 0  ;;  %s336_s9 = sadd.s32 3, %s2407_s7 }
  0x31   : > { %1760 = vrot.lane.b32.xlu1 %v1739_v20, %s1886_s30 }
  0x32   : > { %1755 = vrot.lane.b32.xlu0 %v1734_v13, %s1886_s30  ;;  %s2409_s9 = smov (!%p1548_p9, %s336_s9), %s2407_s7 }
  0x33   : > { %p339_p11 = scmp.eq.s32.totalorder %s2409_s9, 2  ;;  %p343_p12 = scmp.ne.s32.totalorder %s2409_s9, 2 }
  0x35   : > { %p2043_p13 = pnand %p340_p10, %p339_p11  ;;  %p2049_p0 = pnand %p343_p12, %p340_p10  ;;  %743 = vperm.xlu1 %1765, %v2057_v25  }
  0x36   : > { %738 = vperm.xlu0 %1764, %v2054_v24   ;;  %s1892_s14 = smov (!%p2049_p0), 127   ;;  %s1893_s15 = smov (!%p2049_p0), 1  }
  0x37   : > { %s1897_s16 = smov (!%p2049_p0), 18   ;;  %s1899_s19 = smov (!%p2049_p0), 120  }
  0x38   : > { %s1900_s25 = smov (!%p2049_p0), 4   ;;  %s1901_s27 = smov (!%p2049_p0), 121  }
  0x9b   : > { %v1746_v29 = vpop.permute.xlu1 %1745 }
  0x9c   : > { %v1736_v28 = vpop.permute.xlu0 %1735  ;;  %v1748_v32 = vunpack.i.h.bf16 %v1746_v29  ;;  %v1747_v33 = vunpack.i.l.bf16 %v1746_v29 }
  0x9d   : > { %v1738_v30 = vunpack.i.h.bf16 %v1736_v28  ;;  %v1737_v31 = vunpack.i.l.bf16 %v1736_v28 }
  0x9f   : > { %v1751_v37 = vpop.permute.xlu1 %1750  ;;  %v402_v40 = vsel %vm399_vm1, %v1747_v33, %v1737_v31  ;;  %v403_v41 = vsel %vm399_vm1, %v1748_v32, %v1738_v30 }
  0xa0   : > { %v1741_v34 = vpop.permute.xlu0 %1740  ;;  %v1753_v38 = vunpack.i.h.bf16 %v1751_v37  ;;  %v1752_v39 = vunpack.i.l.bf16 %v1751_v37  ;;  %v406_v52 = vpack.c.bf16 %v403_v41, %v402_v40 }
  0xa1   : > { %v1743_v35 = vunpack.i.h.bf16 %v1741_v34  ;;  %v1742_v36 = vunpack.i.l.bf16 %v1741_v34 }
  0xa3   : > { %v400_v42 = vsel %vm399_vm1, %v1737_v31, %v1742_v36  ;;  %v401_v43 = vsel %vm399_vm1, %v1738_v30, %v1743_v35  ;;  %v404_v44 = vsel %vm399_vm1, %v1742_v36, %v1747_v33  ;;  %v405_v45 = vsel %vm399_vm1, %v1743_v35, %v1748_v32  ;;  %v1761_v51 = vpop.permute.xlu1 %1760 }
  0xa4   : > { %v1756_v46 = vpop.permute.xlu0 %1755  ;;  %v407_v47 = vpack.c.bf16 %v401_v43, %v400_v42  ;;  %v408_v48 = vpack.c.bf16 %v405_v45, %v404_v44  ;;  %v1763_v53 = vunpack.i.h.bf16 %v1761_v51  ;;  %v1762_v54 = vunpack.i.l.bf16 %v1761_v51 }
  0xa5   : > { %v1758_v49 = vunpack.i.h.bf16 %v1756_v46  ;;  %v1757_v50 = vunpack.i.l.bf16 %v1756_v46 }
  0xa6   : > { %428 = vmatprep.subr.bf16.mxu0 %v407_v47  ;;  %1613 = vmatpush3.bf16.msra.mxu1 %v408_v48  ;;  %v379_v61 = vsel %vm374_vm2, %v1762_v54, %v1752_v39  ;;  %v380_v62 = vsel %vm374_vm2, %v1763_v53, %v1753_v38 }
  0xa7   : > { %429 = vmatpush1.bf16.msra.mxu0 %v406_v52  ;;  %1614 = vmatprep.subr.bf16.mxu1 %v1884_v17  ;;  %v377_v55 = vsel %vm374_vm2, %v1752_v39, %v1757_v50  ;;  %v378_v56 = vsel %vm374_vm2, %v1753_v38, %v1758_v49  ;;  %v375_v58 = vsel %vm374_vm2, %v1757_v50, %v1762_v54 }
  0xa8   : > { %430 = vmatprep.subr.bf16.mxu0 %v2019_v18  ;;  %v382_v57 = vpack.c.bf16 %v378_v56, %v377_v55  ;;  %v376_v59 = vsel %vm374_vm2, %v1758_v49, %v1763_v53  ;;  %v381_v63 = vpack.c.bf16 %v380_v62, %v379_v61 }
  0xa9   : > { %v383_v60 = vpack.c.bf16 %v376_v59, %v375_v58 }
  0xaa   : > { %1615 = vmatpush3.bf16.msra.mxu1 %v2028_v21 }
  0xab   : > { %431 = vmatpush1.bf16.msra.mxu0 %v2032_v22  ;;  %1616 = vmatprep.subr.bf16.mxu1 %v1884_v17 }
  0xac   : > { %432 = vmatprep.subr.bf16.mxu0 %v382_v57 }
  0xae   : > { %1617 = vmatpush3.bf16.msra.mxu1 %v383_v60 }
  0xaf   : > { %433 = vmatpush1.bf16.msra.mxu0 %v381_v63  ;;  %1622 = vmatprep.subr.bf16.mxu1 %v1884_v17 }
  0xb0   : > { %539 = vmatprep.subr.bf16.mxu0 %v407_v47  ;;  %v744_v38 = vpop.permute.xlu1 %743 }
  0xb1   : > { %1619 = vmatmul.mubr.msk.bf16.vlgmr.msra.gmra.mxu1 %vm414_vm3, %v1766_v1  ;;  %v739_v39 = vpop.permute.xlu0 %738 }
  0xb2   : > { %1550 = vmatmul.mubr.msk.bf16.vlgmr.msra.gmra.mxu0 %vm414_vm3, %v1766_v1  ;;  %1623 = vmatpush3.bf16.msra.mxu1 %v408_v48 }
  0xb3   : > { %540 = vmatpush1.bf16.msra.mxu0 %v406_v52  ;;  %1624 = vmatprep.subr.bf16.mxu1 %v1884_v17 }
  0xb4   : > { %541 = vmatprep.subr.bf16.mxu0 %v2019_v18  ;;  %561 = vmatprep.mubr.bf16.mxu0 %v1888_v23 }
  0xb5   : > { %1628 = vmatprep.mubr.msk.bf16.mxu1 %vm1887_vm0, %v1884_v17 }
  0xb6   : > { %1625 = vmatpush3.bf16.msra.mxu1 %v2028_v21 }
  0xb7   : > { %542 = vmatpush1.bf16.msra.mxu0 %v2032_v22  ;;  %1626 = vmatprep.subr.bf16.mxu1 %v1884_v17 }
  0xb8   : > { %543 = vmatprep.subr.bf16.mxu0 %v382_v57 }
  0xba   : > { %1627 = vmatpush3.bf16.msra.mxu1 %v383_v60 }
  0xbb   : > { %544 = vmatpush1.bf16.msra.mxu0 %v381_v63  ;;  %1632 = vmatprep.subr.bf16.mxu1 %v1884_v17 }
  0xbc   : > { %637 = vmatprep.subr.bf16.mxu0 %v407_v47 }
  0xbd   : > { %1629 = vmatmul.mubr.msk.bf16.vlgmr.msra.gmra.mxu1 %vm414_vm3, %v1767_v2 }
  0xbe   : > { %1553 = vmatmul.mubr.msk.bf16.vlgmr.msra.gmra.mxu0 %vm414_vm3, %v1767_v2  ;;  %1633 = vmatpush3.bf16.msra.mxu1 %v408_v48 }
  0xbf   : > { %638 = vmatpush1.bf16.msra.mxu0 %v406_v52  ;;  %1634 = vmatprep.subr.bf16.mxu1 %v1884_v17 }
  0xc0   : > { %639 = vmatprep.subr.bf16.mxu0 %v2019_v18  ;;  %659 = vmatprep.mubr.bf16.mxu0 %v1888_v23 }
  0xc1   : > { %1638 = vmatprep.mubr.msk.bf16.mxu1 %vm1887_vm0, %v1884_v17 }
  0xc2   : > { %1635 = vmatpush3.bf16.msra.mxu1 %v2028_v21 }
  0xc3   : > { %640 = vmatpush1.bf16.msra.mxu0 %v2032_v22  ;;  %1636 = vmatprep.subr.bf16.mxu1 %v1884_v17 }
  0xc4   : > { %641 = vmatprep.subr.bf16.mxu0 %v382_v57 }
  0xc6   : > { %1637 = vmatpush3.bf16.msra.mxu1 %v383_v60 }
  0xc7   : > { %642 = vmatpush1.bf16.msra.mxu0 %v381_v63 }
  0xc9   : > { %1639 = vmatmul.mubr.msk.bf16.vlgmr.msra.gmra.mxu1 %vm414_vm3, %v1768_v3 }
  0xca   : > { %1556 = vmatmul.mubr.msk.bf16.vlgmr.msra.gmra.mxu0 %vm414_vm3, %v1768_v3 }
 0x171   : > { %v495_v4 = vpop.f32.mrf.mxu1 }
 0x172   : > { %510 = vrot.lane.b32.xlu0 %v495_v4, %s1889_s11  ;;  %v452_v5 = vpop.f32.mrf.mxu0 }
 0x173   : > { %v1620_v6 = vpop.f32.mrf.mxu1 }
 0x174   : > { %v454_v7 = vpop.f32.mrf.mxu0 }
 0x175   : > { %v498_v8 = vpop.f32.mrf.mxu1 }
 0x176   : > { %512 = vrot.lane.b32.xlu1 %v498_v8, %s1889_s11  ;;  %502 = vrot.lane.b32.xlu0 %v452_v5, %s1889_s11  ;;  %v456_v13 = vpop.f32.mrf.mxu0 }
 0x177   : > { %v1621_v9 = vpop.f32.mrf.mxu1 }
 0x178   : > { %v458_v17 = vpop.f32.mrf.mxu0 }
 0x17a   : > { %506 = vrot.lane.b32.xlu0 %v454_v7, %s1889_s11  ;;  %504 = vrot.lane.b32.xlu1 %v456_v13, %s1889_s11 }
 0x17d   : > { %v606_v18 = vpop.f32.mrf.mxu1 }
 0x17e   : > { %508 = vrot.lane.b32.xlu1 %v458_v17, %s1889_s11  ;;  %v563_v19 = vpop.f32.mrf.mxu0 }
 0x17f   : > { %v1630_v20 = vpop.f32.mrf.mxu1 }
 0x180   : > { %v565_v21 = vpop.f32.mrf.mxu0 }
 0x181   : > { %v609_v22 = vpop.f32.mrf.mxu1 }
 0x182   : > { %v567_v28 = vpop.f32.mrf.mxu0 }
 0x183   : > { %v1631_v23 = vpop.f32.mrf.mxu1 }
 0x184   : > { %v569_v29 = vpop.f32.mrf.mxu0 }
 0x189   : > { %v704_v30 = vpop.f32.mrf.mxu1 }
 0x18a   : > { %v661_v31 = vpop.f32.mrf.mxu0 }
 0x18b   : > { %711 = vrot.lane.b32.xlu1 %v661_v31, %s1890_s13  ;;  %v1640_v32 = vpop.f32.mrf.mxu1 }
 0x18c   : > { %v663_v33 = vpop.f32.mrf.mxu0 }
 0x18d   : > { %v707_v34 = vpop.f32.mrf.mxu1 }
 0x18e   : > { %v665_v35 = vpop.f32.mrf.mxu0 }
 0x18f   : > { %715 = vrot.lane.b32.xlu1 %v663_v33, %s1890_s13  ;;  %713 = vrot.lane.b32.xlu0 %v665_v35, %s1890_s13  ;;  %v1641_v36 = vpop.f32.mrf.mxu1 }
 0x190   : > { %v667_v37 = vpop.f32.mrf.mxu0 }
 0x193   : > { %719 = vrot.lane.b32.xlu1 %v704_v30, %s1890_s13  ;;  %717 = vrot.lane.b32.xlu0 %v667_v37, %s1890_s13 }
 0x197   : > { %721 = vrot.lane.b32.xlu0 %v707_v34, %s1890_s13 }
 0x1e4   : > { %v511_v41 = vpop.permute.xlu0 %510 }
 0x1e8   : > { %v513_v40 = vpop.permute.xlu1 %512  ;;  %v503_v43 = vpop.permute.xlu0 %502 }
 0x1e9   : > { %v519_v47 = vsel %vm514_vm4, %v511_v41, %v503_v43 }
 0x1ea   : > { %v613_v48 = vadd.f32 %v563_v19, %v519_v47 }
 0x1ec   : > { %v505_v42 = vpop.permute.xlu1 %504  ;;  %v507_v45 = vpop.permute.xlu0 %506 }
 0x1ed   : > { %v517_v49 = vsel %vm514_vm4, %v503_v43, %v507_v45  ;;  %v515_v52 = vsel %vm514_vm4, %v507_v45, %v511_v41  ;;  %v520_v53 = vsel %vm514_vm4, %v513_v40, %v505_v42 }
 0x1ee   : > { %v614_v56 = vadd.f32 %v565_v21, %v517_v49  ;;  %v615_v57 = vadd.f32 %v606_v18, %v515_v52  ;;  %v616_v58 = vadd.f32 %v567_v28, %v520_v53 }
 0x1f0   : > { %v509_v44 = vpop.permute.xlu1 %508 }
 0x1f1   : > { %v518_v59 = vsel %vm514_vm4, %v505_v42, %v509_v44  ;;  %v516_v63 = vsel %vm514_vm4, %v509_v44, %v513_v40 }
 0x1f2   : > { %v617_v7 = vadd.f32 %v569_v29, %v518_v59  ;;  %v618_v8 = vadd.f32 %v609_v22, %v516_v63 }
 0x1fd   : > { %v712_v46 = vpop.permute.xlu1 %711 }
 0x201   : > { %v716_v50 = vpop.permute.xlu1 %715  ;;  %v714_v51 = vpop.permute.xlu0 %713 }
 0x202   : > { %v726_v54 = vsel %vm723_vm5, %v712_v46, %v716_v50 }
 0x203   : > { %v730_v55 = vadd.f32 %v726_v54, %v613_v48 }
 0x205   : > { %v2136_v60 = vadd.f32 %v739_v39, %v730_v55  ;;  %v720_v61 = vpop.permute.xlu1 %719  ;;  %v718_v62 = vpop.permute.xlu0 %717 }
 0x206   : > { %v724_v1 = vsel %vm723_vm5, %v716_v50, %v720_v61  ;;  %v728_v2 = vsel %vm723_vm5, %v720_v61, %v712_v46  ;;  %v727_v3 = vsel %vm723_vm5, %v714_v51, %v718_v62 }
 0x207   : > { %v731_v4 = vadd.f32 %v724_v1, %v614_v56  ;;  %v732_v5 = vadd.f32 %v728_v2, %v615_v57  ;;  %v733_v6 = vadd.f32 %v727_v3, %v616_v58 }
 0x209   : > { %v2146_v9 = vadd.f32 %v739_v39, %v731_v4  ;;  %v2148_v13 = vadd.f32 %v739_v39, %v732_v5  ;;  %v2150_v17 = vadd.f32 %v744_v38, %v733_v6  ;;  %v722_v18 = vpop.permute.xlu0 %721  ;;  %753 = sbr.rel (%p2049_p0) target bundleno = 1789 (0x6fd), region = 48 }
 0x20a   : > { %v725_v19 = vsel %vm723_vm5, %v718_v62, %v722_v18  ;;  %v729_v20 = vsel %vm723_vm5, %v722_v18, %v714_v51 }
 0x20b   : > { %v734_v21 = vadd.f32 %v725_v19, %v617_v7  ;;  %v735_v23 = vadd.f32 %v729_v20, %v618_v8 }
 0x20d   : > { %v2156_v28 = vadd.f32 %v744_v38, %v734_v21  ;;  %v2158_v30 = vadd.f32 %v744_v38, %v735_v23 }
 0x20e   : > { %v1559_v22 = vmul.f32 -1.442695, %v2146_v9  ;;  %v1558_v31 = vmul.f32 -1.442695, %v2136_v60  ;;  %v1561_v32 = vmul.f32 -1.442695, %v2150_v17 }
 0x20f   : > { %v1562_v29 = vmul.f32 -1.442695, %v2156_v28  ;;  %v1560_v33 = vmul.f32 -1.442695, %v2148_v13  ;;  %v1563_v34 = vmul.f32 -1.442695, %v2158_v30 }
 0x210   : > { %1808 = vpow2.f32 %v1559_v22  ;;  %v2169_v47 = vshrl.u32 %v372_v26, 7  ;;  %v1891_v63 = vmov 0.0   ;;  %vm1894_vm6 = vmmov 0  }
 0x211   : > { %1810 = vpow2.f32 %v1562_v29  ;;  %1642 = vmatprep.subr.bf16.mxu1 %v1891_v63  ;;  %1648 = vmatprep.mubr.msk.bf16.mxu1 %vm1894_vm6, %v1891_v63  ;;  %vm1225_vm7 = vcmask 56344   ;;  %vm1264_vm8 = vcmask 31744  }
 0x212   : > { %1812 = vpow2.f32 %v1558_v31  ;;  %v803_v48 = vsub.s32 1, %v2169_v47  ;;  %v799_v49 = vsub.s32 0, %v2169_v47  ;;  %v807_v51 = vsub.s32 2, %v2169_v47 }
 0x213   : > { %1814 = vpow2.f32 %v1561_v32  ;;  %v1895_v32 = vmov 0  }
 0x214   : > { %1816 = vpow2.f32 %v1560_v33  ;;  %v2174_v50 = vrot.slane %v1969_v0, %v803_v48  ;;  %v2181_v55 = vrot.slane %v1969_v0, %v799_v49  ;;  %v2187_v62 = vrot.slane %v1969_v0, %v807_v51  ;;  %909 = vmatprep.mubr.bf16.mxu0 %v1895_v32 }
 0x215   : > { %1818 = vpow2.f32 %v1563_v34  ;;  %v1896_v33 = vmov 1  }
 0x216   : > { %1801 = vset.pattern.permute.xlu0 %v1896_v33  ;;  %1802 = vset.pattern.permute.xlu1 %v1896_v33  ;;  %v1805_v33 = vld [vmem:[%s1990_s17] sm:$0xff]  }
 0x21d   : > { %v1809_v35 = vpop.eup %1808 }
 0x21e   : > { %v1811_v36 = vpop.eup %1810  ;;  %v773_v37 = vadd.f32 1.0, %v1809_v35 }
 0x21f   : > { %v1813_v38 = vpop.eup %1812  ;;  %v776_v39 = vadd.f32 1.0, %v1811_v36 }
 0x220   : > { %v1815_v40 = vpop.eup %1814  ;;  %1820 = vrcp.f32 %v773_v37  ;;  %v772_v41 = vadd.f32 1.0, %v1813_v38 }
 0x221   : > { %v1817_v42 = vpop.eup %1816  ;;  %1822 = vrcp.f32 %v776_v39  ;;  %v775_v43 = vadd.f32 1.0, %v1815_v40 }
 0x222   : > { %v1819_v44 = vpop.eup %1818  ;;  %1824 = vrcp.f32 %v772_v41  ;;  %v774_v45 = vadd.f32 1.0, %v1817_v42 }
 0x223   : > { %1826 = vrcp.f32 %v775_v43  ;;  %v777_v46 = vadd.f32 1.0, %v1819_v44 }
 0x224   : > { %1828 = vrcp.f32 %v774_v45 }
 0x225   : > { %1830 = vrcp.f32 %v777_v46 }
 0x22d   : > { %v1821_v52 = vpop.eup %1820 }
 0x22e   : > { %v1823_v53 = vpop.eup %1822  ;;  %v791_v54 = vmul.f32 %v1821_v52, %v2146_v9 }
 0x22f   : > { %v1825_v56 = vpop.eup %1824  ;;  %v794_v57 = vmul.f32 %v1823_v53, %v2156_v28 }
 0x230   : > { %v1827_v58 = vpop.eup %1826  ;;  %v813_v59 = vmul.f32 %v2174_v50, %v791_v54  ;;  %v790_v61 = vmul.f32 %v1825_v56, %v2136_v60 }
 0x231   : > { %v1829_v1 = vpop.eup %1828  ;;  %v816_v2 = vmul.f32 %v2174_v50, %v794_v57  ;;  %v793_v3 = vmul.f32 %v1827_v58, %v2150_v17 }
 0x232   : > { %v1831_v4 = vpop.eup %1830  ;;  %v812_v5 = vmul.f32 %v2181_v55, %v790_v61  ;;  %v792_v6 = vmul.f32 %v1829_v1, %v2148_v13 }
 0x233   : > { %v1771_v7 = vpack.i.bf16 %v816_v2, %v813_v59  ;;  %v815_v8 = vmul.f32 %v2181_v55, %v793_v3  ;;  %v795_v18 = vmul.f32 %v1831_v4, %v2158_v30  ;;  %v2197_v20 = vpack.c.bf16 %v816_v2, %v813_v59 }
 0x234   : > { %v814_v19 = vmul.f32 %v2187_v62, %v792_v6 }
 0x235   : > { %1772 = vrot.lane.b32.xlu0 %v1771_v7, %s1892_s14  ;;  %v1781_v21 = vpack.i.bf16 %v815_v8, %v812_v5  ;;  %v817_v23 = vmul.f32 %v2187_v62, %v795_v18  ;;  %v2200_v22 = vpack.c.bf16 %v815_v8, %v812_v5 }
 0x237   : > { %1782 = vrot.lane.b32.xlu1 %v1781_v21, %s1892_s14  ;;  %v1776_v29 = vpack.i.bf16 %v817_v23, %v814_v19  ;;  %v2202_v31 = vpack.c.bf16 %v817_v23, %v814_v19 }
 0x239   : > { %1777 = vrot.lane.b32.xlu0 %v1776_v29, %s1892_s14 }
 0x23b   : > { %1787 = vrot.lane.b32.xlu1 %v1781_v21, %s1893_s15 }
 0x23d   : > { %1792 = vrot.lane.b32.xlu0 %v1771_v7, %s1893_s15 }
 0x23f   : > { %1797 = vrot.lane.b32.xlu1 %v1776_v29, %s1893_s15 }
 0x241   : > { %1194 = vperm.xlu0 %1801, %v2054_v24  }
 0x243   : > { %1198 = vperm.xlu1 %1802, %v2057_v25  }
 0x2a7   : > { %v1773_v34 = vpop.permute.xlu0 %1772 }
 0x2a8   : > { %v1775_v35 = vunpack.i.h.bf16 %v1773_v34  ;;  %v1774_v36 = vunpack.i.l.bf16 %v1773_v34  ;;  %v1806_v34 = vld [vmem:[%s1990_s17 + $0x8] sm:$0xff]  }
 0x2a9   : > { %v1783_v37 = vpop.permute.xlu1 %1782 }
 0x2aa   : > { %v1785_v38 = vunpack.i.h.bf16 %v1783_v37  ;;  %v1784_v39 = vunpack.i.l.bf16 %v1783_v37 }
 0x2ab   : > { %v1778_v40 = vpop.permute.xlu0 %1777 }
 0x2ac   : > { %v1780_v41 = vunpack.i.h.bf16 %v1778_v40  ;;  %v1779_v42 = vunpack.i.l.bf16 %v1778_v40  ;;  %v863_v43 = vsel %vm399_vm1, %v1785_v38, %v1775_v35  ;;  %v862_v44 = vsel %vm399_vm1, %v1784_v39, %v1774_v36 }
 0x2ad   : > { %v1788_v45 = vpop.permute.xlu1 %1787  ;;  %v866_v1 = vpack.c.bf16 %v863_v43, %v862_v44 }
 0x2ae   : > { %v860_v46 = vsel %vm399_vm1, %v1774_v36, %v1779_v42  ;;  %v861_v48 = vsel %vm399_vm1, %v1775_v35, %v1780_v41  ;;  %v864_v51 = vsel %vm399_vm1, %v1779_v42, %v1784_v39  ;;  %v865_v52 = vsel %vm399_vm1, %v1780_v41, %v1785_v38  ;;  %v1807_v35 = vld [vmem:[%s1990_s17 + $0x10] sm:$0xff]   ;;  %s1898_s17 = smov 110  }
 0x2af   : > { %v1790_v53 = vunpack.i.h.bf16 %v1788_v45  ;;  %v1789_v54 = vunpack.i.l.bf16 %v1788_v45  ;;  %v1793_v56 = vpop.permute.xlu0 %1792  ;;  %v867_v57 = vpack.c.bf16 %v861_v48, %v860_v46  ;;  %v868_v58 = vpack.c.bf16 %v865_v52, %v864_v51 }
 0x2b0   : > { %v1795_v59 = vunpack.i.h.bf16 %v1793_v56  ;;  %v1794_v61 = vunpack.i.l.bf16 %v1793_v56 }
 0x2b1   : > { %v1798_v2 = vpop.permute.xlu1 %1797  ;;  %887 = vmatprep.subr.bf16.mxu0 %v867_v57  ;;  %1643 = vmatpush3.bf16.msra.mxu1 %v868_v58 }
 0x2b2   : > { %v838_v3 = vsel %vm374_vm2, %v1789_v54, %v1794_v61  ;;  %v839_v4 = vsel %vm374_vm2, %v1790_v53, %v1795_v59  ;;  %v1800_v5 = vunpack.i.h.bf16 %v1798_v2  ;;  %v1799_v6 = vunpack.i.l.bf16 %v1798_v2  ;;  %888 = vmatpush1.bf16.msra.mxu0 %v866_v1  ;;  %1644 = vmatprep.subr.bf16.mxu1 %v1891_v63 }
 0x2b3   : > { %889 = vmatprep.subr.bf16.mxu0 %v2197_v20  ;;  %v843_v7 = vpack.c.bf16 %v839_v4, %v838_v3 }
 0x2b4   : > { %v837_v8 = vsel %vm374_vm2, %v1795_v59, %v1800_v5  ;;  %v836_v18 = vsel %vm374_vm2, %v1794_v61, %v1799_v6  ;;  %v840_v19 = vsel %vm374_vm2, %v1799_v6, %v1789_v54  ;;  %v841_v21 = vsel %vm374_vm2, %v1800_v5, %v1790_v53 }
 0x2b5   : > { %1645 = vmatpush3.bf16.msra.mxu1 %v2202_v31  ;;  %v844_v23 = vpack.c.bf16 %v837_v8, %v836_v18  ;;  %v842_v29 = vpack.c.bf16 %v841_v21, %v840_v19 }
 0x2b6   : > { %890 = vmatpush1.bf16.msra.mxu0 %v2200_v22  ;;  %1646 = vmatprep.subr.bf16.mxu1 %v1891_v63 }
 0x2b7   : > { %891 = vmatprep.subr.bf16.mxu0 %v843_v7 }
 0x2b9   : > { %1647 = vmatpush3.bf16.msra.mxu1 %v844_v23 }
 0x2ba   : > { %892 = vmatpush1.bf16.msra.mxu0 %v842_v29  ;;  %1652 = vmatprep.subr.bf16.mxu1 %v1891_v63 }
 0x2bb   : > { %997 = vmatprep.subr.bf16.mxu0 %v867_v57 }
 0x2bc   : > { %1649 = vmatmul.mubr.msk.bf16.vlgmr.msra.gmra.mxu1 %vm414_vm3, %v1805_v33  ;;  %v1195_v61 = vpop.permute.xlu0 %1194 }
 0x2bd   : > { %1565 = vmatmul.mubr.msk.bf16.vlgmr.msra.gmra.mxu0 %vm414_vm3, %v1805_v33  ;;  %1653 = vmatpush3.bf16.msra.mxu1 %v868_v58 }
 0x2be   : > { %998 = vmatpush1.bf16.msra.mxu0 %v866_v1  ;;  %1654 = vmatprep.subr.bf16.mxu1 %v1891_v63  ;;  %v1199_v59 = vpop.permute.xlu1 %1198 }
 0x2bf   : > { %999 = vmatprep.subr.bf16.mxu0 %v2197_v20  ;;  %1019 = vmatprep.mubr.bf16.mxu0 %v1895_v32 }
 0x2c0   : > { %1658 = vmatprep.mubr.msk.bf16.mxu1 %vm1894_vm6, %v1891_v63 }
 0x2c1   : > { %1655 = vmatpush3.bf16.msra.mxu1 %v2202_v31 }
 0x2c2   : > { %1000 = vmatpush1.bf16.msra.mxu0 %v2200_v22  ;;  %1656 = vmatprep.subr.bf16.mxu1 %v1891_v63 }
 0x2c3   : > { %1001 = vmatprep.subr.bf16.mxu0 %v843_v7 }
 0x2c5   : > { %1657 = vmatpush3.bf16.msra.mxu1 %v844_v23 }
 0x2c6   : > { %1002 = vmatpush1.bf16.msra.mxu0 %v842_v29  ;;  %1662 = vmatprep.subr.bf16.mxu1 %v1891_v63 }
 0x2c7   : > { %1095 = vmatprep.subr.bf16.mxu0 %v867_v57 }
 0x2c8   : > { %1659 = vmatmul.mubr.msk.bf16.vlgmr.msra.gmra.mxu1 %vm414_vm3, %v1806_v34 }
 0x2c9   : > { %1568 = vmatmul.mubr.msk.bf16.vlgmr.msra.gmra.mxu0 %vm414_vm3, %v1806_v34  ;;  %1663 = vmatpush3.bf16.msra.mxu1 %v868_v58 }
 0x2ca   : > { %1096 = vmatpush1.bf16.msra.mxu0 %v866_v1  ;;  %1664 = vmatprep.subr.bf16.mxu1 %v1891_v63 }
 0x2cb   : > { %1097 = vmatprep.subr.bf16.mxu0 %v2197_v20  ;;  %1117 = vmatprep.mubr.bf16.mxu0 %v1895_v32 }
 0x2cc   : > { %1668 = vmatprep.mubr.msk.bf16.mxu1 %vm1894_vm6, %v1891_v63 }
 0x2cd   : > { %1665 = vmatpush3.bf16.msra.mxu1 %v2202_v31 }
 0x2ce   : > { %1098 = vmatpush1.bf16.msra.mxu0 %v2200_v22  ;;  %1666 = vmatprep.subr.bf16.mxu1 %v1891_v63 }
 0x2cf   : > { %1099 = vmatprep.subr.bf16.mxu0 %v843_v7 }
 0x2d1   : > { %1667 = vmatpush3.bf16.msra.mxu1 %v844_v23 }
 0x2d2   : > { %1100 = vmatpush1.bf16.msra.mxu0 %v842_v29 }
 0x2d4   : > { %1669 = vmatmul.mubr.msk.bf16.vlgmr.msra.gmra.mxu1 %vm414_vm3, %v1807_v35 }
 0x2d5   : > { %1571 = vmatmul.mubr.msk.bf16.vlgmr.msra.gmra.mxu0 %vm414_vm3, %v1807_v35 }
 0x37c   : > { %v954_v20 = vpop.f32.mrf.mxu1 }
 0x37d   : > { %969 = vrot.lane.b32.xlu0 %v954_v20, %s1897_s16  ;;  %v911_v32 = vpop.f32.mrf.mxu0 }
 0x37e   : > { %v1650_v36 = vpop.f32.mrf.mxu1 }
 0x37f   : > { %v913_v37 = vpop.f32.mrf.mxu0 }
 0x380   : > { %v957_v38 = vpop.f32.mrf.mxu1 }
 0x381   : > { %971 = vrot.lane.b32.xlu1 %v957_v38, %s1897_s16  ;;  %961 = vrot.lane.b32.xlu0 %v911_v32, %s1897_s16  ;;  %v915_v31 = vpop.f32.mrf.mxu0 }
 0x382   : > { %v1651_v22 = vpop.f32.mrf.mxu1 }
 0x383   : > { %v917_v63 = vpop.f32.mrf.mxu0 }
 0x385   : > { %965 = vrot.lane.b32.xlu0 %v913_v37, %s1897_s16  ;;  %963 = vrot.lane.b32.xlu1 %v915_v31, %s1897_s16 }
 0x388   : > { %v1064_v39 = vpop.f32.mrf.mxu1 }
 0x389   : > { %967 = vrot.lane.b32.xlu1 %v917_v63, %s1897_s16  ;;  %v1021_v40 = vpop.f32.mrf.mxu0 }
 0x38a   : > { %v1660_v41 = vpop.f32.mrf.mxu1 }
 0x38b   : > { %v1023_v42 = vpop.f32.mrf.mxu0 }
 0x38c   : > { %v1067_v43 = vpop.f32.mrf.mxu1 }
 0x38d   : > { %v1025_v45 = vpop.f32.mrf.mxu0 }
 0x38e   : > { %v1661_v44 = vpop.f32.mrf.mxu1 }
 0x38f   : > { %v1027_v46 = vpop.f32.mrf.mxu0 }
 0x394   : > { %v1162_v48 = vpop.f32.mrf.mxu1 }
 0x395   : > { %v1119_v51 = vpop.f32.mrf.mxu0 }
 0x396   : > { %1169 = vrot.lane.b32.xlu1 %v1119_v51, %s1898_s17  ;;  %v1670_v52 = vpop.f32.mrf.mxu1 }
 0x397   : > { %v1121_v53 = vpop.f32.mrf.mxu0 }
 0x398   : > { %v1165_v54 = vpop.f32.mrf.mxu1 }
 0x399   : > { %v1123_v56 = vpop.f32.mrf.mxu0 }
 0x39a   : > { %1173 = vrot.lane.b32.xlu1 %v1121_v53, %s1898_s17  ;;  %1171 = vrot.lane.b32.xlu0 %v1123_v56, %s1898_s17  ;;  %v1671_v57 = vpop.f32.mrf.mxu1 }
 0x39b   : > { %v1125_v58 = vpop.f32.mrf.mxu0 }
 0x39e   : > { %1177 = vrot.lane.b32.xlu1 %v1162_v48, %s1898_s17  ;;  %1175 = vrot.lane.b32.xlu0 %v1125_v58, %s1898_s17 }
 0x3a2   : > { %1179 = vrot.lane.b32.xlu0 %v1165_v54, %s1898_s17 }
 0x3ef   : > { %v970_v2 = vpop.permute.xlu0 %969 }
 0x3f3   : > { %v972_v1 = vpop.permute.xlu1 %971  ;;  %v962_v4 = vpop.permute.xlu0 %961 }
 0x3f4   : > { %v977_v8 = vsel %vm514_vm4, %v970_v2, %v962_v4 }
 0x3f5   : > { %v1071_v18 = vadd.f32 %v1021_v40, %v977_v8 }
 0x3f7   : > { %v964_v3 = vpop.permute.xlu1 %963  ;;  %v966_v6 = vpop.permute.xlu0 %965 }
 0x3f8   : > { %v975_v19 = vsel %vm514_vm4, %v962_v4, %v966_v6  ;;  %v973_v29 = vsel %vm514_vm4, %v966_v6, %v970_v2  ;;  %v978_v33 = vsel %vm514_vm4, %v972_v1, %v964_v3 }
 0x3f9   : > { %v1072_v20 = vadd.f32 %v1023_v42, %v975_v19  ;;  %v1073_v32 = vadd.f32 %v1064_v39, %v973_v29  ;;  %v1074_v36 = vadd.f32 %v1025_v45, %v978_v33 }
 0x3fb   : > { %v968_v5 = vpop.permute.xlu1 %967 }
 0x3fc   : > { %v974_v37 = vsel %vm514_vm4, %v968_v5, %v972_v1  ;;  %v976_v38 = vsel %vm514_vm4, %v964_v3, %v968_v5 }
 0x3fd   : > { %v1075_v48 = vadd.f32 %v1027_v46, %v976_v38  ;;  %v1076_v51 = vadd.f32 %v1067_v43, %v974_v37 }
 0x408   : > { %v1170_v7 = vpop.permute.xlu1 %1169 }
 0x40c   : > { %v1174_v21 = vpop.permute.xlu1 %1173  ;;  %v1172_v23 = vpop.permute.xlu0 %1171 }
 0x40d   : > { %v1183_v34 = vsel %vm723_vm5, %v1170_v7, %v1174_v21 }
 0x40e   : > { %v1187_v35 = vadd.f32 %v1183_v34, %v1071_v18 }
 0x410   : > { %v1178_v22 = vpop.permute.xlu1 %1177  ;;  %v1176_v31 = vpop.permute.xlu0 %1175  ;;  %v2279_v63 = vadd.f32 %v1195_v61, %v1187_v35 }
 0x411   : > { %v1181_v40 = vsel %vm723_vm5, %v1174_v21, %v1178_v22  ;;  %v1185_v41 = vsel %vm723_vm5, %v1178_v22, %v1170_v7  ;;  %v1184_v39 = vsel %vm723_vm5, %v1172_v23, %v1176_v31 }
 0x412   : > { %v1188_v42 = vadd.f32 %v1181_v40, %v1072_v20  ;;  %v1189_v44 = vadd.f32 %v1185_v41, %v1073_v32  ;;  %v1190_v45 = vadd.f32 %v1184_v39, %v1074_v36  ;;  %v1207_v58 = vmul.f32 %v2279_v63, %v2181_v55 }
 0x414   : > { %v2287_v52 = vadd.f32 %v1195_v61, %v1188_v42  ;;  %v2289_v53 = vadd.f32 %v1195_v61, %v1189_v44  ;;  %v1180_v54 = vpop.permute.xlu0 %1179  ;;  %v2297_v1 = vadd.f32 %v1199_v59, %v1190_v45 }
 0x415   : > { %v1182_v56 = vsel %vm723_vm5, %v1176_v31, %v1180_v54  ;;  %v1186_v57 = vsel %vm723_vm5, %v1180_v54, %v1172_v23 }
 0x416   : > { %v1191_v2 = vadd.f32 %v1182_v56, %v1075_v48  ;;  %v1192_v3 = vadd.f32 %v1186_v57, %v1076_v51  ;;  %v1208_v43 = vmul.f32 %v2287_v52, %v2174_v50  ;;  %v1209_v4 = vmul.f32 %v2289_v53, %v2187_v62 }
 0x417   : > { %v1210_v6 = vmul.f32 %v2297_v1, %v2181_v55 }
 0x418   : > { %v2301_v46 = vadd.f32 %v1199_v59, %v1191_v2  ;;  %v2303_v61 = vadd.f32 %v1199_v59, %v1192_v3  ;;  %v1213_v5 = vadd.f32 %v1208_v43, %v1207_v58 }
 0x41a   : > { %v1214_v27 = vadd.f32 %v1213_v5, %v1209_v4  ;;  %v1211_v7 = vmul.f32 %v2301_v46, %v2174_v50  ;;  %v1212_v8 = vmul.f32 %v2303_v61, %v2187_v62  ;;  %v1902_v5 = vmov 2  }
 0x41b   : > { %1803 = vset.pattern.permute.xlu0 %v1902_v5  ;;  %1804 = vset.pattern.permute.xlu1 %v1902_v5 }
 0x41c   : > { %1215 = vadd.xlane.f32.xlu1 %v1214_v27  ;;  %v1217_v18 = vadd.f32 %v1211_v7, %v1210_v6 }
 0x41e   : > { %v1218_v19 = vadd.f32 %v1217_v18, %v1212_v8 }
 0x420   : > { %1219 = vadd.xlane.f32.xlu0 %v1218_v19 }
 0x436   : > { %1235 = vrot.lane.b32.xlu0 %v2054_v24, %s1899_s19 }
 0x4a5   : > { %v1216_v59 = vpop.xlane.xlu1 %1215 }
 0x4a6   : > { %v1221_v21 = vmul.f32 0.00390625, %v1216_v59 }
 0x4a8   : > { %v1223_v29 = vmul.f32 %v1221_v21, %v2054_v24 }
 0x4a9   : > { %v1220_v23 = vpop.xlane.xlu0 %1219 }
 0x4aa   : > { %v1222_v33 = vmul.f32 0.00390625, %v1220_v23  ;;  %v1226_v35 = vsel %vm1225_vm7, %v1223_v29, 0.0 }
 0x4ac   : > { %v1224_v34 = vmul.f32 %v1222_v33, %v2057_v25 }
 0x4ad   : > { %v1236_v40 = vpop.permute.xlu0 %1235 }
 0x4ae   : > { %v1227_v20 = vsel %vm1225_vm7, %v1224_v34, 0.0 }
 0x4af   : > { %v1228_v32 = vadd.f32 %v1227_v20, %v1226_v35 }
 0x4b1   : > { %v1229_v36 = vrot.slane %v1228_v32, 4 }
 0x4b3   : > { %v1230_v37 = vadd.f32 %v1229_v36, %v1228_v32 }
 0x4b5   : > { %v1231_v38 = vrot.slane %v1230_v37, 2 }
 0x4b7   : > { %v1232_v22 = vadd.f32 %v1231_v38, %v1230_v37 }
 0x4b9   : > { %v1233_v31 = vrot.slane %v1232_v22, 1 }
 0x4bb   : > { %v1234_v41 = vadd.f32 %v1233_v31, %v1232_v22 }
 0x4bd   : > { %v1238_v39 = vadd.f32 %v1236_v40, %v1234_v41 }
 0x4bf   : > { %v1573_v42 = vmul.f32 -1.442695, %v1238_v39 }
 0x4c1   : > { %1832 = vpow2.f32 %v1573_v42 }
 0x4ce   : > { %v1833_v44 = vpop.eup %1832 }
 0x4cf   : > { %v1242_v45 = vadd.f32 1.0, %v1833_v44 }
 0x4d1   : > { %1834 = vrcp.f32 %v1242_v45 }
 0x4de   : > { %v1835_v48 = vpop.eup %1834 }
 0x4df   : > { %v1245_v51 = vmul.f32 %v1835_v48, %v1238_v39 }
 0x4e1   : > { %v1249_v54 = vrot.slane %v1245_v51, %v799_v49 }
 0x4e3   : > { %1251 = vrot.lane.b32.xlu1 %v1249_v54, %s1900_s25 }
 0x555   : > { %v1252_v56 = vpop.permute.xlu1 %1251 }
 0x556   : > { %v1254_v57 = vmul.f32 %v1252_v56, %v2054_v24  ;;  %v1255_v58 = vmul.f32 %v1252_v56, %v2057_v25 }
 0x558   : > { %1260 = vrot.lane.b32.xlu0 %v1255_v58, %s1901_s27  ;;  %1258 = vrot.lane.b32.xlu1 %v1254_v57, %s1901_s27 }
 0x5ca   : > { %v1261_v2 = vpop.permute.xlu0 %1260  ;;  %v1259_v3 = vpop.permute.xlu1 %1258 }
 0x5cb   : > { %v1268_v43 = vsel %vm1264_vm8, %v1261_v2, 0.0  ;;  %v1265_v4 = vsel %vm1264_vm8, %v1259_v3, 0.0 }
 0x5cc   : > { %1269 = vadd.xlane.f32.xlu0 %v1268_v43  ;;  %1266 = vadd.xlane.f32.xlu1 %v1265_v4 }
 0x655   : > { %v1270_v47 = vpop.xlane.xlu0 %1269  ;;  %v1267_v49 = vpop.xlane.xlu1 %1266 }
 0x656   : > { %v1272_v27 = vadd.f32 %v1270_v47, %v2057_v25  ;;  %v1271_v6 = vadd.f32 %v1267_v49, %v2054_v24 }
 0x658   : > { %v1575_v7 = vmul.f32 -1.442695, %v1272_v27  ;;  %v1574_v8 = vmul.f32 -1.442695, %v1271_v6 }
 0x65a   : > { %1836 = vpow2.f32 %v1575_v7 }
 0x65b   : > { %1838 = vpow2.f32 %v1574_v8 }
 0x667   : > { %v1837_v18 = vpop.eup %1836 }
 0x668   : > { %v1839_v19 = vpop.eup %1838  ;;  %v1280_v59 = vadd.f32 1.0, %v1837_v18 }
 0x669   : > { %v1279_v21 = vadd.f32 1.0, %v1839_v19 }
 0x66a   : > { %1840 = vrcp.f32 %v1280_v59 }
 0x66b   : > { %1842 = vrcp.f32 %v1279_v21 }
 0x677   : > { %v1841_v23 = vpop.eup %1840 }
 0x678   : > { %v1843_v29 = vpop.eup %1842  ;;  %1292 = vperm.xlu1 %1804, %v1841_v23  }
 0x679   : > { %1287 = vperm.xlu0 %1803, %v1843_v29  }
 0x6f3   : > { %v1293_v33 = vpop.permute.xlu1 %1292 }
 0x6f4   : > { %v1288_v34 = vpop.permute.xlu0 %1287  ;;  %v1298_v25 = vmul.f32 %v1293_v33, %v2297_v1  ;;  %v1299_v24 = vmul.f32 %v1293_v33, %v2301_v46  ;;  %v1300_v35 = vmul.f32 %v1293_v33, %v2303_v61 }
 0x6f5   : > { %v1295_v20 = vmul.f32 %v1288_v34, %v2279_v63  ;;  %v1296_v32 = vmul.f32 %v1288_v34, %v2287_v52  ;;  %v1297_v36 = vmul.f32 %v1288_v34, %v2289_v53 }
 0x6f6   : > { %v1304_v37 = vadd.f32 %v1298_v25, %v2009_v14  ;;  %v1305_v38 = vadd.f32 %v1299_v24, %v2003_v11  ;;  %v1306_v22 = vadd.f32 %v1300_v35, %v2013_v16 }
 0x6f7   : > { %v1301_v31 = vadd.f32 %v1295_v20, %v2005_v12  ;;  %v1302_v1 = vadd.f32 %v1296_v32, %v2001_v10  ;;  %v1303_v46 = vadd.f32 %v1297_v36, %v2011_v15 }
 0x6f8   : > { %v1310_v61 = vmul.f32 %v1304_v37, %v2181_v55  ;;  %v1311_v63 = vmul.f32 %v1305_v38, %v2174_v50  ;;  %v1312_v52 = vmul.f32 %v1306_v22, %v2187_v62 }
 0x6f9   : > { %v1307_v53 = vmul.f32 %v1301_v31, %v2181_v55  ;;  %v1308_v14 = vmul.f32 %v1302_v1, %v2174_v50  ;;  %v1309_v11 = vmul.f32 %v1303_v46, %v2187_v62 }
 0x6fa   : > { %1316 = vst [vmem:[#allocation2] sm:$0xff] %v1310_v61  ;;  %1317 = vst [vmem:[#allocation2 + $0x18] sm:$0xff] %v1311_v63 }
 0x6fb   : > { %1318 = vst [vmem:[#allocation2 + $0x20] sm:$0xff] %v1312_v52  ;;  %1313 = vst [vmem:[#allocation2 + $0x28] sm:$0xff] %v1307_v53 }
 0x6fc   : > { %1314 = vst [vmem:[#allocation2 + $0x10] sm:$0xff] %v1308_v14  ;;  %1315 = vst [vmem:[#allocation2 + $0x8] sm:$0xff] %v1309_v11 }
 0x6fd PF: > { %1320 = sbr.rel (%p2043_p13) target bundleno = 1808 (0x710), region = 52 }
 0x702   : > { %v1321_v10 = vld [vmem:[#allocation3] sm:$0xff]  ;;  %v1335_v12 = vshrl.u32 %v372_v26, 7  ;;  %v1322_v15 = vld [vmem:[#allocation3 + $0x8] sm:$0xff]  ;;  %v1324_v40 = vld [vmem:[#allocation3 + $0x18] sm:$0xff] }
 0x703   : > { %v1323_v16 = vld [vmem:[#allocation3 + $0x20] sm:$0xff]  ;;  %v1327_v55 = vadd.f32 %v1321_v10, %v2136_v60  ;;  %v1328_v50 = vadd.f32 %v1322_v15, %v2146_v9  ;;  %v1325_v41 = vld [vmem:[#allocation3 + $0x28] sm:$0xff]  ;;  %v1326_v39 = vld [vmem:[#allocation3 + $0x10] sm:$0xff]  ;;  %v1330_v48 = vadd.f32 %v1324_v40, %v2150_v17 }
 0x704   : > { %v1329_v62 = vadd.f32 %v1323_v16, %v2148_v13  ;;  %v1336_v42 = vsub.s32 0, %v1335_v12  ;;  %v1340_v44 = vsub.s32 1, %v1335_v12  ;;  %v1344_v45 = vsub.s32 2, %v1335_v12 }
 0x705   : > { %v1331_v51 = vadd.f32 %v1325_v41, %v2156_v28  ;;  %v1332_v54 = vadd.f32 %v1326_v39, %v2158_v30 }
 0x706   : > { %v1337_v56 = vrot.slane %v1969_v0, %v1336_v42  ;;  %v1341_v57 = vrot.slane %v1969_v0, %v1340_v44  ;;  %v1345_v58 = vrot.slane %v1969_v0, %v1344_v45 }
 0x708   : > { %v1349_v2 = vmul.f32 %v1337_v56, %v1327_v55  ;;  %v1350_v3 = vmul.f32 %v1341_v57, %v1328_v50  ;;  %v1351_v43 = vmul.f32 %v1345_v58, %v1329_v62  ;;  %v1352_v4 = vmul.f32 %v1337_v56, %v1330_v48 }
 0x709   : > { %v1353_v5 = vmul.f32 %v1341_v57, %v1331_v51  ;;  %v1354_v47 = vmul.f32 %v1345_v58, %v1332_v54 }
 0x70a   : > { %1355 = vst [vmem:[#allocation2 + $0x28] sm:$0xff] %v1349_v2  ;;  %1361 = vst [vmem:[#allocation3] sm:$0xff] %v1349_v2 }
 0x70b   : > { %1356 = vst [vmem:[#allocation2 + $0x10] sm:$0xff] %v1350_v3  ;;  %1362 = vst [vmem:[#allocation3 + $0x8] sm:$0xff] %v1350_v3 }
 0x70c   : > { %1357 = vst [vmem:[#allocation2 + $0x8] sm:$0xff] %v1351_v43  ;;  %1363 = vst [vmem:[#allocation3 + $0x20] sm:$0xff] %v1351_v43 }
 0x70d   : > { %1358 = vst [vmem:[#allocation2] sm:$0xff] %v1352_v4  ;;  %1364 = vst [vmem:[#allocation3 + $0x18] sm:$0xff] %v1352_v4 }
 0x70e   : > { %1359 = vst [vmem:[#allocation2 + $0x18] sm:$0xff] %v1353_v5  ;;  %1365 = vst [vmem:[#allocation3 + $0x28] sm:$0xff] %v1353_v5 }
 0x70f   : > { %1360 = vst [vmem:[#allocation2 + $0x20] sm:$0xff] %v1354_v47  ;;  %1366 = vst [vmem:[#allocation3 + $0x10] sm:$0xff] %v1354_v47 }
 0x710 PF: > { %1369 = sbr.rel (%p340_p10) target bundleno = 1827 (0x723), region = 56 }
 0x715   : > { %v1370_v49 = vld [vmem:[%s1975_s8] sm:$0xff]  ;;  %v1388_v27 = vshrl.u32 %v372_v26, 7  ;;  %v1371_v6 = vld [vmem:[%s1975_s8 + $0x8] ss:$12 sps:$4 sm:$0xff]   ;;  %v1372_v7 = vld [vmem:[%s1975_s8 + $0xc] sm:$0xff] }
 0x716   : > { %v1374_v8 = vunpack.c.l.bf16 %v1370_v49  ;;  %v1375_v18 = vunpack.c.h.bf16 %v1370_v49  ;;  %v1376_v19 = vunpack.c.l.bf16 %v1371_v6  ;;  %v1377_v59 = vunpack.c.l.bf16 %v1372_v7 }
 0x717   : > { %v1389_v21 = vsub.s32 0, %v1388_v27  ;;  %v1393_v23 = vsub.s32 1, %v1388_v27  ;;  %v1397_v29 = vsub.s32 2, %v1388_v27  ;;  %v1378_v33 = vunpack.c.h.bf16 %v1372_v7 }
 0x718   : > { %v1380_v34 = vadd.f32 %v1374_v8, %v2136_v60  ;;  %v1381_v25 = vadd.f32 %v1375_v18, %v2146_v9  ;;  %v1382_v24 = vadd.f32 %v1376_v19, %v2148_v13  ;;  %v1383_v35 = vadd.f32 %v1377_v59, %v2150_v17 }
 0x719   : > { %v1390_v26 = vrot.slane %v1969_v0, %v1389_v21  ;;  %v1394_v20 = vrot.slane %v1969_v0, %v1393_v23  ;;  %v1398_v32 = vrot.slane %v1969_v0, %v1397_v29  ;;  %v1384_v36 = vadd.f32 %v1378_v33, %v2156_v28 }
 0x71a   : > { %v1379_v37 = vunpack.c.h.bf16 %v1371_v6 }
 0x71b   : > { %v1402_v60 = vmul.f32 %v1390_v26, %v1380_v34  ;;  %v1403_v38 = vmul.f32 %v1394_v20, %v1381_v25  ;;  %v1404_v9 = vmul.f32 %v1398_v32, %v1382_v24  ;;  %v1405_v22 = vmul.f32 %v1390_v26, %v1383_v35 }
 0x71c   : > { %v1406_v13 = vmul.f32 %v1394_v20, %v1384_v36  ;;  %v1385_v17 = vadd.f32 %v1379_v37, %v2158_v30 }
 0x71d   : > { %v1584_v31 = vpack.c.bf16 %v1403_v38, %v1402_v60  ;;  %v1585_v1 = vpack.c.bf16 %v1404_v9, %v1404_v9 }
 0x71e   : > { %v1586_v46 = vpack.c.bf16 %v1406_v13, %v1405_v22  ;;  %v1407_v61 = vmul.f32 %v1398_v32, %v1385_v17 }
 0x71f   : > { %1428 = vst [vmem:[%s1995_s26] sm:$0xff] %v1584_v31  ;;  %1429 = vst [vmem:[%s1995_s26 + $0x8] sm:$0xf] %v1585_v1 }
 0x720   : > { %1430 = vst [vmem:[%s1995_s26 + $0xc] sm:$0xff] %v1586_v46  ;;  %v1587_v63 = vpack.c.bf16 %v1407_v61, %v1407_v61 }
 0x722   : > { %1431 = vst [vmem:[%s1995_s26 + $0x14] sm:$0xf] %v1587_v63 }
 0x723 PF: > { %s15_s22 = sadd.s32 1, %s1882_s22   ;;  %s2394_s18 = smov %s1874_s20 }
 0x724   : > { %p12_p1 = scmp.ge.s32.totalorder %s15_s22, 16   ;;  %s2395_s19 = smov %s1878_s21 }
 0x725   : > { %s2396_s20 = smov %s2399_s23  ;;  %s2397_s21 = smov %s2403_s24 }
 0x726   :  { %14 = sbr.rel (!%p12_p1) target bundleno = 3 (0x3), region = 95 }

// kernel: rcan_forward.7
= control target key start
LH: loop header
LB: loop body
LE: loop exit
PB: predicated region body
PF: predicated region fallthrough
CT: control target
= control target key end

     0   :  { %s1647_s15 = smov 0   ;;  %s2364_s0 = inlined_call_operand.vmem [shape: bf16[2,16,1280], index: 0, kind: input, shape index: {}]   ;;  %s2365_s1 = inlined_call_operand.vmem [shape: f32[1,1280], index: 1, kind: input, shape index: {}]   ;;  %s2366_s2 = inlined_call_operand.vmem [shape: bf16[48,48], index: 2, kind: input, shape index: {}]   ;;  %s2367_s3 = inlined_call_operand.vmem [shape: f32[16,1], index: 3, kind: input, shape index: {}]   ;;  %s2368_s4 = inlined_call_operand.vmem [shape: f32[2,16,1280], index: 4, kind: output, shape index: {}]  }
   0x1 LB: > { %s1442_s16 = sadd.s32 4294967295, %s1615_s15   ;;  %p1446_p0 = scmp.ge.s32.totalorder %s1615_s15, 1  ;;  %s1615_s15 = sphi %s1647_s15, %s14_s15  }
   0x2   : > { %p162_p1 = scmp.lt.s32.totalorder %s1615_s15, 3 }
   0x4   : > { %p163_p2 = pnand %p1446_p0, %p162_p1 }
   0x5   : > { %p188_p3 = scmp.lt.s32.totalorder (!%p163_p2), %s1442_s16, 1  ;;  %s1617_s21 = smov (!%p163_p2), 127  }
   0x6   : > { %166 = sbr.rel (%p163_p2) target bundleno = 580 (0x244), region = 36  ;;  %s1618_s22 = smov (!%p163_p2), 1  }
   0x7   : > { %s1620_s7 = smov (!%p163_p2), 34   ;;  %s1621_s8 = smov (!%p163_p2), 94  }
   0xb   : > { %s2374_s16 = smov (!%p188_p3, %s1442_s16), 1  ;;  %v1619_v35 = vmov 0   ;;  %v1261_v51 = vld [vmem:[%s2367_s3] sm:$0xff]  ;;  %v1262_v52 = vld [vmem:[%s2367_s3 + $0x8] sm:$0xff]  ;;  %v275_v53 = vlaneseq  ;;  %vm434_vm2 = vcmask 392192  }
   0xc   : > { %s1479_s17 = smul.u32 80, %s2374_s16  ;;  %470 = vmatprep.mubr.bf16.mxu0 %v1619_v35  ;;  %513 = vmatprep.mubr.bf16.mxu1 %v1619_v35 }
   0xd   : > { %1594 = vset.pattern.permute.xlu0 %v1619_v35  ;;  %1595 = vset.pattern.permute.xlu1 %v1619_v35  ;;  %v1736_v54 = vand.u32 127, %v275_v53  ;;  %s1480_s11 = smul.u32 160, %s2374_s16 }
   0xe   : > { %s1661_s20 = scalar_lea.vmem %s2364_s0, %s1479_s17 }
   0xf   : > { %v199_v0 = vld [vmem:[%s1661_s20] sm:$0xff]  ;;  %v204_v1 = vld [vmem:[%s1661_s20 + $0x28] sm:$0xff]  ;;  %v205_v7 = vld [vmem:[%s1661_s20 + $0x30] sm:$0xff]  ;;  %vm348_vm0 = vcmp.lt.s32.totalorder %v1736_v54, 127  ;;  %vm277_vm1 = vcmp.lt.s32.totalorder %v1736_v54, 1  ;;  %vm693_vm3 = vcmp.lt.s32.totalorder %v1736_v54, 34  ;;  %s2194_s14 = scalar_lea.vmem %s2368_s4, %s1480_s11 }
  0x10   : > { %v200_v2 = vld [vmem:[%s1661_s20 + $0x8] sm:$0xff]  ;;  %v216_v3 = vunpack.c.h.bf16 %v199_v0  ;;  %v226_v4 = vunpack.c.h.bf16 %v204_v1  ;;  %v215_v5 = vunpack.c.l.bf16 %v199_v0  ;;  %v225_v6 = vunpack.c.l.bf16 %v204_v1  ;;  %v1668_v8 = vld [vmem:[%s1661_s20 + $0x20] sm:$0xff]  ;;  %v201_v17 = vld [vmem:[%s1661_s20 + $0x10] sm:$0xff] }
  0x11   : > { %v1671_v9 = vld [vmem:[%s1661_s20 + $0x48] sm:$0xff]  ;;  %v217_v10 = vunpack.c.l.bf16 %v200_v2  ;;  %v227_v11 = vunpack.c.l.bf16 %v205_v7  ;;  %v224_v14 = vunpack.c.h.bf16 %v1668_v8  ;;  %v206_v18 = vld [vmem:[%s1661_s20 + $0x38] sm:$0xff]  ;;  %v218_v20 = vunpack.c.h.bf16 %v200_v2  ;;  %v207_v25 = vld [vmem:[%s1661_s20 + $0x40] sm:$0xff] }
  0x12   : > { %v1494_v12 = vpack.i.bf16 %v226_v4, %v216_v3  ;;  %v1504_v13 = vpack.i.bf16 %v225_v6, %v215_v5  ;;  %v234_v15 = vunpack.c.h.bf16 %v1671_v9  ;;  %v228_v21 = vunpack.c.h.bf16 %v205_v7  ;;  %v202_v24 = vld [vmem:[%s1661_s20 + $0x18] sm:$0xff] }
  0x13   : > { %v1499_v16 = vpack.i.bf16 %v227_v11, %v217_v10  ;;  %v219_v22 = vunpack.c.l.bf16 %v201_v17  ;;  %v229_v23 = vunpack.c.l.bf16 %v206_v18  ;;  %v1683_v26 = vcombine.high %v199_v0, %v204_v1 }
  0x14   : > { %1495 = vrot.lane.b32.xlu0 %v1494_v12, %s1617_s21  ;;  %1505 = vrot.lane.b32.xlu1 %v1504_v13, %s1617_s21  ;;  %v1519_v19 = vpack.i.bf16 %v234_v15, %v224_v14  ;;  %v1685_v27 = vcombine.low %v199_v0, %v204_v1  ;;  %v1687_v28 = vcombine.high %v200_v2, %v205_v7  ;;  %v220_v29 = vunpack.c.h.bf16 %v201_v17 }
  0x15   : > { %v230_v30 = vunpack.c.h.bf16 %v206_v18  ;;  %v1524_v31 = vpack.i.bf16 %v228_v21, %v218_v20  ;;  %v1529_v32 = vpack.i.bf16 %v229_v23, %v219_v22  ;;  %v221_v33 = vunpack.c.l.bf16 %v202_v24 }
  0x16   : > { %v231_v34 = vunpack.c.l.bf16 %v207_v25  ;;  %v1692_v36 = vcombine.low %v200_v2, %v205_v7  ;;  %v1699_v39 = vcombine.high %v201_v17, %v206_v18  ;;  %v1701_v40 = vcombine.low %v201_v17, %v206_v18 }
  0x17   : > { %v1534_v37 = vpack.i.bf16 %v230_v30, %v220_v29  ;;  %v222_v41 = vunpack.c.h.bf16 %v202_v24  ;;  %v232_v42 = vunpack.c.h.bf16 %v207_v25  ;;  %v223_v43 = vunpack.c.l.bf16 %v1668_v8 }
  0x18   : > { %1500 = vrot.lane.b32.xlu0 %v1499_v16, %s1617_s21  ;;  %1510 = vrot.lane.b32.xlu1 %v1504_v13, %s1618_s22  ;;  %v1539_v38 = vpack.i.bf16 %v231_v34, %v221_v33  ;;  %v233_v44 = vunpack.c.l.bf16 %v1671_v9  ;;  %v1711_v47 = vcombine.high %v202_v24, %v207_v25  ;;  %v1713_v48 = vcombine.low %v202_v24, %v207_v25 }
  0x19   : > { %v1564_v45 = vpack.i.bf16 %v232_v42, %v222_v41  ;;  %v1719_v49 = vcombine.high %v1668_v8, %v1671_v9  ;;  %v1723_v50 = vcombine.low %v1668_v8, %v1671_v9  ;;  %vm1220_vm4 = vcmp.lt.s32.totalorder %v1736_v54, 94 }
  0x1a   : > { %v1569_v46 = vpack.i.bf16 %v233_v44, %v223_v43 }
  0x1c   : > { %1515 = vrot.lane.b32.xlu0 %v1494_v12, %s1618_s22  ;;  %1520 = vrot.lane.b32.xlu1 %v1519_v19, %s1618_s22 }
  0x20   : > { %1525 = vrot.lane.b32.xlu0 %v1524_v31, %s1617_s21  ;;  %1530 = vrot.lane.b32.xlu1 %v1529_v32, %s1617_s21 }
  0x24   : > { %1535 = vrot.lane.b32.xlu0 %v1534_v37, %s1617_s21  ;;  %1540 = vrot.lane.b32.xlu1 %v1539_v38, %s1617_s21 }
  0x28   : > { %1545 = vrot.lane.b32.xlu0 %v1499_v16, %s1618_s22  ;;  %1550 = vrot.lane.b32.xlu1 %v1524_v31, %s1618_s22 }
  0x2c   : > { %1555 = vrot.lane.b32.xlu0 %v1529_v32, %s1618_s22  ;;  %1560 = vrot.lane.b32.xlu1 %v1534_v37, %s1618_s22 }
  0x30   : > { %1565 = vrot.lane.b32.xlu0 %v1564_v45, %s1617_s21  ;;  %1570 = vrot.lane.b32.xlu1 %v1569_v46, %s1617_s21 }
  0x34   : > { %1575 = vrot.lane.b32.xlu0 %v1519_v19, %s1617_s21  ;;  %1580 = vrot.lane.b32.xlu1 %v1539_v38, %s1618_s22 }
  0x38   : > { %1585 = vrot.lane.b32.xlu0 %v1564_v45, %s1618_s22  ;;  %1590 = vrot.lane.b32.xlu1 %v1569_v46, %s1618_s22  ;;  %v1805_v46 = vld [vmem:[%s2366_s2] sm:$0xff]  }
  0x3c   : > { %1265 = vperm.xlu0 %1594, %v1261_v51   ;;  %1270 = vperm.xlu1 %1595, %v1262_v52  }
  0x86   : > { %v1496_v55 = vpop.permute.xlu0 %1495  ;;  %v1738_v56 = vpop.permute.xlu1 %1505 }
  0x87   : > { %v1498_v57 = vunpack.i.h.bf16 %v1496_v55  ;;  %v1497_v58 = vunpack.i.l.bf16 %v1496_v55  ;;  %v1508_v59 = vunpack.i.h.bf16 %v1738_v56  ;;  %v1507_v60 = vunpack.i.l.bf16 %v1738_v56 }
  0x89   : > { %v365_v1 = vsel %vm348_vm0, %v1507_v60, %v1497_v58  ;;  %v366_v2 = vsel %vm348_vm0, %v1508_v59, %v1498_v57 }
  0x8a   : > { %v1501_v61 = vpop.permute.xlu0 %1500  ;;  %v1511_v62 = vpop.permute.xlu1 %1510  ;;  %v1760_v10 = vpack.c.bf16 %v366_v2, %v365_v1 }
  0x8b   : > { %v1503_v63 = vunpack.i.h.bf16 %v1501_v61  ;;  %v1502_v0 = vunpack.i.l.bf16 %v1501_v61  ;;  %v1513_v5 = vunpack.i.h.bf16 %v1511_v62  ;;  %v1512_v6 = vunpack.i.l.bf16 %v1511_v62 }
  0x8d   : > { %v363_v3 = vsel %vm348_vm0, %v1497_v58, %v1502_v0  ;;  %v364_v4 = vsel %vm348_vm0, %v1498_v57, %v1503_v63 }
  0x8e   : > { %v1516_v7 = vpop.permute.xlu0 %1515  ;;  %v1756_v8 = vpop.permute.xlu1 %1520  ;;  %v1758_v9 = vpack.c.bf16 %v364_v4, %v363_v3 }
  0x8f   : > { %v1518_v11 = vunpack.i.h.bf16 %v1516_v7  ;;  %v1517_v12 = vunpack.i.l.bf16 %v1516_v7  ;;  %v1523_v13 = vunpack.i.h.bf16 %v1756_v8  ;;  %v1522_v14 = vunpack.i.l.bf16 %v1756_v8 }
  0x90   : > { %448 = vmatprep.subr.bf16.mxu0 %v1758_v9 }
  0x91   : > { %449 = vmatpush1.bf16.msra.mxu0 %v1760_v10  ;;  %v294_v15 = vsel %vm277_vm1, %v1512_v6, %v1517_v12  ;;  %v295_v16 = vsel %vm277_vm1, %v1513_v5, %v1518_v11  ;;  %v296_v19 = vsel %vm277_vm1, %v1522_v14, %v1512_v6  ;;  %v297_v20 = vsel %vm277_vm1, %v1523_v13, %v1513_v5 }
  0x92   : > { %v1526_v17 = vpop.permute.xlu0 %1525  ;;  %v1531_v18 = vpop.permute.xlu1 %1530  ;;  %450 = vmatprep.subr.bf16.mxu0 %v1683_v26  ;;  %v1779_v25 = vpack.c.bf16 %v295_v16, %v294_v15  ;;  %v1795_v38 = vpack.c.bf16 %v297_v20, %v296_v19 }
  0x93   : > { %v1528_v21 = vunpack.i.h.bf16 %v1526_v17  ;;  %v1527_v22 = vunpack.i.l.bf16 %v1526_v17  ;;  %v1533_v23 = vunpack.i.h.bf16 %v1531_v18  ;;  %v1532_v24 = vunpack.i.l.bf16 %v1531_v18 }
  0x95   : > { %451 = vmatpush1.bf16.msra.mxu0 %v1685_v27  ;;  %v359_v29 = vsel %vm348_vm0, %v1527_v22, %v1532_v24  ;;  %v360_v30 = vsel %vm348_vm0, %v1528_v21, %v1533_v23  ;;  %v361_v31 = vsel %vm348_vm0, %v1502_v0, %v1527_v22  ;;  %v362_v32 = vsel %vm348_vm0, %v1503_v63, %v1528_v21 }
  0x96   : > { %v1536_v33 = vpop.permute.xlu0 %1535  ;;  %v1790_v34 = vpop.permute.xlu1 %1540  ;;  %452 = vmatprep.subr.bf16.mxu0 %v1779_v25  ;;  %v1793_v37 = vpack.c.bf16 %v360_v30, %v359_v29  ;;  %v1797_v41 = vpack.c.bf16 %v362_v32, %v361_v31 }
  0x97   : > { %v1538_v42 = vunpack.i.h.bf16 %v1536_v33  ;;  %v1537_v43 = vunpack.i.l.bf16 %v1536_v33  ;;  %v1543_v44 = vunpack.i.h.bf16 %v1790_v34  ;;  %v1542_v45 = vunpack.i.l.bf16 %v1790_v34 }
  0x98   : > { %491 = vmatprep.subr.bf16.mxu1 %v1793_v37 }
  0x99   : > { %v357_v51 = vsel %vm348_vm0, %v1532_v24, %v1537_v43  ;;  %v358_v52 = vsel %vm348_vm0, %v1533_v23, %v1538_v42  ;;  %453 = vmatpush1.bf16.msra.mxu0 %v1795_v38  ;;  %492 = vmatpush1.bf16.msra.mxu1 %v1797_v41  ;;  %v355_v55 = vsel %vm348_vm0, %v1537_v43, %v1542_v45 }
  0x9a   : > { %v1815_v57 = vpack.c.bf16 %v358_v52, %v357_v51  ;;  %v1546_v58 = vpop.permute.xlu0 %1545  ;;  %v1551_v61 = vpop.permute.xlu1 %1550  ;;  %493 = vmatprep.subr.bf16.mxu1 %v1687_v28  ;;  %v356_v62 = vsel %vm348_vm0, %v1538_v42, %v1543_v44 }
  0x9b   : > { %v1548_v63 = vunpack.i.h.bf16 %v1546_v58  ;;  %v1547_v0 = vunpack.i.l.bf16 %v1546_v58  ;;  %v1553_v1 = vunpack.i.h.bf16 %v1551_v61  ;;  %v1552_v2 = vunpack.i.l.bf16 %v1551_v61 }
  0x9c   : > { %v1820_v3 = vpack.c.bf16 %v356_v62, %v355_v55  ;;  %1460 = vmatmul.mubr.msk.bf16.vlgmr.msra.gmra.mxu0 %vm434_vm2, %v1805_v46 }
  0x9d   : > { %494 = vmatpush1.bf16.msra.mxu1 %v1692_v36  ;;  %v290_v4 = vsel %vm277_vm1, %v1547_v0, %v1552_v2  ;;  %v291_v5 = vsel %vm277_vm1, %v1548_v63, %v1553_v1  ;;  %v292_v6 = vsel %vm277_vm1, %v1517_v12, %v1547_v0  ;;  %v293_v7 = vsel %vm277_vm1, %v1518_v11, %v1548_v63 }
  0x9e   : > { %534 = vmatprep.subr.bf16.mxu0 %v1820_v3  ;;  %v1556_v15 = vpop.permute.xlu0 %1555  ;;  %v1561_v16 = vpop.permute.xlu1 %1560  ;;  %v1834_v17 = vpack.c.bf16 %v291_v5, %v290_v4  ;;  %v1836_v18 = vpack.c.bf16 %v293_v7, %v292_v6  ;;  %556 = vmatprep.mubr.bf16.mxu0 %v1619_v35 }
  0x9f   : > { %535 = vmatpush1.bf16.msra.mxu0 %v1815_v57  ;;  %v1558_v19 = vunpack.i.h.bf16 %v1556_v15  ;;  %v1557_v20 = vunpack.i.l.bf16 %v1556_v15  ;;  %v1563_v21 = vunpack.i.h.bf16 %v1561_v16  ;;  %v1562_v22 = vunpack.i.l.bf16 %v1561_v16 }
  0xa0   : > { %495 = vmatprep.subr.bf16.mxu1 %v1834_v17  ;;  %536 = vmatprep.subr.bf16.mxu0 %v1699_v39 }
  0xa1   : > { %v288_v11 = vsel %vm277_vm1, %v1552_v2, %v1557_v20  ;;  %v289_v12 = vsel %vm277_vm1, %v1553_v1, %v1558_v19  ;;  %496 = vmatpush1.bf16.msra.mxu1 %v1836_v18  ;;  %v286_v23 = vsel %vm277_vm1, %v1557_v20, %v1562_v22  ;;  %v287_v24 = vsel %vm277_vm1, %v1558_v19, %v1563_v21 }
  0xa2   : > { %v1851_v29 = vpack.c.bf16 %v289_v12, %v288_v11  ;;  %v1566_v30 = vpop.permute.xlu0 %1565  ;;  %v1571_v31 = vpop.permute.xlu1 %1570  ;;  %v1853_v32 = vpack.c.bf16 %v287_v24, %v286_v23 }
  0xa3   : > { %537 = vmatpush1.bf16.msra.mxu0 %v1701_v40  ;;  %v1568_v33 = vunpack.i.h.bf16 %v1566_v30  ;;  %v1567_v34 = vunpack.i.l.bf16 %v1566_v30  ;;  %v1573_v42 = vunpack.i.h.bf16 %v1571_v31  ;;  %v1572_v43 = vunpack.i.l.bf16 %v1571_v31 }
  0xa4   : > { %1461 = vmatmul.mubr.msk.bf16.vlgmr.msra.gmra.mxu1 %vm434_vm2, %v1805_v46  ;;  %538 = vmatprep.subr.bf16.mxu0 %v1853_v32 }
  0xa5   : > { %v353_v51 = vsel %vm348_vm0, %v1542_v45, %v1567_v34  ;;  %v354_v52 = vsel %vm348_vm0, %v1543_v44, %v1568_v33  ;;  %v351_v55 = vsel %vm348_vm0, %v1567_v34, %v1572_v43  ;;  %v352_v58 = vsel %vm348_vm0, %v1568_v33, %v1573_v42  ;;  %599 = vmatprep.mubr.bf16.mxu1 %v1619_v35 }
  0xa6   : > { %v1868_v61 = vpack.c.bf16 %v354_v52, %v353_v51  ;;  %v1576_v62 = vpop.permute.xlu0 %1575  ;;  %v1581_v63 = vpop.permute.xlu1 %1580  ;;  %v1870_v0 = vpack.c.bf16 %v352_v58, %v351_v55 }
  0xa7   : > { %539 = vmatpush1.bf16.msra.mxu0 %v1851_v29  ;;  %v1578_v45 = vunpack.i.h.bf16 %v1576_v62  ;;  %v1577_v1 = vunpack.i.l.bf16 %v1576_v62  ;;  %v1583_v4 = vunpack.i.h.bf16 %v1581_v63  ;;  %v1582_v5 = vunpack.i.l.bf16 %v1581_v63 }
  0xa8   : > { %577 = vmatprep.subr.bf16.mxu1 %v1870_v0 }
  0xa9   : > { %v349_v44 = vsel %vm348_vm0, %v1572_v43, %v1577_v1  ;;  %v350_v2 = vsel %vm348_vm0, %v1573_v42, %v1578_v45  ;;  %578 = vmatpush1.bf16.msra.mxu1 %v1868_v61  ;;  %v367_v15 = vsel %vm348_vm0, %v1577_v1, %v1507_v60  ;;  %v368_v23 = vsel %vm348_vm0, %v1578_v45, %v1508_v59 }
  0xaa   : > { %v1586_v6 = vpop.permute.xlu0 %1585  ;;  %v1591_v7 = vpop.permute.xlu1 %1590  ;;  %1462 = vmatmul.mubr.msk.bf16.vlgmr.msra.gmra.mxu0 %vm434_vm2, %v1805_v46  ;;  %579 = vmatprep.subr.bf16.mxu1 %v1711_v47  ;;  %v1887_v20 = vpack.c.bf16 %v350_v2, %v349_v44  ;;  %v284_v24 = vsel %vm277_vm1, %v1562_v22, %v1582_v5  ;;  %v285_v30 = vsel %vm277_vm1, %v1563_v21, %v1583_v4 }
  0xab   : > { %v1588_v16 = vunpack.i.h.bf16 %v1586_v6  ;;  %v1587_v19 = vunpack.i.l.bf16 %v1586_v6  ;;  %642 = vmatprep.mubr.bf16.mxu0 %v1619_v35  ;;  %v1593_v11 = vunpack.i.h.bf16 %v1591_v7  ;;  %v1592_v12 = vunpack.i.l.bf16 %v1591_v7 }
  0xac   : > { %v1897_v60 = vpack.c.bf16 %v368_v23, %v367_v15  ;;  %v1907_v59 = vpack.c.bf16 %v285_v30, %v284_v24 }
  0xad   : > { %580 = vmatpush1.bf16.msra.mxu1 %v1713_v48  ;;  %v282_v31 = vsel %vm277_vm1, %v1582_v5, %v1587_v19  ;;  %v283_v33 = vsel %vm277_vm1, %v1583_v4, %v1588_v16  ;;  %v278_v21 = vsel %vm277_vm1, %v1592_v12, %v1522_v14  ;;  %v279_v22 = vsel %vm277_vm1, %v1593_v11, %v1523_v13  ;;  %v1607_v13 = vld [vmem:[%s2366_s2 + $0x8] sm:$0xff]  }
  0xae   : > { %620 = vmatprep.subr.bf16.mxu0 %v1897_v60  ;;  %v1905_v56 = vpack.c.bf16 %v283_v33, %v282_v31  ;;  %v281_v34 = vsel %vm277_vm1, %v1588_v16, %v1593_v11  ;;  %v280_v42 = vsel %vm277_vm1, %v1587_v19, %v1592_v12  ;;  %v1925_v43 = vpack.c.bf16 %v279_v22, %v278_v21 }
  0xaf   : > { %621 = vmatpush1.bf16.msra.mxu0 %v1887_v20  ;;  %v1932_v8 = vpack.c.bf16 %v281_v34, %v280_v42 }
  0xb0   : > { %581 = vmatprep.subr.bf16.mxu1 %v1905_v56  ;;  %622 = vmatprep.subr.bf16.mxu0 %v1719_v49 }
  0xb1   : > { %582 = vmatpush1.bf16.msra.mxu1 %v1907_v59 }
  0xb2   : > { %732 = vmatprep.subr.bf16.mxu1 %v1758_v9 }
  0xb3   : > { %623 = vmatpush1.bf16.msra.mxu0 %v1723_v50 }
  0xb4   : > { %624 = vmatprep.subr.bf16.mxu0 %v1925_v43  ;;  %1463 = vmatmul.mubr.msk.bf16.vlgmr.msra.gmra.mxu1 %vm434_vm2, %v1805_v46 }
  0xb5   : > { %733 = vmatpush1.bf16.msra.mxu1 %v1760_v10  ;;  %754 = vmatprep.mubr.bf16.mxu1 %v1619_v35 }
  0xb6   : > { %734 = vmatprep.subr.bf16.mxu1 %v1683_v26 }
  0xb7   : > { %625 = vmatpush1.bf16.msra.mxu0 %v1932_v8 }
  0xb8   : > { %775 = vmatprep.subr.bf16.mxu0 %v1793_v37 }
  0xb9   : > { %735 = vmatpush1.bf16.msra.mxu1 %v1685_v27 }
  0xba   : > { %1464 = vmatmul.mubr.msk.bf16.vlgmr.msra.gmra.mxu0 %vm434_vm2, %v1805_v46  ;;  %736 = vmatprep.subr.bf16.mxu1 %v1779_v25 }
  0xbb   : > { %776 = vmatpush1.bf16.msra.mxu0 %v1797_v41  ;;  %797 = vmatprep.mubr.bf16.mxu0 %v1619_v35 }
  0xbc   : > { %777 = vmatprep.subr.bf16.mxu0 %v1687_v28 }
  0xbd   : > { %737 = vmatpush1.bf16.msra.mxu1 %v1795_v38 }
  0xbe   : > { %818 = vmatprep.subr.bf16.mxu1 %v1820_v3 }
  0xbf   : > { %778 = vmatpush1.bf16.msra.mxu0 %v1692_v36 }
  0xc0   : > { %779 = vmatprep.subr.bf16.mxu0 %v1834_v17  ;;  %1466 = vmatmul.mubr.msk.bf16.vlgmr.msra.gmra.mxu1 %vm434_vm2, %v1607_v13 }
  0xc1   : > { %819 = vmatpush1.bf16.msra.mxu1 %v1815_v57  ;;  %840 = vmatprep.mubr.bf16.mxu1 %v1619_v35 }
  0xc2   : > { %820 = vmatprep.subr.bf16.mxu1 %v1699_v39 }
  0xc3   : > { %780 = vmatpush1.bf16.msra.mxu0 %v1836_v18 }
  0xc4   : > { %861 = vmatprep.subr.bf16.mxu0 %v1870_v0 }
  0xc5   : > { %821 = vmatpush1.bf16.msra.mxu1 %v1701_v40 }
  0xc6   : > { %1467 = vmatmul.mubr.msk.bf16.vlgmr.msra.gmra.mxu0 %vm434_vm2, %v1607_v13  ;;  %822 = vmatprep.subr.bf16.mxu1 %v1853_v32 }
  0xc7   : > { %862 = vmatpush1.bf16.msra.mxu0 %v1868_v61  ;;  %883 = vmatprep.mubr.bf16.mxu0 %v1619_v35 }
  0xc8   : > { %863 = vmatprep.subr.bf16.mxu0 %v1711_v47 }
  0xc9   : > { %823 = vmatpush1.bf16.msra.mxu1 %v1851_v29 }
  0xca   : > { %904 = vmatprep.subr.bf16.mxu1 %v1897_v60 }
  0xcb   : > { %864 = vmatpush1.bf16.msra.mxu0 %v1713_v48 }
  0xcc   : > { %865 = vmatprep.subr.bf16.mxu0 %v1905_v56  ;;  %1468 = vmatmul.mubr.msk.bf16.vlgmr.msra.gmra.mxu1 %vm434_vm2, %v1607_v13 }
  0xcd   : > { %905 = vmatpush1.bf16.msra.mxu1 %v1887_v20  ;;  %926 = vmatprep.mubr.bf16.mxu1 %v1619_v35 }
  0xce   : > { %906 = vmatprep.subr.bf16.mxu1 %v1719_v49 }
  0xcf   : > { %866 = vmatpush1.bf16.msra.mxu0 %v1907_v59 }
  0xd0   : > { %975 = vmatprep.subr.bf16.mxu0 %v1758_v9  ;;  %v1608_v9 = vld [vmem:[%s2366_s2 + $0x10] sm:$0xff]  }
  0xd1   : > { %907 = vmatpush1.bf16.msra.mxu1 %v1723_v50 }
  0xd2   : > { %1469 = vmatmul.mubr.msk.bf16.vlgmr.msra.gmra.mxu0 %vm434_vm2, %v1607_v13  ;;  %908 = vmatprep.subr.bf16.mxu1 %v1925_v43 }
  0xd3   : > { %976 = vmatpush1.bf16.msra.mxu0 %v1760_v10  ;;  %997 = vmatprep.mubr.bf16.mxu0 %v1619_v35 }
  0xd4   : > { %977 = vmatprep.subr.bf16.mxu0 %v1683_v26 }
  0xd5   : > { %909 = vmatpush1.bf16.msra.mxu1 %v1932_v8 }
  0xd6   : > { %1018 = vmatprep.subr.bf16.mxu1 %v1793_v37 }
  0xd7   : > { %978 = vmatpush1.bf16.msra.mxu0 %v1685_v27 }
  0xd8   : > { %979 = vmatprep.subr.bf16.mxu0 %v1779_v25  ;;  %1470 = vmatmul.mubr.msk.bf16.vlgmr.msra.gmra.mxu1 %vm434_vm2, %v1607_v13  ;;  %v2102_v13 = vpop.permute.xlu1 %1270 }
  0xd9   : > { %1019 = vmatpush1.bf16.msra.mxu1 %v1797_v41  ;;  %1040 = vmatprep.mubr.bf16.mxu1 %v1619_v35 }
  0xda   : > { %1020 = vmatprep.subr.bf16.mxu1 %v1687_v28 }
  0xdb   : > { %980 = vmatpush1.bf16.msra.mxu0 %v1795_v38 }
  0xdc   : > { %1061 = vmatprep.subr.bf16.mxu0 %v1820_v3 }
  0xdd   : > { %1021 = vmatpush1.bf16.msra.mxu1 %v1692_v36 }
  0xde   : > { %1472 = vmatmul.mubr.msk.bf16.vlgmr.msra.gmra.mxu0 %vm434_vm2, %v1608_v9  ;;  %1022 = vmatprep.subr.bf16.mxu1 %v1834_v17 }
  0xdf   : > { %1062 = vmatpush1.bf16.msra.mxu0 %v1815_v57  ;;  %1083 = vmatprep.mubr.bf16.mxu0 %v1619_v35 }
  0xe0   : > { %1063 = vmatprep.subr.bf16.mxu0 %v1699_v39 }
  0xe1   : > { %1023 = vmatpush1.bf16.msra.mxu1 %v1836_v18 }
  0xe2   : > { %1104 = vmatprep.subr.bf16.mxu1 %v1870_v0 }
  0xe3   : > { %1064 = vmatpush1.bf16.msra.mxu0 %v1701_v40 }
  0xe4   : > { %1065 = vmatprep.subr.bf16.mxu0 %v1853_v32  ;;  %1473 = vmatmul.mubr.msk.bf16.vlgmr.msra.gmra.mxu1 %vm434_vm2, %v1608_v9 }
  0xe5   : > { %1105 = vmatpush1.bf16.msra.mxu1 %v1868_v61  ;;  %1126 = vmatprep.mubr.bf16.mxu1 %v1619_v35 }
  0xe6   : > { %1106 = vmatprep.subr.bf16.mxu1 %v1711_v47 }
  0xe7   : > { %1066 = vmatpush1.bf16.msra.mxu0 %v1851_v29 }
  0xe8   : > { %1147 = vmatprep.subr.bf16.mxu0 %v1897_v60 }
  0xe9   : > { %1107 = vmatpush1.bf16.msra.mxu1 %v1713_v48 }
  0xea   : > { %1474 = vmatmul.mubr.msk.bf16.vlgmr.msra.gmra.mxu0 %vm434_vm2, %v1608_v9  ;;  %1108 = vmatprep.subr.bf16.mxu1 %v1905_v56 }
  0xeb   : > { %1148 = vmatpush1.bf16.msra.mxu0 %v1887_v20  ;;  %1169 = vmatprep.mubr.bf16.mxu0 %v1619_v35 }
  0xec   : > { %1149 = vmatprep.subr.bf16.mxu0 %v1719_v49 }
  0xed   : > { %1109 = vmatpush1.bf16.msra.mxu1 %v1907_v59 }
  0xef   : > { %1150 = vmatpush1.bf16.msra.mxu0 %v1723_v50 }
  0xf0   : > { %1151 = vmatprep.subr.bf16.mxu0 %v1925_v43  ;;  %1475 = vmatmul.mubr.msk.bf16.vlgmr.msra.gmra.mxu1 %vm434_vm2, %v1608_v9 }
  0xf3   : > { %1152 = vmatpush1.bf16.msra.mxu0 %v1932_v8 }
  0xf6   : > { %1476 = vmatmul.mubr.msk.bf16.vlgmr.msra.gmra.mxu0 %vm434_vm2, %v1608_v9  ;;  %v2104_v9 = vpop.permute.xlu0 %1265 }
 0x15c   : > { %v472_v26 = vpop.f32.mrf.mxu0 }
 0x15d   : > { %653 = vrot.lane.b32.xlu0 %v472_v26, %s1620_s7 }
 0x15e   : > { %v474_v27 = vpop.f32.mrf.mxu0 }
 0x160   : > { %v476_v28 = vpop.f32.mrf.mxu0 }
 0x161   : > { %655 = vrot.lane.b32.xlu1 %v476_v28, %s1620_s7 }
 0x162   : > { %v478_v40 = vpop.f32.mrf.mxu0 }
 0x164   : > { %v515_v35 = vpop.f32.mrf.mxu1 }
 0x165   : > { %661 = vrot.lane.b32.xlu0 %v515_v35, %s1620_s7 }
 0x166   : > { %v517_v36 = vpop.f32.mrf.mxu1 }
 0x168   : > { %v519_v39 = vpop.f32.mrf.mxu1 }
 0x169   : > { %657 = vrot.lane.b32.xlu0 %v474_v27, %s1620_s7  ;;  %663 = vrot.lane.b32.xlu1 %v519_v39, %s1620_s7 }
 0x16a   : > { %v558_v47 = vpop.f32.mrf.mxu0  ;;  %v521_v48 = vpop.f32.mrf.mxu1 }
 0x16c   : > { %v560_v49 = vpop.f32.mrf.mxu0 }
 0x16d   : > { %665 = vrot.lane.b32.xlu0 %v517_v36, %s1620_s7  ;;  %659 = vrot.lane.b32.xlu1 %v478_v40, %s1620_s7 }
 0x16e   : > { %v562_v50 = vpop.f32.mrf.mxu0 }
 0x170   : > { %v564_v25 = vpop.f32.mrf.mxu0 }
 0x171   : > { %667 = vrot.lane.b32.xlu1 %v521_v48, %s1620_s7  ;;  %669 = vrot.lane.b32.xlu0 %v558_v47, %s1620_s7 }
 0x174   : > { %v601_v10 = vpop.f32.mrf.mxu1 }
 0x175   : > { %671 = vrot.lane.b32.xlu1 %v562_v50, %s1620_s7  ;;  %677 = vrot.lane.b32.xlu0 %v601_v10, %s1620_s7 }
 0x176   : > { %v603_v14 = vpop.f32.mrf.mxu1 }
 0x178   : > { %v605_v37 = vpop.f32.mrf.mxu1 }
 0x179   : > { %673 = vrot.lane.b32.xlu0 %v560_v49, %s1620_s7  ;;  %679 = vrot.lane.b32.xlu1 %v605_v37, %s1620_s7 }
 0x17a   : > { %v644_v38 = vpop.f32.mrf.mxu0  ;;  %v607_v46 = vpop.f32.mrf.mxu1 }
 0x17c   : > { %v646_v41 = vpop.f32.mrf.mxu0 }
 0x17d   : > { %681 = vrot.lane.b32.xlu0 %v603_v14, %s1620_s7  ;;  %675 = vrot.lane.b32.xlu1 %v564_v25, %s1620_s7 }
 0x17e   : > { %v648_v57 = vpop.f32.mrf.mxu0 }
 0x180   : > { %v2037_v3 = vpop.f32.mrf.mxu1  ;;  %v650_v18 = vpop.f32.mrf.mxu0 }
 0x181   : > { %683 = vrot.lane.b32.xlu1 %v607_v46, %s1620_s7  ;;  %685 = vrot.lane.b32.xlu0 %v644_v38, %s1620_s7 }
 0x182   : > { %v2041_v17 = vpop.f32.mrf.mxu1 }
 0x184   : > { %v2045_v29 = vpop.f32.mrf.mxu1 }
 0x185   : > { %689 = vrot.lane.b32.xlu0 %v646_v41, %s1620_s7  ;;  %687 = vrot.lane.b32.xlu1 %v648_v57, %s1620_s7 }
 0x186   : > { %v2047_v32 = vpop.f32.mrf.mxu0  ;;  %v2052_v52 = vpop.f32.mrf.mxu1 }
 0x188   : > { %v2049_v51 = vpop.f32.mrf.mxu0 }
 0x189   : > { %691 = vrot.lane.b32.xlu1 %v650_v18, %s1620_s7 }
 0x18a   : > { %v2054_v55 = vpop.f32.mrf.mxu0 }
 0x18c   : > { %v2056_v58 = vpop.f32.mrf.mxu1  ;;  %v2060_v62 = vpop.f32.mrf.mxu0 }
 0x18e   : > { %v2058_v61 = vpop.f32.mrf.mxu1 }
 0x190   : > { %v2062_v63 = vpop.f32.mrf.mxu1 }
 0x192   : > { %v2064_v0 = vpop.f32.mrf.mxu0  ;;  %v2068_v1 = vpop.f32.mrf.mxu1 }
 0x194   : > { %v2066_v45 = vpop.f32.mrf.mxu0 }
 0x196   : > { %v2070_v44 = vpop.f32.mrf.mxu0 }
 0x198   : > { %v2072_v2 = vpop.f32.mrf.mxu1  ;;  %v2076_v5 = vpop.f32.mrf.mxu0 }
 0x19a   : > { %v2074_v4 = vpop.f32.mrf.mxu1 }
 0x19c   : > { %v2078_v6 = vpop.f32.mrf.mxu1 }
 0x19e   : > { %v999_v7 = vpop.f32.mrf.mxu0  ;;  %v2081_v16 = vpop.f32.mrf.mxu1 }
 0x19f   : > { %1180 = vrot.lane.b32.xlu1 %v999_v7, %s1621_s8 }
 0x1a0   : > { %v1001_v15 = vpop.f32.mrf.mxu0 }
 0x1a2   : > { %v1003_v19 = vpop.f32.mrf.mxu0 }
 0x1a3   : > { %1182 = vrot.lane.b32.xlu0 %v1003_v19, %s1621_s8 }
 0x1a4   : > { %v1042_v20 = vpop.f32.mrf.mxu1  ;;  %v1005_v23 = vpop.f32.mrf.mxu0 }
 0x1a5   : > { %1188 = vrot.lane.b32.xlu1 %v1042_v20, %s1621_s8 }
 0x1a6   : > { %v1044_v11 = vpop.f32.mrf.mxu1 }
 0x1a8   : > { %v1046_v12 = vpop.f32.mrf.mxu1 }
 0x1a9   : > { %1184 = vrot.lane.b32.xlu1 %v1001_v15, %s1621_s8  ;;  %1190 = vrot.lane.b32.xlu0 %v1046_v12, %s1621_s8  ;;  %v2139_v15 = vshrl.u32 %v275_v53, 7  ;;  %v2154_v53 = vld [vmem:[%s2365_s1] sm:$0xff] }
 0x1aa   : > { %v1085_v24 = vpop.f32.mrf.mxu0  ;;  %v1048_v30 = vpop.f32.mrf.mxu1 }
 0x1ac   : > { %v1087_v60 = vpop.f32.mrf.mxu0 }
 0x1ad   : > { %1192 = vrot.lane.b32.xlu1 %v1044_v11, %s1621_s8  ;;  %1186 = vrot.lane.b32.xlu0 %v1005_v23, %s1621_s8  ;;  %v2370_v23 = vsub.s32 0, %v2139_v15 }
 0x1ae   : > { %v1089_v33 = vpop.f32.mrf.mxu0 }
 0x1b0   : > { %v1128_v31 = vpop.f32.mrf.mxu1  ;;  %v1091_v21 = vpop.f32.mrf.mxu0 }
 0x1b1   : > { %1194 = vrot.lane.b32.xlu0 %v1048_v30, %s1621_s8  ;;  %1196 = vrot.lane.b32.xlu1 %v1085_v24, %s1621_s8  ;;  %v2369_v24 = vsub.s32 1, %v2139_v15  ;;  %v1307_v30 = vsub.s32 2, %v2139_v15 }
 0x1b2   : > { %v1130_v56 = vpop.f32.mrf.mxu1 }
 0x1b4   : > { %v1132_v59 = vpop.f32.mrf.mxu1 }
 0x1b5   : > { %1204 = vrot.lane.b32.xlu1 %v1128_v31, %s1621_s8  ;;  %1198 = vrot.lane.b32.xlu0 %v1089_v33, %s1621_s8 }
 0x1b6   : > { %v1171_v22 = vpop.f32.mrf.mxu0  ;;  %v1134_v34 = vpop.f32.mrf.mxu1 }
 0x1b8   : > { %v1173_v42 = vpop.f32.mrf.mxu0 }
 0x1b9   : > { %1200 = vrot.lane.b32.xlu1 %v1087_v60, %s1621_s8  ;;  %1206 = vrot.lane.b32.xlu0 %v1132_v59, %s1621_s8 }
 0x1ba   : > { %v1175_v43 = vpop.f32.mrf.mxu0 }
 0x1bc   : > { %v1177_v8 = vpop.f32.mrf.mxu0 }
 0x1bd   : > { %1208 = vrot.lane.b32.xlu1 %v1130_v56, %s1621_s8  ;;  %1202 = vrot.lane.b32.xlu0 %v1091_v21, %s1621_s8 }
 0x1c1   : > { %1210 = vrot.lane.b32.xlu0 %v1134_v34, %s1621_s8  ;;  %1212 = vrot.lane.b32.xlu1 %v1171_v22, %s1621_s8  ;;  %v1300_v22 = vrot.slane %v2154_v53, %v2370_v23 }
 0x1c5   : > { %1216 = vrot.lane.b32.xlu1 %v1173_v42, %s1621_s8  ;;  %1214 = vrot.lane.b32.xlu0 %v1175_v43, %s1621_s8  ;;  %v1304_v42 = vrot.slane %v2154_v53, %v2369_v24 }
 0x1c9   : > { %1218 = vrot.lane.b32.xlu0 %v1177_v8, %s1621_s8 }
 0x1cf   : > { %v654_v27 = vpop.permute.xlu0 %653 }
 0x1d3   : > { %v656_v26 = vpop.permute.xlu1 %655 }
 0x1d7   : > { %v662_v35 = vpop.permute.xlu0 %661 }
 0x1db   : > { %v2106_v28 = vpop.permute.xlu1 %663  ;;  %v658_v39 = vpop.permute.xlu0 %657 }
 0x1dc   : > { %v710_v11 = vsel %vm693_vm3, %v654_v27, %v658_v39  ;;  %v708_v60 = vsel %vm693_vm3, %v658_v39, %v662_v35 }
 0x1dd   : > { %v938_v31 = vadd.f32 %v2041_v17, %v710_v11  ;;  %v1308_v11 = vrot.slane %v2154_v53, %v1307_v30 }
 0x1df   : > { %v660_v36 = vpop.permute.xlu1 %659  ;;  %v2110_v47 = vpop.permute.xlu0 %665 }
 0x1e0   : > { %v706_v39 = vsel %vm693_vm3, %v662_v35, %v2110_v47 }
 0x1e1   : > { %v940_v23 = vadd.f32 %v2049_v51, %v706_v39 }
 0x1e3   : > { %v2108_v40 = vpop.permute.xlu1 %667  ;;  %v2114_v49 = vpop.permute.xlu0 %669 }
 0x1e7   : > { %v2112_v48 = vpop.permute.xlu1 %671  ;;  %v2118_v10 = vpop.permute.xlu0 %677 }
 0x1eb   : > { %v2116_v50 = vpop.permute.xlu1 %679  ;;  %v2122_v25 = vpop.permute.xlu0 %673 }
 0x1ef   : > { %v2120_v14 = vpop.permute.xlu1 %675  ;;  %v2126_v38 = vpop.permute.xlu0 %681 }
 0x1f3   : > { %v2124_v37 = vpop.permute.xlu1 %683  ;;  %v2130_v46 = vpop.permute.xlu0 %685 }
 0x1f7   : > { %v2128_v41 = vpop.permute.xlu1 %687  ;;  %v2136_v7 = vpop.permute.xlu0 %689 }
 0x1f8   : > { %v712_v12 = vsel %vm693_vm3, %v2136_v7, %v654_v27  ;;  %v939_v27 = vadd.f32 %v2047_v32, %v708_v60 }
 0x1f9   : > { %v937_v33 = vadd.f32 %v2037_v3, %v712_v12  ;;  %v711_v3 = vsel %vm693_vm3, %v656_v26, %v660_v36  ;;  %v1311_v12 = vsub.s32 3, %v2139_v15 }
 0x1fa   : > { %v948_v35 = vadd.f32 %v2052_v52, %v711_v3 }
 0x1fb   : > { %v2132_v57 = vpop.permute.xlu1 %691 }
 0x1fc   : > { %v713_v21 = vsel %vm693_vm3, %v2132_v57, %v656_v26  ;;  %v709_v26 = vsel %vm693_vm3, %v660_v36, %v2106_v28 }
 0x1fd   : > { %v949_v52 = vadd.f32 %v2054_v55, %v709_v26 }
 0x211   : > { %v2134_v18 = vpop.permute.xlu1 %1180 }
 0x215   : > { %v2142_v19 = vpop.permute.xlu0 %1182 }
 0x217   : > { %v1189_v20 = vpop.permute.xlu1 %1188 }
 0x21b   : > { %v1185_v56 = vpop.permute.xlu1 %1184  ;;  %v1191_v59 = vpop.permute.xlu0 %1190 }
 0x21c   : > { %v1235_v34 = vsel %vm1220_vm4, %v1185_v56, %v1189_v20  ;;  %v1237_v17 = vsel %vm1220_vm4, %v2134_v18, %v1185_v56  ;;  %v947_v56 = vadd.f32 %v2045_v29, %v713_v21 }
 0x21d   : > { %v1241_v43 = vadd.f32 %v1237_v17, %v937_v33  ;;  %v1242_v8 = vadd.f32 %v1235_v34, %v938_v31 }
 0x21f   : > { %v1273_v24 = vadd.f32 %v2104_v9, %v1241_v43  ;;  %v1274_v31 = vadd.f32 %v2104_v9, %v1242_v8  ;;  %v1193_v33 = vpop.permute.xlu1 %1192  ;;  %v1187_v32 = vpop.permute.xlu0 %1186  ;;  %v1312_v8 = vrot.slane %v2154_v53, %v1311_v12 }
 0x220   : > { %v1233_v36 = vsel %vm1220_vm4, %v1189_v20, %v1193_v33  ;;  %v1236_v29 = vsel %vm1220_vm4, %v1187_v32, %v1191_v59  ;;  %v1238_v30 = vsel %vm1220_vm4, %v2142_v19, %v1187_v32 }
 0x221   : > { %v1347_v60 = vmul.f32 %v1300_v22, %v1273_v24  ;;  %v1348_v21 = vmul.f32 %v1304_v42, %v1274_v31  ;;  %v1243_v34 = vadd.f32 %v1233_v36, %v939_v27  ;;  %v1251_v17 = vadd.f32 %v1238_v30, %v947_v56 }
 0x222   : > { %v1252_v43 = vadd.f32 %v1236_v29, %v948_v35  ;;  %v707_v27 = vsel %vm693_vm3, %v2106_v28, %v2108_v40  ;;  %v704_v28 = vsel %vm693_vm3, %v2110_v47, %v2114_v49  ;;  %v1315_v47 = vsub.s32 4, %v2139_v15 }
 0x223   : > { %1367 = vst [vmem:[%s2194_s14] sm:$0xff] %v1347_v60  ;;  %1368 = vst [vmem:[%s2194_s14 + $0x8] sm:$0xff] %v1348_v21  ;;  %v1275_v20 = vadd.f32 %v2104_v9, %v1243_v34  ;;  %v1283_v3 = vadd.f32 %v2102_v13, %v1251_v17  ;;  %v1195_v32 = vpop.permute.xlu0 %1194  ;;  %v1197_v24 = vpop.permute.xlu1 %1196  ;;  %v950_v36 = vadd.f32 %v2060_v62, %v707_v27  ;;  %v1323_v17 = vsub.s32 6, %v2139_v15 }
 0x224   : > { %v1284_v12 = vadd.f32 %v2102_v13, %v1252_v43  ;;  %v1234_v51 = vsel %vm1220_vm4, %v1191_v59, %v1195_v32  ;;  %v1231_v55 = vsel %vm1220_vm4, %v1193_v33, %v1197_v24  ;;  %v702_v62 = vsel %vm693_vm3, %v2114_v49, %v2122_v25 }
 0x225   : > { %v1349_v39 = vmul.f32 %v1308_v11, %v1275_v20  ;;  %v1357_v26 = vmul.f32 %v1300_v22, %v1283_v3  ;;  %v1253_v56 = vadd.f32 %v1234_v51, %v949_v52  ;;  %v1244_v31 = vadd.f32 %v1231_v55, %v940_v23 }
 0x226   : > { %v1358_v35 = vmul.f32 %v1304_v42, %v1284_v12  ;;  %v1319_v22 = vsub.s32 5, %v2139_v15  ;;  %v941_v34 = vadd.f32 %v2056_v58, %v704_v28  ;;  %v1327_v43 = vsub.s32 7, %v2139_v15 }
 0x227   : > { %1369 = vst [vmem:[%s2194_s14 + $0x10] sm:$0xff] %v1349_v39  ;;  %1377 = vst [vmem:[%s2194_s14 + $0x50] sm:$0xff] %v1357_v26  ;;  %v1285_v59 = vadd.f32 %v2102_v13, %v1253_v56  ;;  %v1276_v29 = vadd.f32 %v2104_v9, %v1244_v31  ;;  %v1205_v30 = vpop.permute.xlu1 %1204  ;;  %v1199_v33 = vpop.permute.xlu0 %1198  ;;  %v705_v49 = vsel %vm693_vm3, %v2108_v40, %v2112_v48 }
 0x228   : > { %1378 = vst [vmem:[%s2194_s14 + $0x58] sm:$0xff] %v1358_v35  ;;  %v1232_v23 = vsel %vm1220_vm4, %v1195_v32, %v1199_v33  ;;  %v700_v52 = vsel %vm693_vm3, %v2122_v25, %v2118_v10  ;;  %v1316_v32 = vrot.slane %v2154_v53, %v1315_v47  ;;  %v1320_v27 = vrot.slane %v2154_v53, %v1319_v22 }
 0x229   : > { %v1359_v42 = vmul.f32 %v1308_v11, %v1285_v59  ;;  %v1350_v60 = vmul.f32 %v1312_v8, %v1276_v29  ;;  %v1254_v21 = vadd.f32 %v1232_v23, %v950_v36  ;;  %v942_v11 = vadd.f32 %v2058_v61, %v702_v62 }
 0x22a   : > { %v703_v61 = vsel %vm693_vm3, %v2112_v48, %v2120_v14  ;;  %v951_v39 = vadd.f32 %v2062_v63, %v705_v49  ;;  %v943_v26 = vadd.f32 %v2064_v0, %v700_v52  ;;  %v1324_v56 = vrot.slane %v2154_v53, %v1323_v17 }
 0x22b   : > { %1379 = vst [vmem:[%s2194_s14 + $0x60] sm:$0xff] %v1359_v42  ;;  %1370 = vst [vmem:[%s2194_s14 + $0x18] sm:$0xff] %v1350_v60  ;;  %v1286_v58 = vadd.f32 %v2102_v13, %v1254_v21  ;;  %v1201_v20 = vpop.permute.xlu1 %1200  ;;  %v1207_v3 = vpop.permute.xlu0 %1206  ;;  %v2267_v31 = vrot.slane %v2154_v53, %v1327_v43  ;;  %v701_v48 = vsel %vm693_vm3, %v2120_v14, %v2116_v50  ;;  %v1294_v53 = vld [vmem:[%s2365_s1 + $0x8] sm:$0x3] }
 0x22c   : > { %v1227_v40 = vsel %vm1220_vm4, %v1201_v20, %v1205_v30  ;;  %v1229_v12 = vsel %vm1220_vm4, %v1197_v24, %v1201_v20  ;;  %v698_v24 = vsel %vm693_vm3, %v2118_v10, %v2126_v38  ;;  %v952_v10 = vadd.f32 %v2068_v1, %v703_v61 }
 0x22d   : > { %v1360_v25 = vmul.f32 %v1312_v8, %v1286_v58  ;;  %v1245_v51 = vadd.f32 %v1229_v12, %v941_v34  ;;  %v1246_v55 = vadd.f32 %v1227_v40, %v942_v11  ;;  %v944_v47 = vadd.f32 %v2066_v45, %v698_v24 }
 0x22e   : > { %v953_v22 = vadd.f32 %v2070_v44, %v701_v48  ;;  %v2371_v1 = vsub.s32 0, %v2139_v15 }
 0x22f   : > { %1380 = vst [vmem:[%s2194_s14 + $0x68] sm:$0xff] %v1360_v25  ;;  %v1277_v63 = vadd.f32 %v2104_v9, %v1245_v51  ;;  %v1278_v0 = vadd.f32 %v2104_v9, %v1246_v55  ;;  %v1209_v8 = vpop.permute.xlu1 %1208  ;;  %v1203_v35 = vpop.permute.xlu0 %1202 }
 0x230   : > { %v1225_v36 = vsel %vm1220_vm4, %v1205_v30, %v1209_v8  ;;  %v1228_v14 = vsel %vm1220_vm4, %v1203_v35, %v1207_v3  ;;  %v1230_v28 = vsel %vm1220_vm4, %v1199_v33, %v1203_v35  ;;  %v1332_v60 = vrot.slane %v1294_v53, %v2371_v1 }
 0x231   : > { %v1351_v59 = vmul.f32 %v1316_v32, %v1277_v63  ;;  %v1352_v29 = vmul.f32 %v1320_v27, %v1278_v0  ;;  %v1247_v62 = vadd.f32 %v1225_v36, %v943_v26  ;;  %v1255_v23 = vadd.f32 %v1230_v28, %v951_v39 }
 0x232   : > { %v1256_v42 = vadd.f32 %v1228_v14, %v952_v10  ;;  %v699_v30 = vsel %vm693_vm3, %v2116_v50, %v2124_v37  ;;  %v696_v33 = vsel %vm693_vm3, %v2126_v38, %v2130_v46  ;;  %v694_v50 = vsel %vm693_vm3, %v2130_v46, %v2136_v7 }
 0x233   : > { %1371 = vst [vmem:[%s2194_s14 + $0x20] sm:$0xff] %v1351_v59  ;;  %1372 = vst [vmem:[%s2194_s14 + $0x28] sm:$0xff] %v1352_v29  ;;  %v1279_v45 = vadd.f32 %v2104_v9, %v1247_v62  ;;  %v1287_v44 = vadd.f32 %v2102_v13, %v1255_v23  ;;  %v1211_v21 = vpop.permute.xlu0 %1210  ;;  %v1213_v34 = vpop.permute.xlu1 %1212  ;;  %v954_v20 = vadd.f32 %v2076_v5, %v699_v30  ;;  %v2372_v46 = vsub.s32 1, %v2139_v15 }
 0x234   : > { %v1288_v17 = vadd.f32 %v2102_v13, %v1256_v42  ;;  %v1226_v38 = vsel %vm1220_vm4, %v1207_v3, %v1211_v21  ;;  %v1223_v43 = vsel %vm1220_vm4, %v1209_v8, %v1213_v34  ;;  %v945_v40 = vadd.f32 %v2072_v2, %v696_v33 }
 0x235   : > { %v1353_v49 = vmul.f32 %v1324_v56, %v1279_v45  ;;  %v1361_v52 = vmul.f32 %v1316_v32, %v1287_v44  ;;  %v1257_v11 = vadd.f32 %v1226_v38, %v953_v22  ;;  %v1248_v58 = vadd.f32 %v1223_v43, %v944_v47 }
 0x236   : > { %v1362_v12 = vmul.f32 %v1320_v27, %v1288_v17  ;;  %v1336_v7 = vrot.slane %v1294_v53, %v2372_v46  ;;  %v946_v61 = vadd.f32 %v2074_v4, %v694_v50  ;;  %v697_v3 = vsel %vm693_vm3, %v2124_v37, %v2128_v41 }
 0x237   : > { %1373 = vst [vmem:[%s2194_s14 + $0x30] sm:$0xff] %v1353_v49  ;;  %1381 = vst [vmem:[%s2194_s14 + $0x70] sm:$0xff] %v1361_v52  ;;  %v1289_v32 = vadd.f32 %v2102_v13, %v1257_v11  ;;  %v1280_v5 = vadd.f32 %v2104_v9, %v1248_v58  ;;  %v1217_v2 = vpop.permute.xlu1 %1216  ;;  %v1215_v27 = vpop.permute.xlu0 %1214  ;;  %v695_v4 = vsel %vm693_vm3, %v2128_v41, %v2132_v57 }
 0x238   : > { %1382 = vst [vmem:[%s2194_s14 + $0x78] sm:$0xff] %v1362_v12  ;;  %v1221_v15 = vsel %vm1220_vm4, %v1213_v34, %v1217_v2  ;;  %v1239_v37 = vsel %vm1220_vm4, %v1217_v2, %v2134_v18  ;;  %v1224_v25 = vsel %vm1220_vm4, %v1211_v21, %v1215_v27  ;;  %v955_v41 = vadd.f32 %v2078_v6, %v697_v3 }
 0x239   : > { %v1363_v51 = vmul.f32 %v1324_v56, %v1289_v32  ;;  %v1354_v55 = vmul.f32 %v2267_v31, %v1280_v5  ;;  %v1249_v39 = vadd.f32 %v1221_v15, %v945_v40  ;;  %v1250_v26 = vadd.f32 %v1239_v37, %v946_v61 }
 0x23a   : > { %v1258_v24 = vadd.f32 %v1224_v25, %v954_v20  ;;  %v956_v57 = vadd.f32 %v2081_v16, %v695_v4 }
 0x23b   : > { %1383 = vst [vmem:[%s2194_s14 + $0x80] sm:$0xff] %v1363_v51  ;;  %1374 = vst [vmem:[%s2194_s14 + $0x38] sm:$0xff] %v1354_v55  ;;  %v1281_v18 = vadd.f32 %v2104_v9, %v1249_v39  ;;  %v1282_v48 = vadd.f32 %v2104_v9, %v1250_v26  ;;  %v1219_v63 = vpop.permute.xlu0 %1218 }
 0x23c   : > { %v1290_v56 = vadd.f32 %v2102_v13, %v1258_v24  ;;  %v1222_v0 = vsel %vm1220_vm4, %v1215_v27, %v1219_v63  ;;  %v1240_v6 = vsel %vm1220_vm4, %v1219_v63, %v2142_v19 }
 0x23d   : > { %v1355_v16 = vmul.f32 %v1332_v60, %v1281_v18  ;;  %v1356_v8 = vmul.f32 %v1336_v7, %v1282_v48  ;;  %v1259_v35 = vadd.f32 %v1222_v0, %v955_v41  ;;  %v1260_v53 = vadd.f32 %v1240_v6, %v956_v57 }
 0x23e   : > { %v1364_v10 = vmul.f32 %v2267_v31, %v1290_v56 }
 0x23f   : > { %1375 = vst [vmem:[%s2194_s14 + $0x40] sm:$0xff] %v1355_v16  ;;  %1376 = vst [vmem:[%s2194_s14 + $0x48] sm:$0xff] %v1356_v8  ;;  %v1291_v9 = vadd.f32 %v2102_v13, %v1259_v35  ;;  %v1292_v36 = vadd.f32 %v2102_v13, %v1260_v53 }
 0x240   : > { %1384 = vst [vmem:[%s2194_s14 + $0x88] sm:$0xff] %v1364_v10 }
 0x241   : > { %v1365_v14 = vmul.f32 %v1332_v60, %v1291_v9  ;;  %v1366_v28 = vmul.f32 %v1336_v7, %v1292_v36 }
 0x243   : > { %1385 = vst [vmem:[%s2194_s14 + $0x90] sm:$0xff] %v1365_v14  ;;  %1386 = vst [vmem:[%s2194_s14 + $0x98] sm:$0xff] %v1366_v28 }
 0x244 PF: > { %s14_s15 = sadd.s32 1, %s1615_s15  }
 0x245   : > { %p11_p4 = scmp.ge.s32.totalorder %s14_s15, 4  }
 0x247   :  { %13 = sbr.rel (!%p11_p4) target bundleno = 1 (0x1), region = 66 }

</bundles_post_ra>
